<compile_context>
chip_gen: v7x
topology: tpu7x:2x2x1
jax: 0.10.0
libtpu: 0.0.40
codegen_flags: <defaults>
</compile_context>

<pallas_src>
import jax
import jax.numpy as jnp
from jax import lax
from jax.experimental import pallas as pl
from jax.experimental.pallas import tpu as pltpu


def _round_up(x, m):
    return (x + m - 1) // m * m


def _vmem_capacity_bytes():
    """Per-core VMEM capacity; conservative fallback = v7x 64 MiB per TensorCore."""
    try:
        cap = getattr(pltpu.get_tpu_info(), "vmem_capacity_bytes", None)
        if cap:
            return int(cap)
    except Exception:
        pass
    return 64 * 1024 * 1024


# ------------------------------ fused Pallas kernel ------------------------------ #

def _make_encoder_kernel(n_layers, offsets, Lc, center_pad, shift, CP, LT):
    """Builds the fused HeatEncoder kernel body (one batch sample per grid step).

    Refs seen by the kernel:
      x_ref    : (CP, LT)     bf16  zero-padded input volume, flattened (d,h,w) on lanes,
                                    pre-shifted so padded flat index q sits at lane shift+q
      mask_ref : (1, Lc)      f32   1.0 where a conv "base" position is a real output voxel
      w_l      : (Co, 27*CP)  bf16  im2col-flattened weights (resident)
      b_l      : (Co, 1)      f32
      o_ref    : (Cout, Lc)   f32   lane-dense output tile
      a_scr    : (CP, LT)     bf16  padded activation of the current layer (VMEM scratch)
      stage    : (27*CP, Lc)  bf16  in-VMEM im2col staging tile (contraction axis)
    """
    n_halo = center_pad
    n_tail = LT - center_pad - Lc

    def kernel(x_ref, mask_ref, *args):
        wb = args[: 2 * n_layers]
        o_ref = args[2 * n_layers]
        a_scr = args[2 * n_layers + 1]
        stage = args[2 * n_layers + 2]

        mask = mask_ref[...]                                     # (1, Lc) f32

        def stage_taps(src_ref):
            # im2col: stack the 27 shifted (CP, Lc) bf16 views on the contraction axis.
            # TODO(synk): the 27 lane-shifted reads could be reduced to 9 distinct shifts
            # by grouping taps by kd (depth on sublanes) if this ever shows up as XLU-bound.
            for k, off in enumerate(offsets):
                stage[k * CP:(k + 1) * CP, :] = \
                    src_ref[:, shift + off: shift + off + Lc]

        def conv(w_ref):                                         # single big-K MXU matmul
            return jnp.dot(w_ref[...], stage[...],
                           preferred_element_type=jnp.float32)   # (Co, Lc) f32

        def store_act(h_f32):                                    # lane-aligned bf16 store
            a_scr[:, center_pad:center_pad + Lc] = (mask * h_f32).astype(jnp.bfloat16)

        # zero only the halo / tail of the scratch (the center is fully overwritten below)
        a_scr[:, :n_halo] = jnp.zeros((CP, n_halo), jnp.bfloat16)
        if n_tail > 0:
            a_scr[:, center_pad + Lc:] = jnp.zeros((CP, n_tail), jnp.bfloat16)

        # --- preprocess: Conv3d + ReLU (downsample == 1, no MaxPool3d) ---
        stage_taps(x_ref)
        store_act(jnp.maximum(conv(wb[0]) + wb[1][...], 0.0))

        # --- residual CNN blocks: ReLU(conv(h) + h) ---
        for r in range(1, n_layers - 1):
            stage_taps(a_scr)
            res = a_scr[:, center_pad:center_pad + Lc].astype(jnp.float32)
            y = conv(wb[2 * r]) + wb[2 * r + 1][...] + res
            store_act(jnp.maximum(y, 0.0))

        # --- final Conv3d + ReLU (lane-dense f32 store) ---
        stage_taps(a_scr)
        o_ref[...] = jnp.maximum(
            conv(wb[2 * (n_layers - 1)]) + wb[2 * n_layers - 1][...], 0.0)

    return kernel


# ---------------------------------- JAX wrapper ----------------------------------- #

def heat_encoder_forward(x_ncdhw, params):
    """Forward pass: x (N, Cin, D, H, W) f32 -> (N, Cout, D, H, W) f32."""
    N, Cin, D, H, W = x_ncdhw.shape
    Dp, Hp, Wp = D + 2, H + 2, W + 2
    HWp = Hp * Wp
    Pf = Dp * HWp                               # flattened padded volume per sample
    margin = 2 * HWp + 2 * Wp + 2               # largest 3x3x3 tap offset
    center = HWp + Wp + 1                       # flat offset of the (1,1,1) tap
    center_pad = _round_up(center, 128)         # lane-aligned activation store offset
    shift = center_pad - center                 # lane pre-shift of the padded volume
    Lc = _round_up(Pf, 128)                     # lane-dense compute width (conv bases)
    LT = _round_up(shift + margin + Lc, 128)    # padded-activation lane width

    offsets = tuple(kd * HWp + kh * Wp + kw
                    for kd in range(3) for kh in range(3) for kw in range(3))

    weights, biases = params["weights"], params["biases"]
    n_layers = len(weights)
    Chid = int(weights[0].shape[1])
    Cout = int(weights[-1].shape[1])
    CP = _round_up(max(Cin, Chid), 8)           # padded channel count on the sublane axis
    K = 27 * CP                                 # im2col contraction width

    # channels-first, zero-padded, spatially flattened, lane-shifted bf16 input
    xp = jnp.pad(x_ncdhw.astype(jnp.float32),
                 ((0, 0), (0, 0), (1, 1), (1, 1), (1, 1))).reshape(N, Cin, Pf)
    xf = jnp.pad(xp, ((0, 0), (0, CP - Cin), (shift, LT - shift - Pf))
                 ).astype(jnp.bfloat16)                          # (N, CP, LT)

    def flat_weight(w27, cout_pad):                              # (27,co,ci) -> (cop, 27*CP)
        _, co, ci = w27.shape
        w = jnp.pad(w27, ((0, 0), (0, cout_pad - co), (0, CP - ci)))
        return jnp.transpose(w, (1, 0, 2)).reshape(cout_pad, K).astype(jnp.bfloat16)

    def flat_bias(bvec, cout_pad):
        return jnp.pad(bvec, (0, cout_pad - bvec.shape[0])
                       ).reshape(cout_pad, 1).astype(jnp.float32)

    # mask over conv base positions: 1.0 where base coords (d,h,w) are real output voxels
    b = jnp.arange(Lc)
    bd, bh, bw = b // HWp, (b % HWp) // Wp, b % Wp
    mask = ((bd < D) & (bh < H) & (bw < W)).astype(jnp.float32).reshape(1, Lc)

    in_specs = [
        pl.BlockSpec((None, CP, LT), lambda n: (n, 0, 0)),       # per-sample bf16 input
        pl.BlockSpec((1, Lc), lambda n: (0, 0)),                 # mask (constant over grid)
    ]
    args = [xf, mask]
    for li, (w, bvec) in enumerate(zip(weights, biases)):
        co = int(w.shape[1])
        # pad hidden Cout to CP so the activation-scratch store is always full-height
        cop = co if li == n_layers - 1 else CP
        in_specs.append(pl.BlockSpec((cop, K), lambda n: (0, 0)))
        in_specs.append(pl.BlockSpec((cop, 1), lambda n: (0, 0)))
        args.append(flat_weight(w, cop))
        args.append(flat_bias(bvec, cop))

    # --- generation-aware VMEM budget (inputs/outputs double-buffered by Pallas) ---
    nbytes = lambda a: a.size * a.dtype.itemsize
    est_vmem = (
        2 * CP * LT * 2                                   # x block (bf16)
        + 2 * Lc * 4                                      # mask
        + 2 * sum(nbytes(a) for a in args[2:])            # weights + biases
        + 2 * Cout * Lc * 4                               # output block (f32)
        + CP * LT * 2                                     # a_scr (bf16)
        + K * Lc * 2                                      # im2col stage (bf16)
        + (1 << 20)                                       # compiler-internal scratch slack
    )
    vmem_cap = _vmem_capacity_bytes()
    assert est_vmem < int(0.75 * vmem_cap), (
        f"TODO(synk): volume too large for the fully fused single-sample kernel "
        f"(~{est_vmem >> 20} MiB of ~{vmem_cap >> 20} MiB VMEM); needs spatial tiling")
    vmem_limit = max(32 * 1024 * 1024, min(int(0.75 * vmem_cap), 100 * 1024 * 1024))

    kernel = _make_encoder_kernel(n_layers, offsets, Lc, center_pad, shift, CP, LT)

    out = pl.pallas_call(
        kernel,
        out_shape=jax.ShapeDtypeStruct((N, Cout, Lc), jnp.float32),
        grid_spec=pltpu.PrefetchScalarGridSpec(
            num_scalar_prefetch=0,
            grid=(N,),                                    # one sample per step; N>=2 feeds both v7x TCs
            in_specs=in_specs,
            out_specs=pl.BlockSpec((None, Cout, Lc), lambda n: (n, 0, 0)),
            scratch_shapes=[pltpu.VMEM((CP, LT), jnp.bfloat16),   # padded activation
                            pltpu.VMEM((K, Lc), jnp.bfloat16)],   # im2col stage
        ),
        compiler_params=pltpu.CompilerParams(
            dimension_semantics=("parallel",),            # megacore-friendly (v7x)
            vmem_limit_bytes=vmem_limit,
        ),
    )(*args)

    # conv base b == unpadded voxel (d, h, w) in padded strides -> crop to (D, H, W)
    vol = out[:, :, :Pf].reshape(N, Cout, Dp, Hp, Wp)
    return vol[:, :, :D, :H, :W]


# ------------------------------- params / reference ------------------------------- #

def init_heat_encoder_params(key, input_channels, hidden_channels, output_channels,
                             layers=3):
    """Synthetic init mimicking Conv3d default (uniform +-1/sqrt(fan_in)).

    Weight layout: w[kd*9 + kh*3 + kw, cout, cin]  (torch (Cout,Cin,3,3,3) permuted
    (2,3,4,0,1) then reshaped). Real checkpoints must be permuted the same way.
    """
    def conv_params(k, cin, cout):
        bound = (27 * cin) ** -0.5
        k_w, k_b = jax.random.split(k)
        w = jax.random.uniform(k_w, (27, cout, cin), jnp.float32, -bound, bound)
        bvec = jax.random.uniform(k_b, (cout,), jnp.float32, -bound, bound)
        return w, bvec

    cins = [input_channels] + [hidden_channels] * (layers - 1)
    couts = [hidden_channels] * (layers - 1) + [output_channels]
    keys = jax.random.split(key, layers)
    ws, bs = [], []
    for k, ci, co in zip(keys, cins, couts):
        w, bvec = conv_params(k, ci, co)
        ws.append(w)
        bs.append(bvec)
    return {"weights": ws, "biases": bs}


def heat_encoder_reference(x_ncdhw, params):
    """Pure-JAX f32 reference (HIGHEST precision conv) for validation."""
    def conv3d(h, w27, bvec):
        co, ci = w27.shape[1], w27.shape[2]
        w = jnp.transpose(w27.reshape(3, 3, 3, co, ci), (3, 4, 0, 1, 2))
        y = lax.conv_general_dilated(
            h, w, window_strides=(1, 1, 1),
            padding=((1, 1), (1, 1), (1, 1)),
            dimension_numbers=("NCDHW", "OIDHW", "NCDHW"),
            precision=lax.Precision.HIGHEST)
        return y + bvec.reshape(1, -1, 1, 1, 1)

    ws, bs = params["weights"], params["biases"]
    h = jax.nn.relu(conv3d(x_ncdhw.astype(jnp.float32), ws[0], bs[0]))
    for w, bvec in zip(ws[1:-1], bs[1:-1]):
        h = jax.nn.relu(conv3d(h, w, bvec) + h)
    return jax.nn.relu(conv3d(h, ws[-1], bs[-1]))


# -------------------------------------- main --------------------------------------- #

if __name__ == "__main__":
    key = jax.random.PRNGKey(0)
    k_x, k_p = jax.random.split(key)

    N, C_IN, C_HID, C_OUT = 2, 4, 8, 4
    D = H = W = 8
    LAYERS = 3

    x = jax.random.normal(k_x, (N, C_IN, D, H, W), jnp.float32)     # NCDHW
    params = init_heat_encoder_params(k_p, C_IN, C_HID, C_OUT, layers=LAYERS)

    fwd = jax.jit(heat_encoder_forward)
    y = jax.block_until_ready(fwd(x, params))

    assert y.shape == (N, C_OUT, D, H, W), y.shape
    assert bool(jnp.all(jnp.isfinite(y)))
    assert bool(jnp.all(y >= 0.0))                                   # final ReLU

    # numerical check vs pure-JAX f32 reference (kernel uses bf16 MXU operands/activations)
    y_ref = jax.block_until_ready(heat_encoder_reference(x, params))
    max_err = float(jnp.max(jnp.abs(y - y_ref)))
    assert max_err < 0.1, f"max abs err vs reference = {max_err}"

    print("KERNEL_OK")
</pallas_src>

<mosaic_0001>
module attributes {stable_mosaic.version = 11 : i64} {
  func.func @kernel(%arg0: i32, %arg1: memref<1x8x1280xbf16, #tpu.memory_space<vmem>>, %arg2: memref<1x1024xf32, #tpu.memory_space<vmem>>, %arg3: memref<8x216xbf16, #tpu.memory_space<vmem>>, %arg4: memref<8x1xf32, #tpu.memory_space<vmem>>, %arg5: memref<8x216xbf16, #tpu.memory_space<vmem>>, %arg6: memref<8x1xf32, #tpu.memory_space<vmem>>, %arg7: memref<4x216xbf16, #tpu.memory_space<vmem>>, %arg8: memref<4x1xf32, #tpu.memory_space<vmem>>, %arg9: memref<1x4x1024xf32, #tpu.memory_space<vmem>>, %arg10: memref<8x1280xbf16, #tpu.memory_space<vmem>>, %arg11: memref<216x1024xbf16, #tpu.memory_space<vmem>>) attributes {dimension_semantics = [#tpu.dimension_semantics<parallel>], iteration_bounds = array<i64: 2>, scalar_prefetch = 0 : i64, scratch_operands = 2 : i64, tpu.core_type = #tpu.core_type<tc>, window_params = [{transform_indices = @transform_0, window_bounds = array<i64: 1, 8, 1280>}, {pipeline_mode = #tpu.pipeline_mode<synchronous>, transform_indices = @transform_1, window_bounds = array<i64: 1, 1024>}, {pipeline_mode = #tpu.pipeline_mode<synchronous>, transform_indices = @transform_2, window_bounds = array<i64: 8, 216>}, {pipeline_mode = #tpu.pipeline_mode<synchronous>, transform_indices = @transform_3, window_bounds = array<i64: 8, 1>}, {pipeline_mode = #tpu.pipeline_mode<synchronous>, transform_indices = @transform_4, window_bounds = array<i64: 8, 216>}, {pipeline_mode = #tpu.pipeline_mode<synchronous>, transform_indices = @transform_5, window_bounds = array<i64: 8, 1>}, {pipeline_mode = #tpu.pipeline_mode<synchronous>, transform_indices = @transform_6, window_bounds = array<i64: 4, 216>}, {pipeline_mode = #tpu.pipeline_mode<synchronous>, transform_indices = @transform_7, window_bounds = array<i64: 4, 1>}, {transform_indices = @transform_8, window_bounds = array<i64: 1, 4, 1024>}]} {
    %c0 = arith.constant 0 : index
    %c0_0 = arith.constant 0 : index
    %0 = vector.load %arg2[%c0, %c0_0] : memref<1x1024xf32, #tpu.memory_space<vmem>>, vector<1x1024xf32>
    %cst = arith.constant 0.000000e+00 : bf16
    %1 = vector.broadcast %cst : bf16 to vector<8x128xbf16>
    %c0_1 = arith.constant 0 : index
    %c0_2 = arith.constant 0 : index
    %2 = vector.load %arg10[%c0_1, %c0_2] : memref<8x1280xbf16, #tpu.memory_space<vmem>>, vector<8x128xbf16>
    tpu.vector_store %arg10[%c0_1, %c0_2], %1 {strides = array<i32>} : memref<8x1280xbf16, #tpu.memory_space<vmem>>, vector<8x128xbf16>,
    %cst_3 = arith.constant 0.000000e+00 : bf16
    %3 = vector.broadcast %cst_3 : bf16 to vector<8x128xbf16>
    %c0_4 = arith.constant 0 : index
    %c1152 = arith.constant 1152 : index
    %4 = vector.load %arg10[%c0_4, %c1152] : memref<8x1280xbf16, #tpu.memory_space<vmem>>, vector<8x128xbf16>
    tpu.vector_store %arg10[%c0_4, %c1152], %3 {strides = array<i32>} : memref<8x1280xbf16, #tpu.memory_space<vmem>>, vector<8x128xbf16>,
    %c0_5 = arith.constant 0 : index
    %c0_6 = arith.constant 0 : index
    %c17 = arith.constant 17 : index
    %5 = vector.load %arg1[%c0_5, %c0_6, %c17] : memref<1x8x1280xbf16, #tpu.memory_space<vmem>>, vector<1x8x1024xbf16>
    %6 = vector.shape_cast %5 : vector<1x8x1024xbf16> to vector<8x1024xbf16>
    %c0_7 = arith.constant 0 : index
    %c0_8 = arith.constant 0 : index
    %7 = vector.load %arg11[%c0_7, %c0_8] : memref<216x1024xbf16, #tpu.memory_space<vmem>>, vector<8x1024xbf16>
    tpu.vector_store %arg11[%c0_7, %c0_8], %6 {strides = array<i32>} : memref<216x1024xbf16, #tpu.memory_space<vmem>>, vector<8x1024xbf16>,
    %c0_9 = arith.constant 0 : index
    %c0_10 = arith.constant 0 : index
    %c18 = arith.constant 18 : index
    %8 = vector.load %arg1[%c0_9, %c0_10, %c18] : memref<1x8x1280xbf16, #tpu.memory_space<vmem>>, vector<1x8x1024xbf16>
    %9 = vector.shape_cast %8 : vector<1x8x1024xbf16> to vector<8x1024xbf16>
    %c8 = arith.constant 8 : index
    %c0_11 = arith.constant 0 : index
    %10 = vector.load %arg11[%c8, %c0_11] : memref<216x1024xbf16, #tpu.memory_space<vmem>>, vector<8x1024xbf16>
    tpu.vector_store %arg11[%c8, %c0_11], %9 {strides = array<i32>} : memref<216x1024xbf16, #tpu.memory_space<vmem>>, vector<8x1024xbf16>,
    %c0_12 = arith.constant 0 : index
    %c0_13 = arith.constant 0 : index
    %c19 = arith.constant 19 : index
    %11 = vector.load %arg1[%c0_12, %c0_13, %c19] : memref<1x8x1280xbf16, #tpu.memory_space<vmem>>, vector<1x8x1024xbf16>
    %12 = vector.shape_cast %11 : vector<1x8x1024xbf16> to vector<8x1024xbf16>
    %c16 = arith.constant 16 : index
    %c0_14 = arith.constant 0 : index
    %13 = vector.load %arg11[%c16, %c0_14] : memref<216x1024xbf16, #tpu.memory_space<vmem>>, vector<8x1024xbf16>
    tpu.vector_store %arg11[%c16, %c0_14], %12 {strides = array<i32>} : memref<216x1024xbf16, #tpu.memory_space<vmem>>, vector<8x1024xbf16>,
    %c0_15 = arith.constant 0 : index
    %c0_16 = arith.constant 0 : index
    %c27 = arith.constant 27 : index
    %14 = vector.load %arg1[%c0_15, %c0_16, %c27] : memref<1x8x1280xbf16, #tpu.memory_space<vmem>>, vector<1x8x1024xbf16>
    %15 = vector.shape_cast %14 : vector<1x8x1024xbf16> to vector<8x1024xbf16>
    %c24 = arith.constant 24 : index
    %c0_17 = arith.constant 0 : index
    %16 = vector.load %arg11[%c24, %c0_17] : memref<216x1024xbf16, #tpu.memory_space<vmem>>, vector<8x1024xbf16>
    tpu.vector_store %arg11[%c24, %c0_17], %15 {strides = array<i32>} : memref<216x1024xbf16, #tpu.memory_space<vmem>>, vector<8x1024xbf16>,
    %c0_18 = arith.constant 0 : index
    %c0_19 = arith.constant 0 : index
    %c28 = arith.constant 28 : index
    %17 = vector.load %arg1[%c0_18, %c0_19, %c28] : memref<1x8x1280xbf16, #tpu.memory_space<vmem>>, vector<1x8x1024xbf16>
    %18 = vector.shape_cast %17 : vector<1x8x1024xbf16> to vector<8x1024xbf16>
    %c32 = arith.constant 32 : index
    %c0_20 = arith.constant 0 : index
    %19 = vector.load %arg11[%c32, %c0_20] : memref<216x1024xbf16, #tpu.memory_space<vmem>>, vector<8x1024xbf16>
    tpu.vector_store %arg11[%c32, %c0_20], %18 {strides = array<i32>} : memref<216x1024xbf16, #tpu.memory_space<vmem>>, vector<8x1024xbf16>,
    %c0_21 = arith.constant 0 : index
    %c0_22 = arith.constant 0 : index
    %c29 = arith.constant 29 : index
    %20 = vector.load %arg1[%c0_21, %c0_22, %c29] : memref<1x8x1280xbf16, #tpu.memory_space<vmem>>, vector<1x8x1024xbf16>
    %21 = vector.shape_cast %20 : vector<1x8x1024xbf16> to vector<8x1024xbf16>
    %c40 = arith.constant 40 : index
    %c0_23 = arith.constant 0 : index
    %22 = vector.load %arg11[%c40, %c0_23] : memref<216x1024xbf16, #tpu.memory_space<vmem>>, vector<8x1024xbf16>
    tpu.vector_store %arg11[%c40, %c0_23], %21 {strides = array<i32>} : memref<216x1024xbf16, #tpu.memory_space<vmem>>, vector<8x1024xbf16>,
    %c0_24 = arith.constant 0 : index
    %c0_25 = arith.constant 0 : index
    %c37 = arith.constant 37 : index
    %23 = vector.load %arg1[%c0_24, %c0_25, %c37] : memref<1x8x1280xbf16, #tpu.memory_space<vmem>>, vector<1x8x1024xbf16>
    %24 = vector.shape_cast %23 : vector<1x8x1024xbf16> to vector<8x1024xbf16>
    %c48 = arith.constant 48 : index
    %c0_26 = arith.constant 0 : index
    %25 = vector.load %arg11[%c48, %c0_26] : memref<216x1024xbf16, #tpu.memory_space<vmem>>, vector<8x1024xbf16>
    tpu.vector_store %arg11[%c48, %c0_26], %24 {strides = array<i32>} : memref<216x1024xbf16, #tpu.memory_space<vmem>>, vector<8x1024xbf16>,
    %c0_27 = arith.constant 0 : index
    %c0_28 = arith.constant 0 : index
    %c38 = arith.constant 38 : index
    %26 = vector.load %arg1[%c0_27, %c0_28, %c38] : memref<1x8x1280xbf16, #tpu.memory_space<vmem>>, vector<1x8x1024xbf16>
    %27 = vector.shape_cast %26 : vector<1x8x1024xbf16> to vector<8x1024xbf16>
    %c56 = arith.constant 56 : index
    %c0_29 = arith.constant 0 : index
    %28 = vector.load %arg11[%c56, %c0_29] : memref<216x1024xbf16, #tpu.memory_space<vmem>>, vector<8x1024xbf16>
    tpu.vector_store %arg11[%c56, %c0_29], %27 {strides = array<i32>} : memref<216x1024xbf16, #tpu.memory_space<vmem>>, vector<8x1024xbf16>,
    %c0_30 = arith.constant 0 : index
    %c0_31 = arith.constant 0 : index
    %c39 = arith.constant 39 : index
    %29 = vector.load %arg1[%c0_30, %c0_31, %c39] : memref<1x8x1280xbf16, #tpu.memory_space<vmem>>, vector<1x8x1024xbf16>
    %30 = vector.shape_cast %29 : vector<1x8x1024xbf16> to vector<8x1024xbf16>
    %c64 = arith.constant 64 : index
    %c0_32 = arith.constant 0 : index
    %31 = vector.load %arg11[%c64, %c0_32] : memref<216x1024xbf16, #tpu.memory_space<vmem>>, vector<8x1024xbf16>
    tpu.vector_store %arg11[%c64, %c0_32], %30 {strides = array<i32>} : memref<216x1024xbf16, #tpu.memory_space<vmem>>, vector<8x1024xbf16>,
    %c0_33 = arith.constant 0 : index
    %c0_34 = arith.constant 0 : index
    %c117 = arith.constant 117 : index
    %32 = vector.load %arg1[%c0_33, %c0_34, %c117] : memref<1x8x1280xbf16, #tpu.memory_space<vmem>>, vector<1x8x1024xbf16>
    %33 = vector.shape_cast %32 : vector<1x8x1024xbf16> to vector<8x1024xbf16>
    %c72 = arith.constant 72 : index
    %c0_35 = arith.constant 0 : index
    %34 = vector.load %arg11[%c72, %c0_35] : memref<216x1024xbf16, #tpu.memory_space<vmem>>, vector<8x1024xbf16>
    tpu.vector_store %arg11[%c72, %c0_35], %33 {strides = array<i32>} : memref<216x1024xbf16, #tpu.memory_space<vmem>>, vector<8x1024xbf16>,
    %c0_36 = arith.constant 0 : index
    %c0_37 = arith.constant 0 : index
    %c118 = arith.constant 118 : index
    %35 = vector.load %arg1[%c0_36, %c0_37, %c118] : memref<1x8x1280xbf16, #tpu.memory_space<vmem>>, vector<1x8x1024xbf16>
    %36 = vector.shape_cast %35 : vector<1x8x1024xbf16> to vector<8x1024xbf16>
    %c80 = arith.constant 80 : index
    %c0_38 = arith.constant 0 : index
    %37 = vector.load %arg11[%c80, %c0_38] : memref<216x1024xbf16, #tpu.memory_space<vmem>>, vector<8x1024xbf16>
    tpu.vector_store %arg11[%c80, %c0_38], %36 {strides = array<i32>} : memref<216x1024xbf16, #tpu.memory_space<vmem>>, vector<8x1024xbf16>,
    %c0_39 = arith.constant 0 : index
    %c0_40 = arith.constant 0 : index
    %c119 = arith.constant 119 : index
    %38 = vector.load %arg1[%c0_39, %c0_40, %c119] : memref<1x8x1280xbf16, #tpu.memory_space<vmem>>, vector<1x8x1024xbf16>
    %39 = vector.shape_cast %38 : vector<1x8x1024xbf16> to vector<8x1024xbf16>
    %c88 = arith.constant 88 : index
    %c0_41 = arith.constant 0 : index
    %40 = vector.load %arg11[%c88, %c0_41] : memref<216x1024xbf16, #tpu.memory_space<vmem>>, vector<8x1024xbf16>
    tpu.vector_store %arg11[%c88, %c0_41], %39 {strides = array<i32>} : memref<216x1024xbf16, #tpu.memory_space<vmem>>, vector<8x1024xbf16>,
    %c0_42 = arith.constant 0 : index
    %c0_43 = arith.constant 0 : index
    %c127 = arith.constant 127 : index
    %41 = vector.load %arg1[%c0_42, %c0_43, %c127] : memref<1x8x1280xbf16, #tpu.memory_space<vmem>>, vector<1x8x1024xbf16>
    %42 = vector.shape_cast %41 : vector<1x8x1024xbf16> to vector<8x1024xbf16>
    %c96 = arith.constant 96 : index
    %c0_44 = arith.constant 0 : index
    %43 = vector.load %arg11[%c96, %c0_44] : memref<216x1024xbf16, #tpu.memory_space<vmem>>, vector<8x1024xbf16>
    tpu.vector_store %arg11[%c96, %c0_44], %42 {strides = array<i32>} : memref<216x1024xbf16, #tpu.memory_space<vmem>>, vector<8x1024xbf16>,
    %c0_45 = arith.constant 0 : index
    %c0_46 = arith.constant 0 : index
    %c128 = arith.constant 128 : index
    %44 = vector.load %arg1[%c0_45, %c0_46, %c128] : memref<1x8x1280xbf16, #tpu.memory_space<vmem>>, vector<1x8x1024xbf16>
    %45 = vector.shape_cast %44 : vector<1x8x1024xbf16> to vector<8x1024xbf16>
    %c104 = arith.constant 104 : index
    %c0_47 = arith.constant 0 : index
    %46 = vector.load %arg11[%c104, %c0_47] : memref<216x1024xbf16, #tpu.memory_space<vmem>>, vector<8x1024xbf16>
    tpu.vector_store %arg11[%c104, %c0_47], %45 {strides = array<i32>} : memref<216x1024xbf16, #tpu.memory_space<vmem>>, vector<8x1024xbf16>,
    %c0_48 = arith.constant 0 : index
    %c0_49 = arith.constant 0 : index
    %c129 = arith.constant 129 : index
    %47 = vector.load %arg1[%c0_48, %c0_49, %c129] : memref<1x8x1280xbf16, #tpu.memory_space<vmem>>, vector<1x8x1024xbf16>
    %48 = vector.shape_cast %47 : vector<1x8x1024xbf16> to vector<8x1024xbf16>
    %c112 = arith.constant 112 : index
    %c0_50 = arith.constant 0 : index
    %49 = vector.load %arg11[%c112, %c0_50] : memref<216x1024xbf16, #tpu.memory_space<vmem>>, vector<8x1024xbf16>
    tpu.vector_store %arg11[%c112, %c0_50], %48 {strides = array<i32>} : memref<216x1024xbf16, #tpu.memory_space<vmem>>, vector<8x1024xbf16>,
    %c0_51 = arith.constant 0 : index
    %c0_52 = arith.constant 0 : index
    %c137 = arith.constant 137 : index
    %50 = vector.load %arg1[%c0_51, %c0_52, %c137] : memref<1x8x1280xbf16, #tpu.memory_space<vmem>>, vector<1x8x1024xbf16>
    %51 = vector.shape_cast %50 : vector<1x8x1024xbf16> to vector<8x1024xbf16>
    %c120 = arith.constant 120 : index
    %c0_53 = arith.constant 0 : index
    %52 = vector.load %arg11[%c120, %c0_53] : memref<216x1024xbf16, #tpu.memory_space<vmem>>, vector<8x1024xbf16>
    tpu.vector_store %arg11[%c120, %c0_53], %51 {strides = array<i32>} : memref<216x1024xbf16, #tpu.memory_space<vmem>>, vector<8x1024xbf16>,
    %c0_54 = arith.constant 0 : index
    %c0_55 = arith.constant 0 : index
    %c138 = arith.constant 138 : index
    %53 = vector.load %arg1[%c0_54, %c0_55, %c138] : memref<1x8x1280xbf16, #tpu.memory_space<vmem>>, vector<1x8x1024xbf16>
    %54 = vector.shape_cast %53 : vector<1x8x1024xbf16> to vector<8x1024xbf16>
    %c128_56 = arith.constant 128 : index
    %c0_57 = arith.constant 0 : index
    %55 = vector.load %arg11[%c128_56, %c0_57] : memref<216x1024xbf16, #tpu.memory_space<vmem>>, vector<8x1024xbf16>
    tpu.vector_store %arg11[%c128_56, %c0_57], %54 {strides = array<i32>} : memref<216x1024xbf16, #tpu.memory_space<vmem>>, vector<8x1024xbf16>,
    %c0_58 = arith.constant 0 : index
    %c0_59 = arith.constant 0 : index
    %c139 = arith.constant 139 : index
    %56 = vector.load %arg1[%c0_58, %c0_59, %c139] : memref<1x8x1280xbf16, #tpu.memory_space<vmem>>, vector<1x8x1024xbf16>
    %57 = vector.shape_cast %56 : vector<1x8x1024xbf16> to vector<8x1024xbf16>
    %c136 = arith.constant 136 : index
    %c0_60 = arith.constant 0 : index
    %58 = vector.load %arg11[%c136, %c0_60] : memref<216x1024xbf16, #tpu.memory_space<vmem>>, vector<8x1024xbf16>
    tpu.vector_store %arg11[%c136, %c0_60], %57 {strides = array<i32>} : memref<216x1024xbf16, #tpu.memory_space<vmem>>, vector<8x1024xbf16>,
    %c0_61 = arith.constant 0 : index
    %c0_62 = arith.constant 0 : index
    %c217 = arith.constant 217 : index
    %59 = vector.load %arg1[%c0_61, %c0_62, %c217] : memref<1x8x1280xbf16, #tpu.memory_space<vmem>>, vector<1x8x1024xbf16>
    %60 = vector.shape_cast %59 : vector<1x8x1024xbf16> to vector<8x1024xbf16>
    %c144 = arith.constant 144 : index
    %c0_63 = arith.constant 0 : index
    %61 = vector.load %arg11[%c144, %c0_63] : memref<216x1024xbf16, #tpu.memory_space<vmem>>, vector<8x1024xbf16>
    tpu.vector_store %arg11[%c144, %c0_63], %60 {strides = array<i32>} : memref<216x1024xbf16, #tpu.memory_space<vmem>>, vector<8x1024xbf16>,
    %c0_64 = arith.constant 0 : index
    %c0_65 = arith.constant 0 : index
    %c218 = arith.constant 218 : index
    %62 = vector.load %arg1[%c0_64, %c0_65, %c218] : memref<1x8x1280xbf16, #tpu.memory_space<vmem>>, vector<1x8x1024xbf16>
    %63 = vector.shape_cast %62 : vector<1x8x1024xbf16> to vector<8x1024xbf16>
    %c152 = arith.constant 152 : index
    %c0_66 = arith.constant 0 : index
    %64 = vector.load %arg11[%c152, %c0_66] : memref<216x1024xbf16, #tpu.memory_space<vmem>>, vector<8x1024xbf16>
    tpu.vector_store %arg11[%c152, %c0_66], %63 {strides = array<i32>} : memref<216x1024xbf16, #tpu.memory_space<vmem>>, vector<8x1024xbf16>,
    %c0_67 = arith.constant 0 : index
    %c0_68 = arith.constant 0 : index
    %c219 = arith.constant 219 : index
    %65 = vector.load %arg1[%c0_67, %c0_68, %c219] : memref<1x8x1280xbf16, #tpu.memory_space<vmem>>, vector<1x8x1024xbf16>
    %66 = vector.shape_cast %65 : vector<1x8x1024xbf16> to vector<8x1024xbf16>
    %c160 = arith.constant 160 : index
    %c0_69 = arith.constant 0 : index
    %67 = vector.load %arg11[%c160, %c0_69] : memref<216x1024xbf16, #tpu.memory_space<vmem>>, vector<8x1024xbf16>
    tpu.vector_store %arg11[%c160, %c0_69], %66 {strides = array<i32>} : memref<216x1024xbf16, #tpu.memory_space<vmem>>, vector<8x1024xbf16>,
    %c0_70 = arith.constant 0 : index
    %c0_71 = arith.constant 0 : index
    %c227 = arith.constant 227 : index
    %68 = vector.load %arg1[%c0_70, %c0_71, %c227] : memref<1x8x1280xbf16, #tpu.memory_space<vmem>>, vector<1x8x1024xbf16>
    %69 = vector.shape_cast %68 : vector<1x8x1024xbf16> to vector<8x1024xbf16>
    %c168 = arith.constant 168 : index
    %c0_72 = arith.constant 0 : index
    %70 = vector.load %arg11[%c168, %c0_72] : memref<216x1024xbf16, #tpu.memory_space<vmem>>, vector<8x1024xbf16>
    tpu.vector_store %arg11[%c168, %c0_72], %69 {strides = array<i32>} : memref<216x1024xbf16, #tpu.memory_space<vmem>>, vector<8x1024xbf16>,
    %c0_73 = arith.constant 0 : index
    %c0_74 = arith.constant 0 : index
    %c228 = arith.constant 228 : index
    %71 = vector.load %arg1[%c0_73, %c0_74, %c228] : memref<1x8x1280xbf16, #tpu.memory_space<vmem>>, vector<1x8x1024xbf16>
    %72 = vector.shape_cast %71 : vector<1x8x1024xbf16> to vector<8x1024xbf16>
    %c176 = arith.constant 176 : index
    %c0_75 = arith.constant 0 : index
    %73 = vector.load %arg11[%c176, %c0_75] : memref<216x1024xbf16, #tpu.memory_space<vmem>>, vector<8x1024xbf16>
    tpu.vector_store %arg11[%c176, %c0_75], %72 {strides = array<i32>} : memref<216x1024xbf16, #tpu.memory_space<vmem>>, vector<8x1024xbf16>,
    %c0_76 = arith.constant 0 : index
    %c0_77 = arith.constant 0 : index
    %c229 = arith.constant 229 : index
    %74 = vector.load %arg1[%c0_76, %c0_77, %c229] : memref<1x8x1280xbf16, #tpu.memory_space<vmem>>, vector<1x8x1024xbf16>
    %75 = vector.shape_cast %74 : vector<1x8x1024xbf16> to vector<8x1024xbf16>
    %c184 = arith.constant 184 : index
    %c0_78 = arith.constant 0 : index
    %76 = vector.load %arg11[%c184, %c0_78] : memref<216x1024xbf16, #tpu.memory_space<vmem>>, vector<8x1024xbf16>
    tpu.vector_store %arg11[%c184, %c0_78], %75 {strides = array<i32>} : memref<216x1024xbf16, #tpu.memory_space<vmem>>, vector<8x1024xbf16>,
    %c0_79 = arith.constant 0 : index
    %c0_80 = arith.constant 0 : index
    %c237 = arith.constant 237 : index
    %77 = vector.load %arg1[%c0_79, %c0_80, %c237] : memref<1x8x1280xbf16, #tpu.memory_space<vmem>>, vector<1x8x1024xbf16>
    %78 = vector.shape_cast %77 : vector<1x8x1024xbf16> to vector<8x1024xbf16>
    %c192 = arith.constant 192 : index
    %c0_81 = arith.constant 0 : index
    %79 = vector.load %arg11[%c192, %c0_81] : memref<216x1024xbf16, #tpu.memory_space<vmem>>, vector<8x1024xbf16>
    tpu.vector_store %arg11[%c192, %c0_81], %78 {strides = array<i32>} : memref<216x1024xbf16, #tpu.memory_space<vmem>>, vector<8x1024xbf16>,
    %c0_82 = arith.constant 0 : index
    %c0_83 = arith.constant 0 : index
    %c238 = arith.constant 238 : index
    %80 = vector.load %arg1[%c0_82, %c0_83, %c238] : memref<1x8x1280xbf16, #tpu.memory_space<vmem>>, vector<1x8x1024xbf16>
    %81 = vector.shape_cast %80 : vector<1x8x1024xbf16> to vector<8x1024xbf16>
    %c200 = arith.constant 200 : index
    %c0_84 = arith.constant 0 : index
    %82 = vector.load %arg11[%c200, %c0_84] : memref<216x1024xbf16, #tpu.memory_space<vmem>>, vector<8x1024xbf16>
    tpu.vector_store %arg11[%c200, %c0_84], %81 {strides = array<i32>} : memref<216x1024xbf16, #tpu.memory_space<vmem>>, vector<8x1024xbf16>,
    %c0_85 = arith.constant 0 : index
    %c0_86 = arith.constant 0 : index
    %c239 = arith.constant 239 : index
    %83 = vector.load %arg1[%c0_85, %c0_86, %c239] : memref<1x8x1280xbf16, #tpu.memory_space<vmem>>, vector<1x8x1024xbf16>
    %84 = vector.shape_cast %83 : vector<1x8x1024xbf16> to vector<8x1024xbf16>
    %c208 = arith.constant 208 : index
    %c0_87 = arith.constant 0 : index
    %85 = vector.load %arg11[%c208, %c0_87] : memref<216x1024xbf16, #tpu.memory_space<vmem>>, vector<8x1024xbf16>
    tpu.vector_store %arg11[%c208, %c0_87], %84 {strides = array<i32>} : memref<216x1024xbf16, #tpu.memory_space<vmem>>, vector<8x1024xbf16>,
    %c0_88 = arith.constant 0 : index
    %c0_89 = arith.constant 0 : index
    %86 = vector.load %arg3[%c0_88, %c0_89] : memref<8x216xbf16, #tpu.memory_space<vmem>>, vector<8x216xbf16>
    %c0_90 = arith.constant 0 : index
    %c0_91 = arith.constant 0 : index
    %87 = vector.load %arg11[%c0_90, %c0_91] : memref<216x1024xbf16, #tpu.memory_space<vmem>>, vector<216x1024xbf16>
    %cst_92 = arith.constant dense<0.000000e+00> : vector<8x1024xf32>
    %88 = tpu.matmul %86, %87, %cst_92 {dimension_numbers = #tpu.dot_dimension_numbers<[1], [0], [0], [1], [0, 0, 1, 1], [], []>} : vector<8x216xbf16>, vector<216x1024xbf16>, vector<8x1024xf32> -> vector<8x1024xf32>
    %c0_93 = arith.constant 0 : index
    %c0_94 = arith.constant 0 : index
    %89 = vector.load %arg4[%c0_93, %c0_94] : memref<8x1xf32, #tpu.memory_space<vmem>>, vector<8x1xf32>
    %90 = vector.broadcast %89 : vector<8x1xf32> to vector<8x1024xf32>
    %91 = arith.addf %88, %90 : vector<8x1024xf32>
    %cst_95 = arith.constant 0.000000e+00 : f32
    %92 = vector.broadcast %cst_95 : f32 to vector<8x1024xf32>
    %93 = arith.maximumf %91, %92 : vector<8x1024xf32>
    %94 = vector.broadcast %0 : vector<1x1024xf32> to vector<8x1024xf32>
    %95 = arith.mulf %94, %93 : vector<8x1024xf32>
    %96 = arith.truncf %95 : vector<8x1024xf32> to vector<8x1024xbf16>
    %c0_96 = arith.constant 0 : index
    %c128_97 = arith.constant 128 : index
    %97 = vector.load %arg10[%c0_96, %c128_97] : memref<8x1280xbf16, #tpu.memory_space<vmem>>, vector<8x1024xbf16>
    tpu.vector_store %arg10[%c0_96, %c128_97], %96 {strides = array<i32>} : memref<8x1280xbf16, #tpu.memory_space<vmem>>, vector<8x1024xbf16>,
    %c0_98 = arith.constant 0 : index
    %c17_99 = arith.constant 17 : index
    %98 = vector.load %arg10[%c0_98, %c17_99] : memref<8x1280xbf16, #tpu.memory_space<vmem>>, vector<8x1024xbf16>
    %c0_100 = arith.constant 0 : index
    %c0_101 = arith.constant 0 : index
    %99 = vector.load %arg11[%c0_100, %c0_101] : memref<216x1024xbf16, #tpu.memory_space<vmem>>, vector<8x1024xbf16>
    tpu.vector_store %arg11[%c0_100, %c0_101], %98 {strides = array<i32>} : memref<216x1024xbf16, #tpu.memory_space<vmem>>, vector<8x1024xbf16>,
    %c0_102 = arith.constant 0 : index
    %c18_103 = arith.constant 18 : index
    %100 = vector.load %arg10[%c0_102, %c18_103] : memref<8x1280xbf16, #tpu.memory_space<vmem>>, vector<8x1024xbf16>
    %c8_104 = arith.constant 8 : index
    %c0_105 = arith.constant 0 : index
    %101 = vector.load %arg11[%c8_104, %c0_105] : memref<216x1024xbf16, #tpu.memory_space<vmem>>, vector<8x1024xbf16>
    tpu.vector_store %arg11[%c8_104, %c0_105], %100 {strides = array<i32>} : memref<216x1024xbf16, #tpu.memory_space<vmem>>, vector<8x1024xbf16>,
    %c0_106 = arith.constant 0 : index
    %c19_107 = arith.constant 19 : index
    %102 = vector.load %arg10[%c0_106, %c19_107] : memref<8x1280xbf16, #tpu.memory_space<vmem>>, vector<8x1024xbf16>
    %c16_108 = arith.constant 16 : index
    %c0_109 = arith.constant 0 : index
    %103 = vector.load %arg11[%c16_108, %c0_109] : memref<216x1024xbf16, #tpu.memory_space<vmem>>, vector<8x1024xbf16>
    tpu.vector_store %arg11[%c16_108, %c0_109], %102 {strides = array<i32>} : memref<216x1024xbf16, #tpu.memory_space<vmem>>, vector<8x1024xbf16>,
    %c0_110 = arith.constant 0 : index
    %c27_111 = arith.constant 27 : index
    %104 = vector.load %arg10[%c0_110, %c27_111] : memref<8x1280xbf16, #tpu.memory_space<vmem>>, vector<8x1024xbf16>
    %c24_112 = arith.constant 24 : index
    %c0_113 = arith.constant 0 : index
    %105 = vector.load %arg11[%c24_112, %c0_113] : memref<216x1024xbf16, #tpu.memory_space<vmem>>, vector<8x1024xbf16>
    tpu.vector_store %arg11[%c24_112, %c0_113], %104 {strides = array<i32>} : memref<216x1024xbf16, #tpu.memory_space<vmem>>, vector<8x1024xbf16>,
    %c0_114 = arith.constant 0 : index
    %c28_115 = arith.constant 28 : index
    %106 = vector.load %arg10[%c0_114, %c28_115] : memref<8x1280xbf16, #tpu.memory_space<vmem>>, vector<8x1024xbf16>
    %c32_116 = arith.constant 32 : index
    %c0_117 = arith.constant 0 : index
    %107 = vector.load %arg11[%c32_116, %c0_117] : memref<216x1024xbf16, #tpu.memory_space<vmem>>, vector<8x1024xbf16>
    tpu.vector_store %arg11[%c32_116, %c0_117], %106 {strides = array<i32>} : memref<216x1024xbf16, #tpu.memory_space<vmem>>, vector<8x1024xbf16>,
    %c0_118 = arith.constant 0 : index
    %c29_119 = arith.constant 29 : index
    %108 = vector.load %arg10[%c0_118, %c29_119] : memref<8x1280xbf16, #tpu.memory_space<vmem>>, vector<8x1024xbf16>
    %c40_120 = arith.constant 40 : index
    %c0_121 = arith.constant 0 : index
    %109 = vector.load %arg11[%c40_120, %c0_121] : memref<216x1024xbf16, #tpu.memory_space<vmem>>, vector<8x1024xbf16>
    tpu.vector_store %arg11[%c40_120, %c0_121], %108 {strides = array<i32>} : memref<216x1024xbf16, #tpu.memory_space<vmem>>, vector<8x1024xbf16>,
    %c0_122 = arith.constant 0 : index
    %c37_123 = arith.constant 37 : index
    %110 = vector.load %arg10[%c0_122, %c37_123] : memref<8x1280xbf16, #tpu.memory_space<vmem>>, vector<8x1024xbf16>
    %c48_124 = arith.constant 48 : index
    %c0_125 = arith.constant 0 : index
    %111 = vector.load %arg11[%c48_124, %c0_125] : memref<216x1024xbf16, #tpu.memory_space<vmem>>, vector<8x1024xbf16>
    tpu.vector_store %arg11[%c48_124, %c0_125], %110 {strides = array<i32>} : memref<216x1024xbf16, #tpu.memory_space<vmem>>, vector<8x1024xbf16>,
    %c0_126 = arith.constant 0 : index
    %c38_127 = arith.constant 38 : index
    %112 = vector.load %arg10[%c0_126, %c38_127] : memref<8x1280xbf16, #tpu.memory_space<vmem>>, vector<8x1024xbf16>
    %c56_128 = arith.constant 56 : index
    %c0_129 = arith.constant 0 : index
    %113 = vector.load %arg11[%c56_128, %c0_129] : memref<216x1024xbf16, #tpu.memory_space<vmem>>, vector<8x1024xbf16>
    tpu.vector_store %arg11[%c56_128, %c0_129], %112 {strides = array<i32>} : memref<216x1024xbf16, #tpu.memory_space<vmem>>, vector<8x1024xbf16>,
    %c0_130 = arith.constant 0 : index
    %c39_131 = arith.constant 39 : index
    %114 = vector.load %arg10[%c0_130, %c39_131] : memref<8x1280xbf16, #tpu.memory_space<vmem>>, vector<8x1024xbf16>
    %c64_132 = arith.constant 64 : index
    %c0_133 = arith.constant 0 : index
    %115 = vector.load %arg11[%c64_132, %c0_133] : memref<216x1024xbf16, #tpu.memory_space<vmem>>, vector<8x1024xbf16>
    tpu.vector_store %arg11[%c64_132, %c0_133], %114 {strides = array<i32>} : memref<216x1024xbf16, #tpu.memory_space<vmem>>, vector<8x1024xbf16>,
    %c0_134 = arith.constant 0 : index
    %c117_135 = arith.constant 117 : index
    %116 = vector.load %arg10[%c0_134, %c117_135] : memref<8x1280xbf16, #tpu.memory_space<vmem>>, vector<8x1024xbf16>
    %c72_136 = arith.constant 72 : index
    %c0_137 = arith.constant 0 : index
    %117 = vector.load %arg11[%c72_136, %c0_137] : memref<216x1024xbf16, #tpu.memory_space<vmem>>, vector<8x1024xbf16>
    tpu.vector_store %arg11[%c72_136, %c0_137], %116 {strides = array<i32>} : memref<216x1024xbf16, #tpu.memory_space<vmem>>, vector<8x1024xbf16>,
    %c0_138 = arith.constant 0 : index
    %c118_139 = arith.constant 118 : index
    %118 = vector.load %arg10[%c0_138, %c118_139] : memref<8x1280xbf16, #tpu.memory_space<vmem>>, vector<8x1024xbf16>
    %c80_140 = arith.constant 80 : index
    %c0_141 = arith.constant 0 : index
    %119 = vector.load %arg11[%c80_140, %c0_141] : memref<216x1024xbf16, #tpu.memory_space<vmem>>, vector<8x1024xbf16>
    tpu.vector_store %arg11[%c80_140, %c0_141], %118 {strides = array<i32>} : memref<216x1024xbf16, #tpu.memory_space<vmem>>, vector<8x1024xbf16>,
    %c0_142 = arith.constant 0 : index
    %c119_143 = arith.constant 119 : index
    %120 = vector.load %arg10[%c0_142, %c119_143] : memref<8x1280xbf16, #tpu.memory_space<vmem>>, vector<8x1024xbf16>
    %c88_144 = arith.constant 88 : index
    %c0_145 = arith.constant 0 : index
    %121 = vector.load %arg11[%c88_144, %c0_145] : memref<216x1024xbf16, #tpu.memory_space<vmem>>, vector<8x1024xbf16>
    tpu.vector_store %arg11[%c88_144, %c0_145], %120 {strides = array<i32>} : memref<216x1024xbf16, #tpu.memory_space<vmem>>, vector<8x1024xbf16>,
    %c0_146 = arith.constant 0 : index
    %c127_147 = arith.constant 127 : index
    %122 = vector.load %arg10[%c0_146, %c127_147] : memref<8x1280xbf16, #tpu.memory_space<vmem>>, vector<8x1024xbf16>
    %c96_148 = arith.constant 96 : index
    %c0_149 = arith.constant 0 : index
    %123 = vector.load %arg11[%c96_148, %c0_149] : memref<216x1024xbf16, #tpu.memory_space<vmem>>, vector<8x1024xbf16>
    tpu.vector_store %arg11[%c96_148, %c0_149], %122 {strides = array<i32>} : memref<216x1024xbf16, #tpu.memory_space<vmem>>, vector<8x1024xbf16>,
    %c0_150 = arith.constant 0 : index
    %c128_151 = arith.constant 128 : index
    %124 = vector.load %arg10[%c0_150, %c128_151] : memref<8x1280xbf16, #tpu.memory_space<vmem>>, vector<8x1024xbf16>
    %c104_152 = arith.constant 104 : index
    %c0_153 = arith.constant 0 : index
    %125 = vector.load %arg11[%c104_152, %c0_153] : memref<216x1024xbf16, #tpu.memory_space<vmem>>, vector<8x1024xbf16>
    tpu.vector_store %arg11[%c104_152, %c0_153], %124 {strides = array<i32>} : memref<216x1024xbf16, #tpu.memory_space<vmem>>, vector<8x1024xbf16>,
    %c0_154 = arith.constant 0 : index
    %c129_155 = arith.constant 129 : index
    %126 = vector.load %arg10[%c0_154, %c129_155] : memref<8x1280xbf16, #tpu.memory_space<vmem>>, vector<8x1024xbf16>
    %c112_156 = arith.constant 112 : index
    %c0_157 = arith.constant 0 : index
    %127 = vector.load %arg11[%c112_156, %c0_157] : memref<216x1024xbf16, #tpu.memory_space<vmem>>, vector<8x1024xbf16>
    tpu.vector_store %arg11[%c112_156, %c0_157], %126 {strides = array<i32>} : memref<216x1024xbf16, #tpu.memory_space<vmem>>, vector<8x1024xbf16>,
    %c0_158 = arith.constant 0 : index
    %c137_159 = arith.constant 137 : index
    %128 = vector.load %arg10[%c0_158, %c137_159] : memref<8x1280xbf16, #tpu.memory_space<vmem>>, vector<8x1024xbf16>
    %c120_160 = arith.constant 120 : index
    %c0_161 = arith.constant 0 : index
    %129 = vector.load %arg11[%c120_160, %c0_161] : memref<216x1024xbf16, #tpu.memory_space<vmem>>, vector<8x1024xbf16>
    tpu.vector_store %arg11[%c120_160, %c0_161], %128 {strides = array<i32>} : memref<216x1024xbf16, #tpu.memory_space<vmem>>, vector<8x1024xbf16>,
    %c0_162 = arith.constant 0 : index
    %c138_163 = arith.constant 138 : index
    %130 = vector.load %arg10[%c0_162, %c138_163] : memref<8x1280xbf16, #tpu.memory_space<vmem>>, vector<8x1024xbf16>
    %c128_164 = arith.constant 128 : index
    %c0_165 = arith.constant 0 : index
    %131 = vector.load %arg11[%c128_164, %c0_165] : memref<216x1024xbf16, #tpu.memory_space<vmem>>, vector<8x1024xbf16>
    tpu.vector_store %arg11[%c128_164, %c0_165], %130 {strides = array<i32>} : memref<216x1024xbf16, #tpu.memory_space<vmem>>, vector<8x1024xbf16>,
    %c0_166 = arith.constant 0 : index
    %c139_167 = arith.constant 139 : index
    %132 = vector.load %arg10[%c0_166, %c139_167] : memref<8x1280xbf16, #tpu.memory_space<vmem>>, vector<8x1024xbf16>
    %c136_168 = arith.constant 136 : index
    %c0_169 = arith.constant 0 : index
    %133 = vector.load %arg11[%c136_168, %c0_169] : memref<216x1024xbf16, #tpu.memory_space<vmem>>, vector<8x1024xbf16>
    tpu.vector_store %arg11[%c136_168, %c0_169], %132 {strides = array<i32>} : memref<216x1024xbf16, #tpu.memory_space<vmem>>, vector<8x1024xbf16>,
    %c0_170 = arith.constant 0 : index
    %c217_171 = arith.constant 217 : index
    %134 = vector.load %arg10[%c0_170, %c217_171] : memref<8x1280xbf16, #tpu.memory_space<vmem>>, vector<8x1024xbf16>
    %c144_172 = arith.constant 144 : index
    %c0_173 = arith.constant 0 : index
    %135 = vector.load %arg11[%c144_172, %c0_173] : memref<216x1024xbf16, #tpu.memory_space<vmem>>, vector<8x1024xbf16>
    tpu.vector_store %arg11[%c144_172, %c0_173], %134 {strides = array<i32>} : memref<216x1024xbf16, #tpu.memory_space<vmem>>, vector<8x1024xbf16>,
    %c0_174 = arith.constant 0 : index
    %c218_175 = arith.constant 218 : index
    %136 = vector.load %arg10[%c0_174, %c218_175] : memref<8x1280xbf16, #tpu.memory_space<vmem>>, vector<8x1024xbf16>
    %c152_176 = arith.constant 152 : index
    %c0_177 = arith.constant 0 : index
    %137 = vector.load %arg11[%c152_176, %c0_177] : memref<216x1024xbf16, #tpu.memory_space<vmem>>, vector<8x1024xbf16>
    tpu.vector_store %arg11[%c152_176, %c0_177], %136 {strides = array<i32>} : memref<216x1024xbf16, #tpu.memory_space<vmem>>, vector<8x1024xbf16>,
    %c0_178 = arith.constant 0 : index
    %c219_179 = arith.constant 219 : index
    %138 = vector.load %arg10[%c0_178, %c219_179] : memref<8x1280xbf16, #tpu.memory_space<vmem>>, vector<8x1024xbf16>
    %c160_180 = arith.constant 160 : index
    %c0_181 = arith.constant 0 : index
    %139 = vector.load %arg11[%c160_180, %c0_181] : memref<216x1024xbf16, #tpu.memory_space<vmem>>, vector<8x1024xbf16>
    tpu.vector_store %arg11[%c160_180, %c0_181], %138 {strides = array<i32>} : memref<216x1024xbf16, #tpu.memory_space<vmem>>, vector<8x1024xbf16>,
    %c0_182 = arith.constant 0 : index
    %c227_183 = arith.constant 227 : index
    %140 = vector.load %arg10[%c0_182, %c227_183] : memref<8x1280xbf16, #tpu.memory_space<vmem>>, vector<8x1024xbf16>
    %c168_184 = arith.constant 168 : index
    %c0_185 = arith.constant 0 : index
    %141 = vector.load %arg11[%c168_184, %c0_185] : memref<216x1024xbf16, #tpu.memory_space<vmem>>, vector<8x1024xbf16>
    tpu.vector_store %arg11[%c168_184, %c0_185], %140 {strides = array<i32>} : memref<216x1024xbf16, #tpu.memory_space<vmem>>, vector<8x1024xbf16>,
    %c0_186 = arith.constant 0 : index
    %c228_187 = arith.constant 228 : index
    %142 = vector.load %arg10[%c0_186, %c228_187] : memref<8x1280xbf16, #tpu.memory_space<vmem>>, vector<8x1024xbf16>
    %c176_188 = arith.constant 176 : index
    %c0_189 = arith.constant 0 : index
    %143 = vector.load %arg11[%c176_188, %c0_189] : memref<216x1024xbf16, #tpu.memory_space<vmem>>, vector<8x1024xbf16>
    tpu.vector_store %arg11[%c176_188, %c0_189], %142 {strides = array<i32>} : memref<216x1024xbf16, #tpu.memory_space<vmem>>, vector<8x1024xbf16>,
    %c0_190 = arith.constant 0 : index
    %c229_191 = arith.constant 229 : index
    %144 = vector.load %arg10[%c0_190, %c229_191] : memref<8x1280xbf16, #tpu.memory_space<vmem>>, vector<8x1024xbf16>
    %c184_192 = arith.constant 184 : index
    %c0_193 = arith.constant 0 : index
    %145 = vector.load %arg11[%c184_192, %c0_193] : memref<216x1024xbf16, #tpu.memory_space<vmem>>, vector<8x1024xbf16>
    tpu.vector_store %arg11[%c184_192, %c0_193], %144 {strides = array<i32>} : memref<216x1024xbf16, #tpu.memory_space<vmem>>, vector<8x1024xbf16>,
    %c0_194 = arith.constant 0 : index
    %c237_195 = arith.constant 237 : index
    %146 = vector.load %arg10[%c0_194, %c237_195] : memref<8x1280xbf16, #tpu.memory_space<vmem>>, vector<8x1024xbf16>
    %c192_196 = arith.constant 192 : index
    %c0_197 = arith.constant 0 : index
    %147 = vector.load %arg11[%c192_196, %c0_197] : memref<216x1024xbf16, #tpu.memory_space<vmem>>, vector<8x1024xbf16>
    tpu.vector_store %arg11[%c192_196, %c0_197], %146 {strides = array<i32>} : memref<216x1024xbf16, #tpu.memory_space<vmem>>, vector<8x1024xbf16>,
    %c0_198 = arith.constant 0 : index
    %c238_199 = arith.constant 238 : index
    %148 = vector.load %arg10[%c0_198, %c238_199] : memref<8x1280xbf16, #tpu.memory_space<vmem>>, vector<8x1024xbf16>
    %c200_200 = arith.constant 200 : index
    %c0_201 = arith.constant 0 : index
    %149 = vector.load %arg11[%c200_200, %c0_201] : memref<216x1024xbf16, #tpu.memory_space<vmem>>, vector<8x1024xbf16>
    tpu.vector_store %arg11[%c200_200, %c0_201], %148 {strides = array<i32>} : memref<216x1024xbf16, #tpu.memory_space<vmem>>, vector<8x1024xbf16>,
    %c0_202 = arith.constant 0 : index
    %c239_203 = arith.constant 239 : index
    %150 = vector.load %arg10[%c0_202, %c239_203] : memref<8x1280xbf16, #tpu.memory_space<vmem>>, vector<8x1024xbf16>
    %c208_204 = arith.constant 208 : index
    %c0_205 = arith.constant 0 : index
    %151 = vector.load %arg11[%c208_204, %c0_205] : memref<216x1024xbf16, #tpu.memory_space<vmem>>, vector<8x1024xbf16>
    tpu.vector_store %arg11[%c208_204, %c0_205], %150 {strides = array<i32>} : memref<216x1024xbf16, #tpu.memory_space<vmem>>, vector<8x1024xbf16>,
    %c0_206 = arith.constant 0 : index
    %c128_207 = arith.constant 128 : index
    %152 = vector.load %arg10[%c0_206, %c128_207] : memref<8x1280xbf16, #tpu.memory_space<vmem>>, vector<8x1024xbf16>
    %153 = arith.extf %152 : vector<8x1024xbf16> to vector<8x1024xf32>
    %c0_208 = arith.constant 0 : index
    %c0_209 = arith.constant 0 : index
    %154 = vector.load %arg5[%c0_208, %c0_209] : memref<8x216xbf16, #tpu.memory_space<vmem>>, vector<8x216xbf16>
    %c0_210 = arith.constant 0 : index
    %c0_211 = arith.constant 0 : index
    %155 = vector.load %arg11[%c0_210, %c0_211] : memref<216x1024xbf16, #tpu.memory_space<vmem>>, vector<216x1024xbf16>
    %cst_212 = arith.constant dense<0.000000e+00> : vector<8x1024xf32>
    %156 = tpu.matmul %154, %155, %cst_212 {dimension_numbers = #tpu.dot_dimension_numbers<[1], [0], [0], [1], [0, 0, 1, 1], [], []>} : vector<8x216xbf16>, vector<216x1024xbf16>, vector<8x1024xf32> -> vector<8x1024xf32>
    %c0_213 = arith.constant 0 : index
    %c0_214 = arith.constant 0 : index
    %157 = vector.load %arg6[%c0_213, %c0_214] : memref<8x1xf32, #tpu.memory_space<vmem>>, vector<8x1xf32>
    %158 = vector.broadcast %157 : vector<8x1xf32> to vector<8x1024xf32>
    %159 = arith.addf %156, %158 : vector<8x1024xf32>
    %160 = arith.addf %159, %153 : vector<8x1024xf32>
    %cst_215 = arith.constant 0.000000e+00 : f32
    %161 = vector.broadcast %cst_215 : f32 to vector<8x1024xf32>
    %162 = arith.maximumf %160, %161 : vector<8x1024xf32>
    %163 = vector.broadcast %0 : vector<1x1024xf32> to vector<8x1024xf32>
    %164 = arith.mulf %163, %162 : vector<8x1024xf32>
    %165 = arith.truncf %164 : vector<8x1024xf32> to vector<8x1024xbf16>
    %c0_216 = arith.constant 0 : index
    %c128_217 = arith.constant 128 : index
    %166 = vector.load %arg10[%c0_216, %c128_217] : memref<8x1280xbf16, #tpu.memory_space<vmem>>, vector<8x1024xbf16>
    tpu.vector_store %arg10[%c0_216, %c128_217], %165 {strides = array<i32>} : memref<8x1280xbf16, #tpu.memory_space<vmem>>, vector<8x1024xbf16>,
    %c0_218 = arith.constant 0 : index
    %c17_219 = arith.constant 17 : index
    %167 = vector.load %arg10[%c0_218, %c17_219] : memref<8x1280xbf16, #tpu.memory_space<vmem>>, vector<8x1024xbf16>
    %c0_220 = arith.constant 0 : index
    %c0_221 = arith.constant 0 : index
    %168 = vector.load %arg11[%c0_220, %c0_221] : memref<216x1024xbf16, #tpu.memory_space<vmem>>, vector<8x1024xbf16>
    tpu.vector_store %arg11[%c0_220, %c0_221], %167 {strides = array<i32>} : memref<216x1024xbf16, #tpu.memory_space<vmem>>, vector<8x1024xbf16>,
    %c0_222 = arith.constant 0 : index
    %c18_223 = arith.constant 18 : index
    %169 = vector.load %arg10[%c0_222, %c18_223] : memref<8x1280xbf16, #tpu.memory_space<vmem>>, vector<8x1024xbf16>
    %c8_224 = arith.constant 8 : index
    %c0_225 = arith.constant 0 : index
    %170 = vector.load %arg11[%c8_224, %c0_225] : memref<216x1024xbf16, #tpu.memory_space<vmem>>, vector<8x1024xbf16>
    tpu.vector_store %arg11[%c8_224, %c0_225], %169 {strides = array<i32>} : memref<216x1024xbf16, #tpu.memory_space<vmem>>, vector<8x1024xbf16>,
    %c0_226 = arith.constant 0 : index
    %c19_227 = arith.constant 19 : index
    %171 = vector.load %arg10[%c0_226, %c19_227] : memref<8x1280xbf16, #tpu.memory_space<vmem>>, vector<8x1024xbf16>
    %c16_228 = arith.constant 16 : index
    %c0_229 = arith.constant 0 : index
    %172 = vector.load %arg11[%c16_228, %c0_229] : memref<216x1024xbf16, #tpu.memory_space<vmem>>, vector<8x1024xbf16>
    tpu.vector_store %arg11[%c16_228, %c0_229], %171 {strides = array<i32>} : memref<216x1024xbf16, #tpu.memory_space<vmem>>, vector<8x1024xbf16>,
    %c0_230 = arith.constant 0 : index
    %c27_231 = arith.constant 27 : index
    %173 = vector.load %arg10[%c0_230, %c27_231] : memref<8x1280xbf16, #tpu.memory_space<vmem>>, vector<8x1024xbf16>
    %c24_232 = arith.constant 24 : index
    %c0_233 = arith.constant 0 : index
    %174 = vector.load %arg11[%c24_232, %c0_233] : memref<216x1024xbf16, #tpu.memory_space<vmem>>, vector<8x1024xbf16>
    tpu.vector_store %arg11[%c24_232, %c0_233], %173 {strides = array<i32>} : memref<216x1024xbf16, #tpu.memory_space<vmem>>, vector<8x1024xbf16>,
    %c0_234 = arith.constant 0 : index
    %c28_235 = arith.constant 28 : index
    %175 = vector.load %arg10[%c0_234, %c28_235] : memref<8x1280xbf16, #tpu.memory_space<vmem>>, vector<8x1024xbf16>
    %c32_236 = arith.constant 32 : index
    %c0_237 = arith.constant 0 : index
    %176 = vector.load %arg11[%c32_236, %c0_237] : memref<216x1024xbf16, #tpu.memory_space<vmem>>, vector<8x1024xbf16>
    tpu.vector_store %arg11[%c32_236, %c0_237], %175 {strides = array<i32>} : memref<216x1024xbf16, #tpu.memory_space<vmem>>, vector<8x1024xbf16>,
    %c0_238 = arith.constant 0 : index
    %c29_239 = arith.constant 29 : index
    %177 = vector.load %arg10[%c0_238, %c29_239] : memref<8x1280xbf16, #tpu.memory_space<vmem>>, vector<8x1024xbf16>
    %c40_240 = arith.constant 40 : index
    %c0_241 = arith.constant 0 : index
    %178 = vector.load %arg11[%c40_240, %c0_241] : memref<216x1024xbf16, #tpu.memory_space<vmem>>, vector<8x1024xbf16>
    tpu.vector_store %arg11[%c40_240, %c0_241], %177 {strides = array<i32>} : memref<216x1024xbf16, #tpu.memory_space<vmem>>, vector<8x1024xbf16>,
    %c0_242 = arith.constant 0 : index
    %c37_243 = arith.constant 37 : index
    %179 = vector.load %arg10[%c0_242, %c37_243] : memref<8x1280xbf16, #tpu.memory_space<vmem>>, vector<8x1024xbf16>
    %c48_244 = arith.constant 48 : index
    %c0_245 = arith.constant 0 : index
    %180 = vector.load %arg11[%c48_244, %c0_245] : memref<216x1024xbf16, #tpu.memory_space<vmem>>, vector<8x1024xbf16>
    tpu.vector_store %arg11[%c48_244, %c0_245], %179 {strides = array<i32>} : memref<216x1024xbf16, #tpu.memory_space<vmem>>, vector<8x1024xbf16>,
    %c0_246 = arith.constant 0 : index
    %c38_247 = arith.constant 38 : index
    %181 = vector.load %arg10[%c0_246, %c38_247] : memref<8x1280xbf16, #tpu.memory_space<vmem>>, vector<8x1024xbf16>
    %c56_248 = arith.constant 56 : index
    %c0_249 = arith.constant 0 : index
    %182 = vector.load %arg11[%c56_248, %c0_249] : memref<216x1024xbf16, #tpu.memory_space<vmem>>, vector<8x1024xbf16>
    tpu.vector_store %arg11[%c56_248, %c0_249], %181 {strides = array<i32>} : memref<216x1024xbf16, #tpu.memory_space<vmem>>, vector<8x1024xbf16>,
    %c0_250 = arith.constant 0 : index
    %c39_251 = arith.constant 39 : index
    %183 = vector.load %arg10[%c0_250, %c39_251] : memref<8x1280xbf16, #tpu.memory_space<vmem>>, vector<8x1024xbf16>
    %c64_252 = arith.constant 64 : index
    %c0_253 = arith.constant 0 : index
    %184 = vector.load %arg11[%c64_252, %c0_253] : memref<216x1024xbf16, #tpu.memory_space<vmem>>, vector<8x1024xbf16>
    tpu.vector_store %arg11[%c64_252, %c0_253], %183 {strides = array<i32>} : memref<216x1024xbf16, #tpu.memory_space<vmem>>, vector<8x1024xbf16>,
    %c0_254 = arith.constant 0 : index
    %c117_255 = arith.constant 117 : index
    %185 = vector.load %arg10[%c0_254, %c117_255] : memref<8x1280xbf16, #tpu.memory_space<vmem>>, vector<8x1024xbf16>
    %c72_256 = arith.constant 72 : index
    %c0_257 = arith.constant 0 : index
    %186 = vector.load %arg11[%c72_256, %c0_257] : memref<216x1024xbf16, #tpu.memory_space<vmem>>, vector<8x1024xbf16>
    tpu.vector_store %arg11[%c72_256, %c0_257], %185 {strides = array<i32>} : memref<216x1024xbf16, #tpu.memory_space<vmem>>, vector<8x1024xbf16>,
    %c0_258 = arith.constant 0 : index
    %c118_259 = arith.constant 118 : index
    %187 = vector.load %arg10[%c0_258, %c118_259] : memref<8x1280xbf16, #tpu.memory_space<vmem>>, vector<8x1024xbf16>
    %c80_260 = arith.constant 80 : index
    %c0_261 = arith.constant 0 : index
    %188 = vector.load %arg11[%c80_260, %c0_261] : memref<216x1024xbf16, #tpu.memory_space<vmem>>, vector<8x1024xbf16>
    tpu.vector_store %arg11[%c80_260, %c0_261], %187 {strides = array<i32>} : memref<216x1024xbf16, #tpu.memory_space<vmem>>, vector<8x1024xbf16>,
    %c0_262 = arith.constant 0 : index
    %c119_263 = arith.constant 119 : index
    %189 = vector.load %arg10[%c0_262, %c119_263] : memref<8x1280xbf16, #tpu.memory_space<vmem>>, vector<8x1024xbf16>
    %c88_264 = arith.constant 88 : index
    %c0_265 = arith.constant 0 : index
    %190 = vector.load %arg11[%c88_264, %c0_265] : memref<216x1024xbf16, #tpu.memory_space<vmem>>, vector<8x1024xbf16>
    tpu.vector_store %arg11[%c88_264, %c0_265], %189 {strides = array<i32>} : memref<216x1024xbf16, #tpu.memory_space<vmem>>, vector<8x1024xbf16>,
    %c0_266 = arith.constant 0 : index
    %c127_267 = arith.constant 127 : index
    %191 = vector.load %arg10[%c0_266, %c127_267] : memref<8x1280xbf16, #tpu.memory_space<vmem>>, vector<8x1024xbf16>
    %c96_268 = arith.constant 96 : index
    %c0_269 = arith.constant 0 : index
    %192 = vector.load %arg11[%c96_268, %c0_269] : memref<216x1024xbf16, #tpu.memory_space<vmem>>, vector<8x1024xbf16>
    tpu.vector_store %arg11[%c96_268, %c0_269], %191 {strides = array<i32>} : memref<216x1024xbf16, #tpu.memory_space<vmem>>, vector<8x1024xbf16>,
    %c0_270 = arith.constant 0 : index
    %c128_271 = arith.constant 128 : index
    %193 = vector.load %arg10[%c0_270, %c128_271] : memref<8x1280xbf16, #tpu.memory_space<vmem>>, vector<8x1024xbf16>
    %c104_272 = arith.constant 104 : index
    %c0_273 = arith.constant 0 : index
    %194 = vector.load %arg11[%c104_272, %c0_273] : memref<216x1024xbf16, #tpu.memory_space<vmem>>, vector<8x1024xbf16>
    tpu.vector_store %arg11[%c104_272, %c0_273], %193 {strides = array<i32>} : memref<216x1024xbf16, #tpu.memory_space<vmem>>, vector<8x1024xbf16>,
    %c0_274 = arith.constant 0 : index
    %c129_275 = arith.constant 129 : index
    %195 = vector.load %arg10[%c0_274, %c129_275] : memref<8x1280xbf16, #tpu.memory_space<vmem>>, vector<8x1024xbf16>
    %c112_276 = arith.constant 112 : index
    %c0_277 = arith.constant 0 : index
    %196 = vector.load %arg11[%c112_276, %c0_277] : memref<216x1024xbf16, #tpu.memory_space<vmem>>, vector<8x1024xbf16>
    tpu.vector_store %arg11[%c112_276, %c0_277], %195 {strides = array<i32>} : memref<216x1024xbf16, #tpu.memory_space<vmem>>, vector<8x1024xbf16>,
    %c0_278 = arith.constant 0 : index
    %c137_279 = arith.constant 137 : index
    %197 = vector.load %arg10[%c0_278, %c137_279] : memref<8x1280xbf16, #tpu.memory_space<vmem>>, vector<8x1024xbf16>
    %c120_280 = arith.constant 120 : index
    %c0_281 = arith.constant 0 : index
    %198 = vector.load %arg11[%c120_280, %c0_281] : memref<216x1024xbf16, #tpu.memory_space<vmem>>, vector<8x1024xbf16>
    tpu.vector_store %arg11[%c120_280, %c0_281], %197 {strides = array<i32>} : memref<216x1024xbf16, #tpu.memory_space<vmem>>, vector<8x1024xbf16>,
    %c0_282 = arith.constant 0 : index
    %c138_283 = arith.constant 138 : index
    %199 = vector.load %arg10[%c0_282, %c138_283] : memref<8x1280xbf16, #tpu.memory_space<vmem>>, vector<8x1024xbf16>
    %c128_284 = arith.constant 128 : index
    %c0_285 = arith.constant 0 : index
    %200 = vector.load %arg11[%c128_284, %c0_285] : memref<216x1024xbf16, #tpu.memory_space<vmem>>, vector<8x1024xbf16>
    tpu.vector_store %arg11[%c128_284, %c0_285], %199 {strides = array<i32>} : memref<216x1024xbf16, #tpu.memory_space<vmem>>, vector<8x1024xbf16>,
    %c0_286 = arith.constant 0 : index
    %c139_287 = arith.constant 139 : index
    %201 = vector.load %arg10[%c0_286, %c139_287] : memref<8x1280xbf16, #tpu.memory_space<vmem>>, vector<8x1024xbf16>
    %c136_288 = arith.constant 136 : index
    %c0_289 = arith.constant 0 : index
    %202 = vector.load %arg11[%c136_288, %c0_289] : memref<216x1024xbf16, #tpu.memory_space<vmem>>, vector<8x1024xbf16>
    tpu.vector_store %arg11[%c136_288, %c0_289], %201 {strides = array<i32>} : memref<216x1024xbf16, #tpu.memory_space<vmem>>, vector<8x1024xbf16>,
    %c0_290 = arith.constant 0 : index
    %c217_291 = arith.constant 217 : index
    %203 = vector.load %arg10[%c0_290, %c217_291] : memref<8x1280xbf16, #tpu.memory_space<vmem>>, vector<8x1024xbf16>
    %c144_292 = arith.constant 144 : index
    %c0_293 = arith.constant 0 : index
    %204 = vector.load %arg11[%c144_292, %c0_293] : memref<216x1024xbf16, #tpu.memory_space<vmem>>, vector<8x1024xbf16>
    tpu.vector_store %arg11[%c144_292, %c0_293], %203 {strides = array<i32>} : memref<216x1024xbf16, #tpu.memory_space<vmem>>, vector<8x1024xbf16>,
    %c0_294 = arith.constant 0 : index
    %c218_295 = arith.constant 218 : index
    %205 = vector.load %arg10[%c0_294, %c218_295] : memref<8x1280xbf16, #tpu.memory_space<vmem>>, vector<8x1024xbf16>
    %c152_296 = arith.constant 152 : index
    %c0_297 = arith.constant 0 : index
    %206 = vector.load %arg11[%c152_296, %c0_297] : memref<216x1024xbf16, #tpu.memory_space<vmem>>, vector<8x1024xbf16>
    tpu.vector_store %arg11[%c152_296, %c0_297], %205 {strides = array<i32>} : memref<216x1024xbf16, #tpu.memory_space<vmem>>, vector<8x1024xbf16>,
    %c0_298 = arith.constant 0 : index
    %c219_299 = arith.constant 219 : index
    %207 = vector.load %arg10[%c0_298, %c219_299] : memref<8x1280xbf16, #tpu.memory_space<vmem>>, vector<8x1024xbf16>
    %c160_300 = arith.constant 160 : index
    %c0_301 = arith.constant 0 : index
    %208 = vector.load %arg11[%c160_300, %c0_301] : memref<216x1024xbf16, #tpu.memory_space<vmem>>, vector<8x1024xbf16>
    tpu.vector_store %arg11[%c160_300, %c0_301], %207 {strides = array<i32>} : memref<216x1024xbf16, #tpu.memory_space<vmem>>, vector<8x1024xbf16>,
    %c0_302 = arith.constant 0 : index
    %c227_303 = arith.constant 227 : index
    %209 = vector.load %arg10[%c0_302, %c227_303] : memref<8x1280xbf16, #tpu.memory_space<vmem>>, vector<8x1024xbf16>
    %c168_304 = arith.constant 168 : index
    %c0_305 = arith.constant 0 : index
    %210 = vector.load %arg11[%c168_304, %c0_305] : memref<216x1024xbf16, #tpu.memory_space<vmem>>, vector<8x1024xbf16>
    tpu.vector_store %arg11[%c168_304, %c0_305], %209 {strides = array<i32>} : memref<216x1024xbf16, #tpu.memory_space<vmem>>, vector<8x1024xbf16>,
    %c0_306 = arith.constant 0 : index
    %c228_307 = arith.constant 228 : index
    %211 = vector.load %arg10[%c0_306, %c228_307] : memref<8x1280xbf16, #tpu.memory_space<vmem>>, vector<8x1024xbf16>
    %c176_308 = arith.constant 176 : index
    %c0_309 = arith.constant 0 : index
    %212 = vector.load %arg11[%c176_308, %c0_309] : memref<216x1024xbf16, #tpu.memory_space<vmem>>, vector<8x1024xbf16>
    tpu.vector_store %arg11[%c176_308, %c0_309], %211 {strides = array<i32>} : memref<216x1024xbf16, #tpu.memory_space<vmem>>, vector<8x1024xbf16>,
    %c0_310 = arith.constant 0 : index
    %c229_311 = arith.constant 229 : index
    %213 = vector.load %arg10[%c0_310, %c229_311] : memref<8x1280xbf16, #tpu.memory_space<vmem>>, vector<8x1024xbf16>
    %c184_312 = arith.constant 184 : index
    %c0_313 = arith.constant 0 : index
    %214 = vector.load %arg11[%c184_312, %c0_313] : memref<216x1024xbf16, #tpu.memory_space<vmem>>, vector<8x1024xbf16>
    tpu.vector_store %arg11[%c184_312, %c0_313], %213 {strides = array<i32>} : memref<216x1024xbf16, #tpu.memory_space<vmem>>, vector<8x1024xbf16>,
    %c0_314 = arith.constant 0 : index
    %c237_315 = arith.constant 237 : index
    %215 = vector.load %arg10[%c0_314, %c237_315] : memref<8x1280xbf16, #tpu.memory_space<vmem>>, vector<8x1024xbf16>
    %c192_316 = arith.constant 192 : index
    %c0_317 = arith.constant 0 : index
    %216 = vector.load %arg11[%c192_316, %c0_317] : memref<216x1024xbf16, #tpu.memory_space<vmem>>, vector<8x1024xbf16>
    tpu.vector_store %arg11[%c192_316, %c0_317], %215 {strides = array<i32>} : memref<216x1024xbf16, #tpu.memory_space<vmem>>, vector<8x1024xbf16>,
    %c0_318 = arith.constant 0 : index
    %c238_319 = arith.constant 238 : index
    %217 = vector.load %arg10[%c0_318, %c238_319] : memref<8x1280xbf16, #tpu.memory_space<vmem>>, vector<8x1024xbf16>
    %c200_320 = arith.constant 200 : index
    %c0_321 = arith.constant 0 : index
    %218 = vector.load %arg11[%c200_320, %c0_321] : memref<216x1024xbf16, #tpu.memory_space<vmem>>, vector<8x1024xbf16>
    tpu.vector_store %arg11[%c200_320, %c0_321], %217 {strides = array<i32>} : memref<216x1024xbf16, #tpu.memory_space<vmem>>, vector<8x1024xbf16>,
    %c0_322 = arith.constant 0 : index
    %c239_323 = arith.constant 239 : index
    %219 = vector.load %arg10[%c0_322, %c239_323] : memref<8x1280xbf16, #tpu.memory_space<vmem>>, vector<8x1024xbf16>
    %c208_324 = arith.constant 208 : index
    %c0_325 = arith.constant 0 : index
    %220 = vector.load %arg11[%c208_324, %c0_325] : memref<216x1024xbf16, #tpu.memory_space<vmem>>, vector<8x1024xbf16>
    tpu.vector_store %arg11[%c208_324, %c0_325], %219 {strides = array<i32>} : memref<216x1024xbf16, #tpu.memory_space<vmem>>, vector<8x1024xbf16>,
    %c0_326 = arith.constant 0 : index
    %c0_327 = arith.constant 0 : index
    %221 = vector.load %arg7[%c0_326, %c0_327] : memref<4x216xbf16, #tpu.memory_space<vmem>>, vector<4x216xbf16>
    %c0_328 = arith.constant 0 : index
    %c0_329 = arith.constant 0 : index
    %222 = vector.load %arg11[%c0_328, %c0_329] : memref<216x1024xbf16, #tpu.memory_space<vmem>>, vector<216x1024xbf16>
    %cst_330 = arith.constant dense<0.000000e+00> : vector<4x1024xf32>
    %223 = tpu.matmul %221, %222, %cst_330 {dimension_numbers = #tpu.dot_dimension_numbers<[1], [0], [0], [1], [0, 0, 1, 1], [], []>} : vector<4x216xbf16>, vector<216x1024xbf16>, vector<4x1024xf32> -> vector<4x1024xf32>
    %c0_331 = arith.constant 0 : index
    %c0_332 = arith.constant 0 : index
    %224 = vector.load %arg8[%c0_331, %c0_332] : memref<4x1xf32, #tpu.memory_space<vmem>>, vector<4x1xf32>
    %225 = vector.broadcast %224 : vector<4x1xf32> to vector<4x1024xf32>
    %226 = arith.addf %223, %225 : vector<4x1024xf32>
    %cst_333 = arith.constant 0.000000e+00 : f32
    %227 = vector.broadcast %cst_333 : f32 to vector<4x1024xf32>
    %228 = arith.maximumf %226, %227 : vector<4x1024xf32>
    %c0_334 = arith.constant 0 : index
    %c0_335 = arith.constant 0 : index
    %c0_336 = arith.constant 0 : index
    %229 = vector.load %arg9[%c0_334, %c0_335, %c0_336] : memref<1x4x1024xf32, #tpu.memory_space<vmem>>, vector<1x4x1024xf32>
    %230 = vector.shape_cast %229 : vector<1x4x1024xf32> to vector<4x1024xf32>
    %231 = vector.shape_cast %228 : vector<4x1024xf32> to vector<1x4x1024xf32>
    tpu.vector_store %arg9[%c0_334, %c0_335, %c0_336], %231 {strides = array<i32>} : memref<1x4x1024xf32, #tpu.memory_space<vmem>>, vector<1x4x1024xf32>,
    return
  }
  func.func @transform_0(%arg0: i32) -> (i32, i32, i32) {
    %c0_i32 = arith.constant 0 : i32
    %c0_i32_0 = arith.constant 0 : i32
    %c0_i32_1 = arith.constant 0 : i32
    return %arg0, %c0_i32, %c0_i32_0 : i32, i32, i32
  }
  func.func @transform_1(%arg0: i32) -> (i32, i32) {
    %c0_i32 = arith.constant 0 : i32
    %c0_i32_0 = arith.constant 0 : i32
    %c0_i32_1 = arith.constant 0 : i32
    return %c0_i32, %c0_i32_0 : i32, i32
  }
  func.func @transform_2(%arg0: i32) -> (i32, i32) {
    %c0_i32 = arith.constant 0 : i32
    %c0_i32_0 = arith.constant 0 : i32
    %c0_i32_1 = arith.constant 0 : i32
    return %c0_i32, %c0_i32_0 : i32, i32
  }
  func.func @transform_3(%arg0: i32) -> (i32, i32) {
    %c0_i32 = arith.constant 0 : i32
    %c0_i32_0 = arith.constant 0 : i32
    %c0_i32_1 = arith.constant 0 : i32
    return %c0_i32, %c0_i32_0 : i32, i32
  }
  func.func @transform_4(%arg0: i32) -> (i32, i32) {
    %c0_i32 = arith.constant 0 : i32
    %c0_i32_0 = arith.constant 0 : i32
    %c0_i32_1 = arith.constant 0 : i32
    return %c0_i32, %c0_i32_0 : i32, i32
  }
  func.func @transform_5(%arg0: i32) -> (i32, i32) {
    %c0_i32 = arith.constant 0 : i32
    %c0_i32_0 = arith.constant 0 : i32
    %c0_i32_1 = arith.constant 0 : i32
    return %c0_i32, %c0_i32_0 : i32, i32
  }
  func.func @transform_6(%arg0: i32) -> (i32, i32) {
    %c0_i32 = arith.constant 0 : i32
    %c0_i32_0 = arith.constant 0 : i32
    %c0_i32_1 = arith.constant 0 : i32
    return %c0_i32, %c0_i32_0 : i32, i32
  }
  func.func @transform_7(%arg0: i32) -> (i32, i32) {
    %c0_i32 = arith.constant 0 : i32
    %c0_i32_0 = arith.constant 0 : i32
    %c0_i32_1 = arith.constant 0 : i32
    return %c0_i32, %c0_i32_0 : i32, i32
  }
  func.func @transform_8(%arg0: i32) -> (i32, i32, i32) {
    %c0_i32 = arith.constant 0 : i32
    %c0_i32_0 = arith.constant 0 : i32
    %c0_i32_1 = arith.constant 0 : i32
    return %arg0, %c0_i32, %c0_i32_0 : i32, i32, i32
  }
}

</mosaic_0001>

<bundles_post_ra>
// kernel: heat_encoder_forward.1
= control target key start
LH: loop header
LB: loop body
LE: loop exit
PB: predicated region body
PF: predicated region fallthrough
CT: control target
= control target key end

     0   :  { %s6884_s27 = smov 0   ;;  %s9368_s0 = inlined_call_operand.vmem [shape: bf16[2,8,1280], index: 0, kind: input, shape index: {}]   ;;  %s9369_s1 = inlined_call_operand.vmem [shape: f32[1,1024], index: 1, kind: input, shape index: {}]   ;;  %s9370_s2 = inlined_call_operand.vmem [shape: bf16[8,216], index: 2, kind: input, shape index: {}]   ;;  %s9371_s3 = inlined_call_operand.vmem [shape: f32[8,1], index: 3, kind: input, shape index: {}]   ;;  %s9372_s4 = inlined_call_operand.vmem [shape: bf16[8,216], index: 4, kind: input, shape index: {}]   ;;  %s9373_s5 = inlined_call_operand.vmem [shape: f32[8,1], index: 5, kind: input, shape index: {}]   ;;  %s9374_s6 = inlined_call_operand.vmem [shape: bf16[4,216], index: 6, kind: input, shape index: {}]   ;;  %s9375_s7 = inlined_call_operand.vmem [shape: f32[4,1], index: 7, kind: input, shape index: {}]   ;;  %s9376_s8 = inlined_call_operand.vmem [shape: f32[2,4,1024], index: 8, kind: output, shape index: {}]  }
   0x1   :  { %9509 = sst [smem:[#allocation6_spill]] %s9368_s0 }
   0x2   :  { %9510 = sst [smem:[#allocation7_spill]] %s9369_s1 }
   0x3   :  { %9511 = sst [smem:[#allocation8_spill]] %s9370_s2 }
   0x4   :  { %9512 = sst [smem:[#allocation9_spill]] %s9371_s3 }
   0x5   :  { %9513 = sst [smem:[#allocation10_spill]] %s9372_s4 }
   0x6   :  { %9514 = sst [smem:[#allocation11_spill]] %s9376_s8 }
   0x7 LB: > { %9515 = sst [smem:[#allocation4_spill]] %s6810_s27  ;;  %s6369_s28 = sadd.s32 4294967295, %s6810_s27   ;;  %s6810_s27 = sphi %s6884_s27, %s18_s27  }
   0x8   : > { %p6373_p0 = scmp.ge.s32.totalorder %s6810_s27, 1  ;;  %p262_p1 = scmp.lt.s32.totalorder %s6810_s27, 3 }
   0xa   : > { %p263_p2 = pnand %p6373_p0, %p262_p1 }
   0xc   : > { %266 = sbr.rel (%p263_p2) target bundleno = 1649 (0x671), region = 52 }
  0x13   : > { %p296_p3 = scmp.lt.s32.totalorder %s6369_s28, 1  ;;  %s9517_s0 = sld [smem:[#allocation6_spill]]  ;;  %vm335_vm0 = vcmask 1043456   ;;  %vm337_vm1 = vcmask 908288   ;;  %vm379_vm2 = vcmask 900096   ;;  %vm421_vm3 = vcmask 891904  }
  0x14   : > { %s9451_s11 = smov 111   ;;  %s9449_s12 = smov 110   ;;  %vm463_vm4 = vcmask 826368   ;;  %vm505_vm5 = vcmask 818176   ;;  %vm547_vm6 = vcmask 809984   ;;  %vm2072_vm7 = vcmask 719872  }
  0x15   : > { %s9766_s28 = smov (!%p296_p3, %s6369_s28), 1  ;;  %s9439_s13 = smov 109   ;;  %vm9500_vm8 = vcmask 744448   ;;  %vm9438_vm9 = vcmask 736256   ;;  %vm9436_vm10 = vcmask 728064   ;;  %vm9435_vm11 = vcmask 89088  }
  0x16   : > { %9516 = sst [smem:[#allocation5_spill]] %s9766_s28  ;;  %s6761_s29 = smul.u32 40, %s9766_s28  ;;  %vm9437_vm12 = vcmask 80896   ;;  %vm9395_vm13 = vcmask 72704   ;;  %vm9396_vm14 = vcmask 7168   ;;  %vm9397_vm15 = vcmask 1039360  }
  0x17   : > { %s9441_s14 = smov 101   ;;  %s9443_s15 = smov 100  }
  0x18   : > { %s9445_s16 = smov 99   ;;  %s9447_s17 = smov 91  }
  0x19   : > { %s6898_s10 = scalar_lea.vmem %s9517_s0, %s6761_s29  ;;  %s9422_s18 = smov 90  }
  0x1a   : > { %v312_v0 = vld [vmem:[%s6898_s10 + $0x10] sm:$0xff]  ;;  %v310_v1 = vld [vmem:[%s6898_s10] sm:$0xff]  ;;  %v311_v2 = vld [vmem:[%s6898_s10 + $0x8] sm:$0xff]  ;;  %s9416_s19 = smov 89   ;;  %s9412_s20 = smov 11  }
  0x1b   : > { %324 = vrot.lane.b32.xlu1 %v312_v0, %s9451_s11  ;;  %320 = vrot.lane.b32.xlu0 %v310_v1, %s9451_s11  ;;  %s9410_s21 = smov 10   ;;  %s9408_s22 = smov 9   ;;  %v6942_v3 = vld [vmem:[%s6898_s10 + $0x4] sm:$0xff]  ;;  %v6948_v4 = vld [vmem:[%s6898_s10 + $0x14] sm:$0xff] }
  0x1c   : > { %s9404_s23 = smov 1   ;;  %s9402_s24 = smov 127   ;;  %v6951_v5 = vld [vmem:[%s6898_s10 + $0xc] sm:$0xff] }
  0x1d   : > { %s9400_s25 = smov 119   ;;  %s9377_s26 = smov 118  }
  0x1e   : > { %s9393_s29 = smov 117   ;;  %s9379_s30 = smov 39  }
  0x1f   : > { %363 = vrot.lane.b32.xlu1 %v310_v1, %s9449_s12  ;;  %322 = vrot.lane.b32.xlu0 %v311_v2, %s9451_s11  ;;  %s9391_s9 = smov 38   ;;  %s9518_s2 = sld [smem:[#allocation8_spill]] }
  0x20   : > { %s9528_s3 = sld [smem:[#allocation9_spill]]  ;;  %s9563_s1 = sld [smem:[#allocation7_spill]] }
  0x21   : > { %s9573_s4 = sld [smem:[#allocation10_spill]]  ;;  %s9575_s0 = smov 17  }
  0x22   : > { %s9581_s27 = smov 91  }
  0x23   : > { %367 = vrot.lane.b32.xlu1 %v312_v0, %s9449_s12  ;;  %365 = vrot.lane.b32.xlu0 %v311_v2, %s9449_s12 }
  0x27   : > { %407 = vrot.lane.b32.xlu1 %v311_v2, %s9439_s13  ;;  %405 = vrot.lane.b32.xlu0 %v310_v1, %s9439_s13 }
  0x2b   : > { %447 = vrot.lane.b32.xlu1 %v310_v1, %s9441_s14  ;;  %409 = vrot.lane.b32.xlu0 %v312_v0, %s9439_s13 }
  0x2f   : > { %451 = vrot.lane.b32.xlu1 %v312_v0, %s9441_s14  ;;  %449 = vrot.lane.b32.xlu0 %v311_v2, %s9441_s14 }
  0x33   : > { %491 = vrot.lane.b32.xlu1 %v311_v2, %s9443_s15  ;;  %489 = vrot.lane.b32.xlu0 %v310_v1, %s9443_s15 }
  0x37   : > { %531 = vrot.lane.b32.xlu1 %v310_v1, %s9445_s16  ;;  %493 = vrot.lane.b32.xlu0 %v312_v0, %s9443_s15 }
  0x3b   : > { %535 = vrot.lane.b32.xlu1 %v312_v0, %s9445_s16  ;;  %533 = vrot.lane.b32.xlu0 %v311_v2, %s9445_s16 }
  0x3f   : > { %575 = vrot.lane.b32.xlu1 %v311_v2, %s9447_s17  ;;  %573 = vrot.lane.b32.xlu0 %v310_v1, %s9447_s17 }
  0x43   : > { %615 = vrot.lane.b32.xlu1 %v310_v1, %s9422_s18  ;;  %577 = vrot.lane.b32.xlu0 %v312_v0, %s9447_s17 }
  0x47   : > { %619 = vrot.lane.b32.xlu1 %v312_v0, %s9422_s18  ;;  %617 = vrot.lane.b32.xlu0 %v311_v2, %s9422_s18 }
  0x4b   : > { %659 = vrot.lane.b32.xlu1 %v311_v2, %s9416_s19  ;;  %657 = vrot.lane.b32.xlu0 %v310_v1, %s9416_s19 }
  0x4f   : > { %699 = vrot.lane.b32.xlu1 %v310_v1, %s9412_s20  ;;  %661 = vrot.lane.b32.xlu0 %v312_v0, %s9416_s19 }
  0x53   : > { %703 = vrot.lane.b32.xlu1 %v312_v0, %s9412_s20  ;;  %701 = vrot.lane.b32.xlu0 %v311_v2, %s9412_s20 }
  0x57   : > { %743 = vrot.lane.b32.xlu1 %v311_v2, %s9410_s21  ;;  %741 = vrot.lane.b32.xlu0 %v310_v1, %s9410_s21 }
  0x5b   : > { %783 = vrot.lane.b32.xlu1 %v310_v1, %s9408_s22  ;;  %745 = vrot.lane.b32.xlu0 %v312_v0, %s9410_s21 }
  0x5f   : > { %787 = vrot.lane.b32.xlu1 %v312_v0, %s9408_s22  ;;  %785 = vrot.lane.b32.xlu0 %v311_v2, %s9408_s22 }
  0x63   : > { %827 = vrot.lane.b32.xlu1 %v311_v2, %s9404_s23  ;;  %825 = vrot.lane.b32.xlu0 %v310_v1, %s9404_s23  ;;  %v7066_v1 = vld [vmem:[%s9518_s2] sm:$0xff]  ;;  %s9578_s2 = smov 101  }
  0x67   : > { %875 = vrot.lane.b32.xlu1 %v6942_v3, %s9402_s24  ;;  %829 = vrot.lane.b32.xlu0 %v312_v0, %s9404_s23 }
  0x6b   : > { %879 = vrot.lane.b32.xlu1 %v6948_v4, %s9402_s24  ;;  %877 = vrot.lane.b32.xlu0 %v6951_v5, %s9402_s24 }
  0x6f   : > { %919 = vrot.lane.b32.xlu1 %v6951_v5, %s9400_s25  ;;  %917 = vrot.lane.b32.xlu0 %v6942_v3, %s9400_s25 }
  0x73   : > { %959 = vrot.lane.b32.xlu1 %v6942_v3, %s9377_s26  ;;  %921 = vrot.lane.b32.xlu0 %v6948_v4, %s9400_s25 }
  0x77   : > { %963 = vrot.lane.b32.xlu1 %v6948_v4, %s9377_s26  ;;  %961 = vrot.lane.b32.xlu0 %v6951_v5, %s9377_s26  ;;  %s9381_s26 = smov 37  }
  0x7b   : > { %1003 = vrot.lane.b32.xlu1 %v6951_v5, %s9393_s29  ;;  %1001 = vrot.lane.b32.xlu0 %v6942_v3, %s9393_s29 }
  0x7f   : > { %1043 = vrot.lane.b32.xlu1 %v6942_v3, %s9379_s30  ;;  %1005 = vrot.lane.b32.xlu0 %v6948_v4, %s9393_s29  ;;  %s9453_s29 = smov 17  }
  0x83   : > { %1047 = vrot.lane.b32.xlu1 %v6948_v4, %s9379_s30  ;;  %1045 = vrot.lane.b32.xlu0 %v6951_v5, %s9379_s30  ;;  %s9383_s30 = smov 29  }
  0x87   : > { %1087 = vrot.lane.b32.xlu1 %v6951_v5, %s9391_s9  ;;  %1085 = vrot.lane.b32.xlu0 %v6942_v3, %s9391_s9 }
  0x8b   : > { %1127 = vrot.lane.b32.xlu1 %v6942_v3, %s9381_s26  ;;  %1089 = vrot.lane.b32.xlu0 %v6948_v4, %s9391_s9  ;;  %s9520_s9 = smov 117  }
  0x8d   : > { %v6989_v6 = vpop.permute.xlu1 %324  ;;  %v321_v7 = vpop.permute.xlu0 %320 }
  0x8e   : > { %v332_v10 = vrot.slane %v6989_v6, 4  ;;  %v330_v12 = vrot.slane %v321_v7, 4 }
  0x8f   : > { %1131 = vrot.lane.b32.xlu1 %v6948_v4, %s9381_s26  ;;  %1129 = vrot.lane.b32.xlu0 %v6951_v5, %s9381_s26  ;;  %s9385_s26 = smov 28  }
  0x91   : > { %v364_v8 = vpop.permute.xlu1 %363  ;;  %v323_v9 = vpop.permute.xlu0 %322 }
  0x92   : > { %v331_v11 = vrot.slane %v323_v9, 4  ;;  %v373_v13 = vrot.slane %v364_v8, 4 }
  0x93   : > { %1171 = vrot.lane.b32.xlu1 %v6951_v5, %s9383_s30  ;;  %1169 = vrot.lane.b32.xlu0 %v6942_v3, %s9383_s30 }
  0x94   : > { %v336_v18 = vsel %vm335_vm0, %v330_v12, %v331_v11  ;;  %v339_v19 = vsel %vm335_vm0, %v331_v11, %v332_v10 }
  0x95   : > { %v7000_v14 = vpop.permute.xlu1 %367  ;;  %v366_v15 = vpop.permute.xlu0 %365  ;;  %v338_v24 = vsel %vm337_vm1, %v321_v7, %v336_v18  ;;  %v340_v26 = vsel %vm337_vm1, %v323_v9, %v339_v19  ;;  %v7074_v9 = vcombine.high %v7066_v1, %v7066_v1 }
  0x96   : > { %v375_v16 = vrot.slane %v7000_v14, 4  ;;  %v374_v17 = vrot.slane %v366_v15, 4 }
  0x97   : > { %1211 = vrot.lane.b32.xlu1 %v6942_v3, %s9385_s26  ;;  %1173 = vrot.lane.b32.xlu0 %v6948_v4, %s9383_s30  ;;  %s9387_s30 = smov 27  }
  0x98   : > { %v378_v20 = vsel %vm335_vm0, %v373_v13, %v374_v17  ;;  %v381_v21 = vsel %vm335_vm0, %v374_v17, %v375_v16  ;;  %6492 = vmatprep.mubr.msk.bf16.mxu0 %vm2072_vm7, %v7074_v9  ;;  %6494 = vmatprep.mubr.msk.bf16.mxu1 %vm2072_vm7, %v7074_v9 }
  0x99   : > { %v408_v22 = vpop.permute.xlu1 %407  ;;  %v406_v23 = vpop.permute.xlu0 %405  ;;  %v380_v25 = vsel %vm379_vm2, %v364_v8, %v378_v20  ;;  %v382_v27 = vsel %vm379_vm2, %v366_v15, %v381_v21 }
  0x9a   : > { %v6380_v28 = vcombine.high %v338_v24, %v380_v25  ;;  %v6382_v29 = vcombine.high %v340_v26, %v382_v27  ;;  %v6379_v30 = vcombine.low %v338_v24, %v380_v25  ;;  %v6381_v31 = vcombine.low %v340_v26, %v382_v27  ;;  %v314_v25 = vld [vmem:[%s6898_s10 + $0x20] sm:$0xf]  ;;  %v7098_v26 = vld [vmem:[%s6898_s10 + $0x18] sm:$0xff] }
  0x9b   : > { %1215 = vrot.lane.b32.xlu1 %v6948_v4, %s9385_s26  ;;  %1213 = vrot.lane.b32.xlu0 %v6951_v5, %s9385_s26  ;;  %v416_v34 = vrot.slane %v408_v22, 4  ;;  %v415_v35 = vrot.slane %v406_v23, 4  ;;  %s9389_s26 = smov 19  }
  0x9c   : > { %2101 = vmatprep.subr.bf16.mxu0 %v6380_v28  ;;  %2142 = vmatprep.subr.bf16.mxu1 %v6382_v29 }
  0x9d   : > { %v448_v32 = vpop.permute.xlu1 %447  ;;  %2102 = vmatpush1.bf16.msra.mxu0 %v6379_v30  ;;  %2143 = vmatpush1.bf16.msra.mxu1 %v6381_v31  ;;  %v7023_v33 = vpop.permute.xlu0 %409  ;;  %v420_v40 = vsel %vm335_vm0, %v415_v35, %v416_v34 }
  0x9e   : > { %v417_v36 = vrot.slane %v7023_v33, 4  ;;  %v457_v37 = vrot.slane %v448_v32, 4  ;;  %v422_v46 = vsel %vm421_vm3, %v406_v23, %v420_v40 }
  0x9f   : > { %1255 = vrot.lane.b32.xlu1 %v6951_v5, %s9387_s30  ;;  %1253 = vrot.lane.b32.xlu0 %v6942_v3, %s9387_s30 }
  0xa0   : > { %v423_v43 = vsel %vm335_vm0, %v416_v34, %v417_v36 }
  0xa1   : > { %v7030_v38 = vpop.permute.xlu1 %451  ;;  %v450_v39 = vpop.permute.xlu0 %449  ;;  %v424_v51 = vsel %vm421_vm3, %v408_v22, %v423_v43 }
  0xa2   : > { %v459_v41 = vrot.slane %v7030_v38, 4  ;;  %v458_v42 = vrot.slane %v450_v39, 4 }
  0xa3   : > { %1295 = vrot.lane.b32.xlu1 %v6942_v3, %s9389_s26  ;;  %1257 = vrot.lane.b32.xlu0 %v6948_v4, %s9387_s30  ;;  %s9420_s30 = smov 18  }
  0xa4   : > { %v465_v44 = vsel %vm335_vm0, %v458_v42, %v459_v41  ;;  %v462_v45 = vsel %vm335_vm0, %v457_v37, %v458_v42 }
  0xa5   : > { %v466_v47 = vsel %vm463_vm4, %v450_v39, %v465_v44  ;;  %v492_v48 = vpop.permute.xlu1 %491  ;;  %v490_v49 = vpop.permute.xlu0 %489  ;;  %v464_v50 = vsel %vm463_vm4, %v448_v32, %v462_v45  ;;  %v357_v32 = vld [vmem:[%s6898_s10 + $0x20] sm:$0xf] }
  0xa6   : > { %v6388_v52 = vcombine.high %v422_v46, %v464_v50  ;;  %v6390_v53 = vcombine.high %v424_v51, %v466_v47  ;;  %v6387_v54 = vcombine.low %v422_v46, %v464_v50  ;;  %v6389_v55 = vcombine.low %v424_v51, %v466_v47  ;;  %v399_v44 = vld [vmem:[%s6898_s10 + $0x20] sm:$0xf] }
  0xa7   : > { %1299 = vrot.lane.b32.xlu1 %v6948_v4, %s9389_s26  ;;  %1297 = vrot.lane.b32.xlu0 %v6951_v5, %s9389_s26  ;;  %v500_v56 = vrot.slane %v492_v48, 4  ;;  %v499_v57 = vrot.slane %v490_v49, 4  ;;  %s9519_s26 = smov 118  }
  0xa8   : > { %2103 = vmatprep.subr.bf16.mxu0 %v6388_v52  ;;  %2144 = vmatprep.subr.bf16.mxu1 %v6390_v53 }
  0xa9   : > { %v532_v58 = vpop.permute.xlu1 %531  ;;  %2104 = vmatpush1.bf16.msra.mxu0 %v6387_v54  ;;  %2145 = vmatpush1.bf16.msra.mxu1 %v6389_v55  ;;  %v7053_v59 = vpop.permute.xlu0 %493  ;;  %v504_v62 = vsel %vm335_vm0, %v499_v57, %v500_v56 }
  0xaa   : > { %v501_v60 = vrot.slane %v7053_v59, 4  ;;  %v541_v61 = vrot.slane %v532_v58, 4  ;;  %v506_v13 = vsel %vm505_vm5, %v490_v49, %v504_v62 }
  0xab   : > { %1339 = vrot.lane.b32.xlu1 %v6951_v5, %s9420_s30  ;;  %1337 = vrot.lane.b32.xlu0 %v6942_v3, %s9420_s30 }
  0xac   : > { %v507_v8 = vsel %vm335_vm0, %v500_v56, %v501_v60  ;;  %v441_v56 = vld [vmem:[%s6898_s10 + $0x20] sm:$0xf] }
  0xad   : > { %v7061_v63 = vpop.permute.xlu1 %535  ;;  %v534_v0 = vpop.permute.xlu0 %533  ;;  %v508_v20 = vsel %vm505_vm5, %v492_v48, %v507_v8  ;;  %v483_v8 = vld [vmem:[%s6898_s10 + $0x20] sm:$0xf] }
  0xae   : > { %v543_v2 = vrot.slane %v7061_v63, 4  ;;  %v542_v7 = vrot.slane %v534_v0, 4 }
  0xaf   : > { %1379 = vrot.lane.b32.xlu1 %v6942_v3, %s9453_s29  ;;  %1341 = vrot.lane.b32.xlu0 %v6948_v4, %s9420_s30 }
  0xb0   : > { %v549_v11 = vsel %vm335_vm0, %v542_v7, %v543_v2  ;;  %v546_v12 = vsel %vm335_vm0, %v541_v61, %v542_v7 }
  0xb1   : > { %v550_v15 = vsel %vm547_vm6, %v534_v0, %v549_v11  ;;  %v576_v17 = vpop.permute.xlu1 %575  ;;  %v574_v18 = vpop.permute.xlu0 %573  ;;  %v548_v19 = vsel %vm547_vm6, %v532_v58, %v546_v12 }
  0xb2   : > { %v6396_v21 = vcombine.high %v506_v13, %v548_v19  ;;  %v6398_v22 = vcombine.high %v508_v20, %v550_v15  ;;  %v6395_v23 = vcombine.low %v506_v13, %v548_v19  ;;  %v6397_v24 = vcombine.low %v508_v20, %v550_v15  ;;  %v525_v20 = vld [vmem:[%s6898_s10 + $0x20] sm:$0xf] }
  0xb3   : > { %1383 = vrot.lane.b32.xlu1 %v6948_v4, %s9453_s29  ;;  %1381 = vrot.lane.b32.xlu0 %v6951_v5, %s9453_s29  ;;  %v584_v29 = vrot.slane %v576_v17, 4  ;;  %v583_v30 = vrot.slane %v574_v18, 4 }
  0xb4   : > { %2105 = vmatprep.subr.bf16.mxu0 %v6396_v21  ;;  %2146 = vmatprep.subr.bf16.mxu1 %v6398_v22 }
  0xb5   : > { %v616_v27 = vpop.permute.xlu1 %615  ;;  %2106 = vmatpush1.bf16.msra.mxu0 %v6395_v23  ;;  %2147 = vmatpush1.bf16.msra.mxu1 %v6397_v24  ;;  %v7100_v28 = vpop.permute.xlu0 %577  ;;  %v588_v37 = vsel %vm335_vm0, %v583_v30, %v584_v29 }
  0xb6   : > { %v585_v4 = vrot.slane %v7100_v28, 4  ;;  %v625_v31 = vrot.slane %v616_v27, 4  ;;  %v590_v46 = vsel %vm9500_vm8, %v574_v18, %v588_v37  ;;  %v567_v37 = vld [vmem:[%s6898_s10 + $0x20] sm:$0xf] }
  0xb7   : > { %328 = vrot.lane.b32.xlu1 %v314_v25, %s9451_s11  ;;  %326 = vrot.lane.b32.xlu0 %v7098_v26, %s9451_s11 }
  0xb8   : > { %v591_v42 = vsel %vm335_vm0, %v584_v29, %v585_v4 }
  0xb9   : > { %v7107_v34 = vpop.permute.xlu1 %619  ;;  %v618_v35 = vpop.permute.xlu0 %617  ;;  %v592_v51 = vsel %vm9500_vm8, %v576_v17, %v591_v42 }
  0xba   : > { %v627_v39 = vrot.slane %v7107_v34, 4  ;;  %v626_v40 = vrot.slane %v618_v35, 4 }
  0xbb   : > { %371 = vrot.lane.b32.xlu1 %v357_v32, %s9449_s12  ;;  %369 = vrot.lane.b32.xlu0 %v7098_v26, %s9449_s12 }
  0xbc   : > { %v633_v43 = vsel %vm335_vm0, %v626_v40, %v627_v39  ;;  %v630_v45 = vsel %vm335_vm0, %v625_v31, %v626_v40 }
  0xbd   : > { %v634_v47 = vsel %vm9438_vm9, %v618_v35, %v633_v43  ;;  %v660_v48 = vpop.permute.xlu1 %659  ;;  %v658_v49 = vpop.permute.xlu0 %657  ;;  %v632_v50 = vsel %vm9438_vm9, %v616_v27, %v630_v45 }
  0xbe   : > { %v6404_v52 = vcombine.high %v590_v46, %v632_v50  ;;  %v6406_v53 = vcombine.high %v592_v51, %v634_v47  ;;  %v6403_v54 = vcombine.low %v590_v46, %v632_v50  ;;  %v6405_v55 = vcombine.low %v592_v51, %v634_v47  ;;  %v609_v47 = vld [vmem:[%s6898_s10 + $0x20] sm:$0xf] }
  0xbf   : > { %413 = vrot.lane.b32.xlu1 %v399_v44, %s9439_s13  ;;  %411 = vrot.lane.b32.xlu0 %v7098_v26, %s9439_s13  ;;  %v668_v61 = vrot.slane %v660_v48, 4  ;;  %v667_v62 = vrot.slane %v658_v49, 4 }
  0xc0   : > { %2107 = vmatprep.subr.bf16.mxu0 %v6404_v52  ;;  %2148 = vmatprep.subr.bf16.mxu1 %v6406_v53 }
  0xc1   : > { %v700_v57 = vpop.permute.xlu1 %699  ;;  %2108 = vmatpush1.bf16.msra.mxu0 %v6403_v54  ;;  %2149 = vmatpush1.bf16.msra.mxu1 %v6405_v55  ;;  %v7130_v58 = vpop.permute.xlu0 %661  ;;  %v672_v13 = vsel %vm335_vm0, %v667_v62, %v668_v61  ;;  %v651_v55 = vld [vmem:[%s6898_s10 + $0x20] sm:$0xf] }
  0xc2   : > { %v669_v0 = vrot.slane %v7130_v58, 4  ;;  %v709_v7 = vrot.slane %v700_v57, 4  ;;  %v674_v22 = vsel %vm9436_vm10, %v658_v49, %v672_v13 }
  0xc3   : > { %455 = vrot.lane.b32.xlu1 %v441_v56, %s9441_s14  ;;  %453 = vrot.lane.b32.xlu0 %v7098_v26, %s9441_s14 }
  0xc4   : > { %v675_v18 = vsel %vm335_vm0, %v668_v61, %v669_v0 }
  0xc5   : > { %v7137_v11 = vpop.permute.xlu1 %703  ;;  %v702_v12 = vpop.permute.xlu0 %701  ;;  %v676_v29 = vsel %vm9436_vm10, %v660_v48, %v675_v18 }
  0xc6   : > { %v711_v15 = vrot.slane %v7137_v11, 4  ;;  %v710_v17 = vrot.slane %v702_v12, 4 }
  0xc7   : > { %497 = vrot.lane.b32.xlu1 %v483_v8, %s9443_s15  ;;  %495 = vrot.lane.b32.xlu0 %v7098_v26, %s9443_s15 }
  0xc8   : > { %v717_v19 = vsel %vm335_vm0, %v710_v17, %v711_v15  ;;  %v714_v21 = vsel %vm335_vm0, %v709_v7, %v710_v17 }
  0xc9   : > { %v718_v23 = vsel %vm9435_vm11, %v702_v12, %v717_v19  ;;  %v744_v24 = vpop.permute.xlu1 %743  ;;  %v742_v25 = vpop.permute.xlu0 %741  ;;  %v716_v27 = vsel %vm9435_vm11, %v700_v57, %v714_v21 }
  0xca   : > { %v6412_v30 = vcombine.high %v674_v22, %v716_v27  ;;  %v6414_v31 = vcombine.high %v676_v29, %v718_v23  ;;  %v6411_v32 = vcombine.low %v674_v22, %v716_v27  ;;  %v6413_v35 = vcombine.low %v676_v29, %v718_v23  ;;  %v693_v23 = vld [vmem:[%s6898_s10 + $0x20] sm:$0xf] }
  0xcb   : > { %539 = vrot.lane.b32.xlu1 %v525_v20, %s9445_s16  ;;  %537 = vrot.lane.b32.xlu0 %v7098_v26, %s9445_s16  ;;  %v752_v43 = vrot.slane %v744_v24, 4  ;;  %v751_v44 = vrot.slane %v742_v25, 4 }
  0xcc   : > { %2109 = vmatprep.subr.bf16.mxu0 %v6412_v30  ;;  %2150 = vmatprep.subr.bf16.mxu1 %v6414_v31 }
  0xcd   : > { %v784_v40 = vpop.permute.xlu1 %783  ;;  %2110 = vmatpush1.bf16.msra.mxu0 %v6411_v32  ;;  %2151 = vmatpush1.bf16.msra.mxu1 %v6413_v35  ;;  %v7160_v42 = vpop.permute.xlu0 %745  ;;  %v756_v50 = vsel %vm335_vm0, %v751_v44, %v752_v43  ;;  %v735_v32 = vld [vmem:[%s6898_s10 + $0x20] sm:$0xf] }
  0xce   : > { %v753_v45 = vrot.slane %v7160_v42, 4  ;;  %v793_v46 = vrot.slane %v784_v40, 4  ;;  %v758_v57 = vsel %vm9437_vm12, %v742_v25, %v756_v50 }
  0xcf   : > { %581 = vrot.lane.b32.xlu1 %v567_v37, %s9447_s17  ;;  %579 = vrot.lane.b32.xlu0 %v7098_v26, %s9447_s17 }
  0xd0   : > { %v759_v53 = vsel %vm335_vm0, %v752_v43, %v753_v45 }
  0xd1   : > { %v7167_v48 = vpop.permute.xlu1 %787  ;;  %v786_v49 = vpop.permute.xlu0 %785  ;;  %v760_v12 = vsel %vm9437_vm12, %v744_v24, %v759_v53 }
  0xd2   : > { %v795_v51 = vrot.slane %v7167_v48, 4  ;;  %v794_v52 = vrot.slane %v786_v49, 4 }
  0xd3   : > { %623 = vrot.lane.b32.xlu1 %v609_v47, %s9422_s18  ;;  %621 = vrot.lane.b32.xlu0 %v7098_v26, %s9422_s18  ;;  %s9566_s18 = smov 11  }
  0xd4   : > { %v801_v54 = vsel %vm335_vm0, %v794_v52, %v795_v51  ;;  %v798_v56 = vsel %vm335_vm0, %v793_v46, %v794_v52 }
  0xd5   : > { %v802_v61 = vsel %vm9395_vm13, %v786_v49, %v801_v54  ;;  %v828_v62 = vpop.permute.xlu1 %827  ;;  %v826_v7 = vpop.permute.xlu0 %825  ;;  %v800_v8 = vsel %vm9395_vm13, %v784_v40, %v798_v56  ;;  %v777_v49 = vld [vmem:[%s6898_s10 + $0x20] sm:$0xf]  ;;  %vm9398_vm13 = vcmask 973824  }
  0xd6   : > { %v836_v13 = vrot.slane %v828_v62, 4  ;;  %v835_v17 = vrot.slane %v826_v7, 4  ;;  %v6420_v18 = vcombine.high %v758_v57, %v800_v8  ;;  %v6422_v19 = vcombine.high %v760_v12, %v802_v61 }
  0xd7   : > { %665 = vrot.lane.b32.xlu1 %v651_v55, %s9416_s19  ;;  %663 = vrot.lane.b32.xlu0 %v7098_v26, %s9416_s19  ;;  %v6419_v20 = vcombine.low %v758_v57, %v800_v8  ;;  %v6421_v21 = vcombine.low %v760_v12, %v802_v61  ;;  %v819_v57 = vld [vmem:[%s6898_s10 + $0x20] sm:$0xf]  ;;  %s9527_s19 = smov 19  }
  0xd8   : > { %v840_v22 = vsel %vm335_vm0, %v835_v17, %v836_v13  ;;  %2111 = vmatprep.subr.bf16.mxu0 %v6420_v18  ;;  %2152 = vmatprep.subr.bf16.mxu1 %v6422_v19  ;;  %v869_v19 = vld [vmem:[%s6898_s10 + $0x24] sm:$0xf] }
  0xd9   : > { %v842_v25 = vsel %vm9396_vm14, %v826_v7, %v840_v22  ;;  %v876_v24 = vpop.permute.xlu1 %875  ;;  %2112 = vmatpush1.bf16.msra.mxu0 %v6419_v20  ;;  %2153 = vmatpush1.bf16.msra.mxu1 %v6421_v21  ;;  %v7192_v27 = vpop.permute.xlu0 %829  ;;  %v7233_v20 = vld [vmem:[%s6898_s10 + $0x1c] sm:$0xff] }
  0xda   : > { %v837_v29 = vrot.slane %v7192_v27, 4  ;;  %v6428_v30 = vcombine.high %v842_v25, %v6942_v3  ;;  %v6427_v31 = vcombine.low %v842_v25, %v6942_v3  ;;  %v885_v44 = vrot.slane %v876_v24, 4 }
  0xdb   : > { %707 = vrot.lane.b32.xlu1 %v693_v23, %s9412_s20  ;;  %705 = vrot.lane.b32.xlu0 %v7098_v26, %s9412_s20  ;;  %s9526_s20 = smov 27  }
  0xdc   : > { %2113 = vmatprep.subr.bf16.mxu0 %v6428_v30  ;;  %v843_v35 = vsel %vm335_vm0, %v836_v13, %v837_v29 }
  0xdd   : > { %v7204_v37 = vpop.permute.xlu1 %879  ;;  %2114 = vmatpush1.bf16.msra.mxu0 %v6427_v31  ;;  %v878_v40 = vpop.permute.xlu0 %877  ;;  %v844_v43 = vsel %vm9396_vm14, %v828_v62, %v843_v35  ;;  %v911_v35 = vld [vmem:[%s6898_s10 + $0x24] sm:$0xf]  ;;  %vm9399_vm14 = vcmask 965632  }
  0xde   : > { %v886_v3 = vrot.slane %v878_v40, 4  ;;  %v6430_v46 = vcombine.high %v844_v43, %v6951_v5  ;;  %v6429_v47 = vcombine.low %v844_v43, %v6951_v5  ;;  %v887_v53 = vrot.slane %v7204_v37, 4 }
  0xdf   : > { %749 = vrot.lane.b32.xlu1 %v735_v32, %s9410_s21  ;;  %747 = vrot.lane.b32.xlu0 %v7098_v26, %s9410_s21  ;;  %s9525_s21 = smov 28  }
  0xe0   : > { %2154 = vmatprep.subr.bf16.mxu1 %v6430_v46  ;;  %v890_v56 = vsel %vm335_vm0, %v885_v44, %v886_v3  ;;  %v893_v12 = vsel %vm335_vm0, %v886_v3, %v887_v53 }
  0xe1   : > { %v920_v50 = vpop.permute.xlu1 %919  ;;  %2155 = vmatpush1.bf16.msra.mxu1 %v6429_v47  ;;  %v918_v52 = vpop.permute.xlu0 %917  ;;  %v892_v8 = vsel %vm9397_vm15, %v876_v24, %v890_v56  ;;  %v894_v22 = vsel %vm9397_vm15, %v878_v40, %v893_v12  ;;  %vm9414_vm15 = vcmask 957440   ;;  %v995_v12 = vld [vmem:[%s6898_s10 + $0x24] sm:$0xf] }
  0xe2   : > { %v928_v54 = vrot.slane %v920_v50, 4  ;;  %v927_v55 = vrot.slane %v918_v52, 4 }
  0xe3   : > { %791 = vrot.lane.b32.xlu1 %v777_v49, %s9408_s22  ;;  %789 = vrot.lane.b32.xlu0 %v7098_v26, %s9408_s22  ;;  %s9524_s22 = smov 29  }
  0xe4   : > { %v932_v5 = vsel %vm335_vm0, %v927_v55, %v928_v54 }
  0xe5   : > { %v934_v61 = vsel %vm9398_vm13, %v918_v52, %v932_v5  ;;  %v960_v62 = vpop.permute.xlu1 %959  ;;  %v7221_v7 = vpop.permute.xlu0 %921 }
  0xe6   : > { %v929_v13 = vrot.slane %v7221_v7, 4  ;;  %v6436_v17 = vcombine.high %v892_v8, %v934_v61  ;;  %v6435_v18 = vcombine.low %v892_v8, %v934_v61  ;;  %v969_v30 = vrot.slane %v960_v62, 4 }
  0xe7   : > { %833 = vrot.lane.b32.xlu1 %v819_v57, %s9404_s23  ;;  %831 = vrot.lane.b32.xlu0 %v7098_v26, %s9404_s23  ;;  %s9523_s23 = smov 37  }
  0xe8   : > { %2115 = vmatprep.subr.bf16.mxu0 %v6436_v17  ;;  %v935_v21 = vsel %vm335_vm0, %v928_v54, %v929_v13 }
  0xe9   : > { %v7239_v23 = vpop.permute.xlu1 %963  ;;  %2116 = vmatpush1.bf16.msra.mxu0 %v6435_v18  ;;  %v962_v25 = vpop.permute.xlu0 %961  ;;  %v936_v24 = vsel %vm9398_vm13, %v920_v50, %v935_v21  ;;  %v953_v50 = vld [vmem:[%s6898_s10 + $0x24] sm:$0xf]  ;;  %vm9406_vm13 = vcmask 318464  }
  0xea   : > { %v970_v31 = vrot.slane %v962_v25, 4  ;;  %v6438_v26 = vcombine.high %v894_v22, %v936_v24  ;;  %v6437_v32 = vcombine.low %v894_v22, %v936_v24  ;;  %v9434_v44 = vrot.slane %v7239_v23, 4 }
  0xeb   : > { %883 = vrot.lane.b32.xlu1 %v869_v19, %s9402_s24  ;;  %881 = vrot.lane.b32.xlu0 %v7233_v20, %s9402_s24  ;;  %s9522_s24 = smov 38  }
  0xec   : > { %2156 = vmatprep.subr.bf16.mxu1 %v6438_v26  ;;  %v974_v47 = vsel %vm335_vm0, %v969_v30, %v970_v31  ;;  %v977_v5 = vsel %vm335_vm0, %v970_v31, %v9434_v44  ;;  %v1037_v26 = vld [vmem:[%s6898_s10 + $0x24] sm:$0xf] }
  0xed   : > { %v1004_v40 = vpop.permute.xlu1 %1003  ;;  %2157 = vmatpush1.bf16.msra.mxu1 %v6437_v32  ;;  %v1002_v43 = vpop.permute.xlu0 %1001  ;;  %v976_v56 = vsel %vm9399_vm14, %v960_v62, %v974_v47  ;;  %v978_v17 = vsel %vm9399_vm14, %v962_v25, %v977_v5  ;;  %vm9407_vm14 = vcmask 310272   ;;  %v1079_v47 = vld [vmem:[%s6898_s10 + $0x24] sm:$0xf] }
  0xee   : > { %v1012_v3 = vrot.slane %v1004_v40, 4  ;;  %v1011_v46 = vrot.slane %v1002_v43, 4 }
  0xef   : > { %925 = vrot.lane.b32.xlu1 %v911_v35, %s9400_s25  ;;  %923 = vrot.lane.b32.xlu0 %v7233_v20, %s9400_s25  ;;  %s9521_s25 = smov 39  }
  0xf0   : > { %v1016_v49 = vsel %vm335_vm0, %v1011_v46, %v1012_v3 }
  0xf1   : > { %v1018_v52 = vsel %vm9414_vm15, %v1002_v43, %v1016_v49  ;;  %v1044_v54 = vpop.permute.xlu1 %1043  ;;  %v7254_v55 = vpop.permute.xlu0 %1005 }
  0xf2   : > { %v9430_v57 = vrot.slane %v7254_v55, 4  ;;  %v6444_v61 = vcombine.high %v976_v56, %v1018_v52  ;;  %v6443_v8 = vcombine.low %v976_v56, %v1018_v52  ;;  %v1053_v22 = vrot.slane %v1044_v54, 4 }
  0xf3   : > { %967 = vrot.lane.b32.xlu1 %v953_v50, %s9519_s26  ;;  %965 = vrot.lane.b32.xlu0 %v7233_v20, %s9519_s26 }
  0xf4   : > { %2117 = vmatprep.subr.bf16.mxu0 %v6444_v61  ;;  %v1019_v62 = vsel %vm335_vm0, %v1012_v3, %v9430_v57 }
  0xf5   : > { %v7269_v18 = vpop.permute.xlu1 %1047  ;;  %2118 = vmatpush1.bf16.msra.mxu0 %v6443_v8  ;;  %v1046_v19 = vpop.permute.xlu0 %1045  ;;  %v1020_v21 = vsel %vm9414_vm15, %v1004_v40, %v1019_v62  ;;  %v1121_v62 = vld [vmem:[%s6898_s10 + $0x24] sm:$0xf]  ;;  %vm9424_vm15 = vcmask 228352  }
  0xf6   : > { %v1054_v24 = vrot.slane %v1046_v19, 4  ;;  %v6446_v30 = vcombine.high %v978_v17, %v1020_v21  ;;  %v6445_v31 = vcombine.low %v978_v17, %v1020_v21  ;;  %v9429_v35 = vrot.slane %v7269_v18, 4 }
  0xf7   : > { %1009 = vrot.lane.b32.xlu1 %v995_v12, %s9520_s9  ;;  %1007 = vrot.lane.b32.xlu0 %v7233_v20, %s9520_s9 }
  0xf8   : > { %2158 = vmatprep.subr.bf16.mxu1 %v6446_v30  ;;  %v1058_v3 = vsel %vm335_vm0, %v1053_v22, %v1054_v24  ;;  %v1061_v5 = vsel %vm335_vm0, %v1054_v24, %v9429_v35 }
  0xf9   : > { %v1088_v25 = vpop.permute.xlu1 %1087  ;;  %2159 = vmatpush1.bf16.msra.mxu1 %v6445_v31  ;;  %v1086_v32 = vpop.permute.xlu0 %1085  ;;  %v1060_v56 = vsel %vm9406_vm13, %v1044_v54, %v1058_v3  ;;  %v1062_v17 = vsel %vm9406_vm13, %v1046_v19, %v1061_v5  ;;  %vm9415_vm13 = vcmask 302080   ;;  %v1205_v5 = vld [vmem:[%s6898_s10 + $0x24] sm:$0xf] }
  0xfa   : > { %v1096_v40 = vrot.slane %v1088_v25, 4  ;;  %v1095_v43 = vrot.slane %v1086_v32, 4 }
  0xfb   : > { %1051 = vrot.lane.b32.xlu1 %v1037_v26, %s9521_s25  ;;  %1049 = vrot.lane.b32.xlu0 %v7233_v20, %s9521_s25 }
  0xfc   : > { %v1100_v46 = vsel %vm335_vm0, %v1095_v43, %v1096_v40  ;;  %v1163_v43 = vld [vmem:[%s6898_s10 + $0x24] sm:$0xf] }
  0xfd   : > { %v1102_v49 = vsel %vm9407_vm14, %v1086_v32, %v1100_v46  ;;  %v1128_v50 = vpop.permute.xlu1 %1127  ;;  %v7284_v52 = vpop.permute.xlu0 %1089 }
  0xfe   : > { %v9428_v61 = vrot.slane %v7284_v52, 4  ;;  %v6452_v8 = vcombine.high %v1060_v56, %v1102_v49  ;;  %v6451_v12 = vcombine.low %v1060_v56, %v1102_v49  ;;  %v1137_v30 = vrot.slane %v1128_v50, 4 }
  0xff   : > { %1093 = vrot.lane.b32.xlu1 %v1079_v47, %s9522_s24  ;;  %1091 = vrot.lane.b32.xlu0 %v7233_v20, %s9522_s24 }
 0x100   : > { %2119 = vmatprep.subr.bf16.mxu0 %v6452_v8  ;;  %v1103_v54 = vsel %vm335_vm0, %v1096_v40, %v9428_v61  ;;  %v6838_v40 = vmov 0  }
 0x101   : > { %v7299_v21 = vpop.permute.xlu1 %1131  ;;  %2120 = vmatpush1.bf16.msra.mxu0 %v6451_v12  ;;  %v1130_v22 = vpop.permute.xlu0 %1129  ;;  %v1104_v24 = vsel %vm9407_vm14, %v1088_v25, %v1103_v54  ;;  %6797 = vset.pattern.permute.xlu0 %v6838_v40  ;;  %308 = vst [vmem:[#allocation2] sm:$0xf] %v6838_v40  ;;  %309 = vst [vmem:[#allocation2 + $0x24] sm:$0xf] %v6838_v40  ;;  %vm9425_vm14 = vcmask 236544  }
 0x102   : > { %v1138_v31 = vrot.slane %v1130_v22, 4  ;;  %v6454_v26 = vcombine.high %v1062_v17, %v1104_v24  ;;  %v6453_v32 = vcombine.low %v1062_v17, %v1104_v24  ;;  %6798 = vset.pattern.permute.xlu1 %v6838_v40  ;;  %v9427_v3 = vrot.slane %v7299_v21, 4 }
 0x103   : > { %1135 = vrot.lane.b32.xlu1 %v1121_v62, %s9523_s23  ;;  %1133 = vrot.lane.b32.xlu0 %v7233_v20, %s9523_s23 }
 0x104   : > { %2160 = vmatprep.subr.bf16.mxu1 %v6454_v26  ;;  %v1142_v49 = vsel %vm335_vm0, %v1137_v30, %v1138_v31  ;;  %v1145_v17 = vsel %vm335_vm0, %v1138_v31, %v9427_v3 }
 0x105   : > { %v1172_v19 = vpop.permute.xlu1 %1171  ;;  %2161 = vmatpush1.bf16.msra.mxu1 %v6453_v32  ;;  %v1170_v25 = vpop.permute.xlu0 %1169  ;;  %v1144_v54 = vsel %vm9415_vm13, %v1128_v50, %v1142_v49  ;;  %v1247_v32 = vld [vmem:[%s6898_s10 + $0x24] sm:$0xf] }
 0x106   : > { %v1180_v46 = vrot.slane %v1172_v19, 4  ;;  %v1179_v47 = vrot.slane %v1170_v25, 4 }
 0x107   : > { %1177 = vrot.lane.b32.xlu1 %v1163_v43, %s9524_s22  ;;  %1175 = vrot.lane.b32.xlu0 %v7233_v20, %s9524_s22  ;;  %v1146_v43 = vsel %vm9415_vm13, %v1130_v22, %v1145_v17  ;;  %vm9431_vm13 = vcmask 220160  }
 0x108   : > { %v1184_v56 = vsel %vm335_vm0, %v1179_v47, %v1180_v46 }
 0x109   : > { %v1186_v8 = vsel %vm9425_vm14, %v1170_v25, %v1184_v56  ;;  %v1212_v12 = vpop.permute.xlu1 %1211  ;;  %v7314_v62 = vpop.permute.xlu0 %1173 }
 0x10a   : > { %v9418_v24 = vrot.slane %v7314_v62, 4  ;;  %v6460_v30 = vcombine.high %v1144_v54, %v1186_v8  ;;  %v6459_v26 = vcombine.low %v1144_v54, %v1186_v8  ;;  %v1221_v47 = vrot.slane %v1212_v12, 4 }
 0x10b   : > { %1219 = vrot.lane.b32.xlu1 %v1205_v5, %s9525_s21  ;;  %1217 = vrot.lane.b32.xlu0 %v7233_v20, %s9525_s21 }
 0x10c   : > { %2121 = vmatprep.subr.bf16.mxu0 %v6460_v30  ;;  %v1187_v50 = vsel %vm335_vm0, %v1180_v46, %v9418_v24  ;;  %v1289_v46 = vld [vmem:[%s6898_s10 + $0x24] sm:$0xf] }
 0x10d   : > { %v7329_v40 = vpop.permute.xlu1 %1215  ;;  %2122 = vmatpush1.bf16.msra.mxu0 %v6459_v26  ;;  %v1214_v31 = vpop.permute.xlu0 %1213  ;;  %v1188_v25 = vsel %vm9425_vm14, %v1172_v19, %v1187_v50  ;;  %vm1353_vm14 = vcmask 146432  }
 0x10e   : > { %v1222_v49 = vrot.slane %v1214_v31, 4  ;;  %v6462_v56 = vcombine.high %v1146_v43, %v1188_v25  ;;  %v6461_v5 = vcombine.low %v1146_v43, %v1188_v25  ;;  %v9419_v54 = vrot.slane %v7329_v40, 4 }
 0x10f   : > { %1261 = vrot.lane.b32.xlu1 %v1247_v32, %s9526_s20  ;;  %1259 = vrot.lane.b32.xlu0 %v7233_v20, %s9526_s20  ;;  %v1331_v32 = vld [vmem:[%s6898_s10 + $0x24] sm:$0xf] }
 0x110   : > { %2162 = vmatprep.subr.bf16.mxu1 %v6462_v56  ;;  %v1226_v30 = vsel %vm335_vm0, %v1221_v47, %v1222_v49  ;;  %v1229_v47 = vsel %vm335_vm0, %v1222_v49, %v9419_v54 }
 0x111   : > { %v1256_v22 = vpop.permute.xlu1 %1255  ;;  %2163 = vmatpush1.bf16.msra.mxu1 %v6461_v5  ;;  %v1254_v8 = vpop.permute.xlu0 %1253  ;;  %v1228_v56 = vsel %vm9424_vm15, %v1212_v12, %v1226_v30  ;;  %v1230_v12 = vsel %vm9424_vm15, %v1214_v31, %v1229_v47  ;;  %v1520_v31 = vld [vmem:[%s9528_s3] sm:$0xff]  ;;  %vm1311_vm15 = vcmask 154624   ;;  %s9579_s3 = smov 100  }
 0x112   : > { %v1264_v19 = vrot.slane %v1256_v22, 4  ;;  %v1263_v17 = vrot.slane %v1254_v8, 4 }
 0x113   : > { %1303 = vrot.lane.b32.xlu1 %v1289_v46, %s9527_s19  ;;  %1301 = vrot.lane.b32.xlu0 %v7233_v20, %s9527_s19 }
 0x114   : > { %v1268_v26 = vsel %vm335_vm0, %v1263_v17, %v1264_v19 }
 0x115   : > { %v1270_v50 = vsel %vm9431_vm13, %v1254_v8, %v1268_v26  ;;  %v1296_v43 = vpop.permute.xlu1 %1295  ;;  %v7344_v25 = vpop.permute.xlu0 %1257  ;;  %v1373_v8 = vld [vmem:[%s6898_s10 + $0x24] sm:$0xf] }
 0x116   : > { %v9426_v5 = vrot.slane %v7344_v25, 4  ;;  %v6468_v46 = vcombine.high %v1228_v56, %v1270_v50  ;;  %v6467_v24 = vcombine.low %v1228_v56, %v1270_v50  ;;  %v1305_v50 = vrot.slane %v1296_v43, 4 }
 0x117   : > { %1345 = vrot.lane.b32.xlu1 %v1331_v32, %s9420_s30  ;;  %1343 = vrot.lane.b32.xlu0 %v7233_v20, %s9420_s30  ;;  %s9564_s30 = smov 90  }
 0x118   : > { %2123 = vmatprep.subr.bf16.mxu0 %v6468_v46  ;;  %v1271_v17 = vsel %vm335_vm0, %v1264_v19, %v9426_v5 }
 0x119   : > { %v7359_v30 = vpop.permute.xlu1 %1299  ;;  %2124 = vmatpush1.bf16.msra.mxu0 %v6467_v24  ;;  %v1298_v49 = vpop.permute.xlu0 %1297  ;;  %v1272_v26 = vsel %vm9431_vm13, %v1256_v22, %v1271_v17  ;;  %vm1395_vm13 = vcmask 138240  }
 0x11a   : > { %v1306_v56 = vrot.slane %v1298_v49, 4  ;;  %v6470_v32 = vcombine.high %v1230_v12, %v1272_v26  ;;  %v6469_v54 = vcombine.low %v1230_v12, %v1272_v26  ;;  %v9433_v22 = vrot.slane %v7359_v30, 4 }
 0x11b   : > { %1387 = vrot.lane.b32.xlu1 %v1373_v8, %s9453_s29  ;;  %1385 = vrot.lane.b32.xlu0 %v7233_v20, %s9453_s29 }
 0x11c   : > { %2164 = vmatprep.subr.bf16.mxu1 %v6470_v32  ;;  %v1310_v17 = vsel %vm335_vm0, %v1305_v50, %v1306_v56 }
 0x11d   : > { %v1340_v19 = vpop.permute.xlu1 %1339  ;;  %2165 = vmatpush1.bf16.msra.mxu1 %v6469_v54  ;;  %v1338_v24 = vpop.permute.xlu0 %1337  ;;  %v1312_v5 = vsel %vm1311_vm15, %v1296_v43, %v1310_v17  ;;  %v1313_v54 = vsel %vm335_vm0, %v1306_v56, %v9433_v22 }
 0x11e   : > { %v1348_v47 = vrot.slane %v1340_v19, 4  ;;  %v1347_v46 = vrot.slane %v1338_v24, 4 }
 0x11f   : > { %1523 = vperm.xlu0 %6797, %v1520_v31   ;;  %v1314_v31 = vsel %vm1311_vm15, %v1298_v49, %v1313_v54 }
 0x120   : > { %v1352_v8 = vsel %vm335_vm0, %v1347_v46, %v1348_v47 }
 0x121   : > { %v1354_v12 = vsel %vm1353_vm14, %v1338_v24, %v1352_v8  ;;  %v1380_v26 = vpop.permute.xlu1 %1379  ;;  %v7372_v32 = vpop.permute.xlu0 %1341 }
 0x122   : > { %v9432_v3 = vrot.slane %v7372_v32, 4  ;;  %v6476_v61 = vcombine.high %v1312_v5, %v1354_v12  ;;  %v6475_v35 = vcombine.low %v1312_v5, %v1354_v12  ;;  %v1389_v57 = vrot.slane %v1380_v26, 4 }
 0x124   : > { %2125 = vmatprep.subr.bf16.mxu0 %v6476_v61  ;;  %v1355_v50 = vsel %vm335_vm0, %v1348_v47, %v9432_v3 }
 0x125   : > { %v7383_v24 = vpop.permute.xlu1 %1383  ;;  %2126 = vmatpush1.bf16.msra.mxu0 %v6475_v35  ;;  %v1382_v43 = vpop.permute.xlu0 %1381  ;;  %v1356_v46 = vsel %vm1353_vm14, %v1340_v19, %v1355_v50 }
 0x126   : > { %v1391_v56 = vrot.slane %v7383_v24, 4  ;;  %v1390_v17 = vrot.slane %v1382_v43, 4  ;;  %v6478_v8 = vcombine.high %v1314_v31, %v1356_v46  ;;  %v6477_v5 = vcombine.low %v1314_v31, %v1356_v46 }
 0x128   : > { %v1394_v61 = vsel %vm335_vm0, %v1389_v57, %v1390_v17  ;;  %v1397_v47 = vsel %vm335_vm0, %v1390_v17, %v1391_v56  ;;  %2166 = vmatprep.subr.bf16.mxu1 %v6478_v8 }
 0x129   : > { %v1398_v49 = vsel %vm1395_vm13, %v1382_v43, %v1397_v47  ;;  %v329_v12 = vpop.permute.xlu1 %328  ;;  %2167 = vmatpush1.bf16.msra.mxu1 %v6477_v5  ;;  %v327_v35 = vpop.permute.xlu0 %326  ;;  %v1396_v54 = vsel %vm1395_vm13, %v1380_v26, %v1394_v61  ;;  %v7400_v26 = vcombine.low %v7066_v1, %v7066_v1 }
 0x12a   : > { %v6486_v19 = vcombine.high %v1398_v49, %v1398_v49  ;;  %v334_v50 = vrot.slane %v329_v12, 4  ;;  %v333_v3 = vrot.slane %v327_v35, 4  ;;  %v6484_v22 = vcombine.high %v1396_v54, %v1396_v54 }
 0x12b   : > { %v6483_v44 = vcombine.low %v1396_v54, %v1396_v54  ;;  %v6485_v31 = vcombine.low %v1398_v49, %v1398_v49 }
 0x12c   : > { %6491 = vmatprep.subr.msk.bf16.mxu0 %vm335_vm0, %v6484_v22  ;;  %6493 = vmatprep.subr.msk.bf16.mxu1 %vm335_vm0, %v6486_v19  ;;  %v343_v57 = vsel %vm335_vm0, %v333_v3, %v334_v50  ;;  %v341_v22 = vsel %vm335_vm0, %v332_v10, %v333_v3 }
 0x12d   : > { %v372_v46 = vpop.permute.xlu1 %371  ;;  %v2078_v43 = vsel %vm335_vm0, %v6483_v44, 0  ;;  %v2084_v17 = vsel %vm335_vm0, %v6485_v31, 0  ;;  %v370_v8 = vpop.permute.xlu0 %369  ;;  %v344_v47 = vsel %vm337_vm1, %v327_v35, %v343_v57  ;;  %v342_v19 = vsel %vm337_vm1, %v6989_v6, %v341_v22 }
 0x12e   : > { %v377_v5 = vrot.slane %v372_v46, 4  ;;  %2128 = vmatpush1.bf16.msra.mxu0 %v2078_v43  ;;  %2169 = vmatpush1.bf16.msra.mxu1 %v2084_v17  ;;  %v376_v61 = vrot.slane %v370_v8, 4 }
 0x130   : > { %v385_v49 = vsel %vm335_vm0, %v376_v61, %v377_v5  ;;  %v383_v44 = vsel %vm335_vm0, %v375_v16, %v376_v61 }
 0x131   : > { %v386_v12 = vsel %vm379_vm2, %v370_v8, %v385_v49  ;;  %2134 = vmatmul.mubr.bf16.vlgmr.msra.gmra.mrb[0].mxu0 %v7400_v26  ;;  %2175 = vmatmul.mubr.bf16.vlgmr.msra.gmra.mrb[0].mxu1 %v7400_v26  ;;  %v414_v1 = vpop.permute.xlu1 %413  ;;  %v412_v54 = vpop.permute.xlu0 %411  ;;  %v384_v10 = vsel %vm379_vm2, %v7000_v14, %v383_v44 }
 0x132   : > { %v6385_v3 = vcombine.low %v344_v47, %v386_v12  ;;  %v419_v35 = vrot.slane %v414_v1, 4  ;;  %v418_v50 = vrot.slane %v412_v54, 4  ;;  %v6383_v31 = vcombine.low %v342_v19, %v384_v10  ;;  %6496 = vmatprep.mubr.msk.bf16.mxu0 %vm2072_vm7, %v7074_v9  ;;  %6498 = vmatprep.mubr.msk.bf16.mxu1 %vm2072_vm7, %v7074_v9 }
 0x133   : > { %v6384_v16 = vcombine.high %v342_v19, %v384_v10  ;;  %v6386_v57 = vcombine.high %v344_v47, %v386_v12 }
 0x134   : > { %v427_v6 = vsel %vm335_vm0, %v418_v50, %v419_v35  ;;  %v425_v8 = vsel %vm335_vm0, %v417_v36, %v418_v50 }
 0x135   : > { %2183 = vmatprep.subr.bf16.mxu0 %v6384_v16  ;;  %2224 = vmatprep.subr.bf16.mxu1 %v6386_v57  ;;  %v456_v46 = vpop.permute.xlu1 %455  ;;  %v454_v43 = vpop.permute.xlu0 %453  ;;  %v428_v61 = vsel %vm421_vm3, %v412_v54, %v427_v6  ;;  %v426_v44 = vsel %vm421_vm3, %v7023_v33, %v425_v8 }
 0x136   : > { %v461_v17 = vrot.slane %v456_v46, 4  ;;  %2184 = vmatpush1.bf16.msra.mxu0 %v6383_v31  ;;  %2225 = vmatpush1.bf16.msra.mxu1 %v6385_v3  ;;  %v460_v14 = vrot.slane %v454_v43, 4 }
 0x138   : > { %v469_v5 = vsel %vm335_vm0, %v460_v14, %v461_v17  ;;  %v467_v9 = vsel %vm335_vm0, %v459_v41, %v460_v14 }
 0x139   : > { %v470_v22 = vsel %vm463_vm4, %v454_v43, %v469_v5  ;;  %v498_v47 = vpop.permute.xlu1 %497  ;;  %v496_v49 = vpop.permute.xlu0 %495  ;;  %v468_v12 = vsel %vm463_vm4, %v7030_v38, %v467_v9 }
 0x13a   : > { %v6393_v1 = vcombine.low %v428_v61, %v470_v22  ;;  %v503_v36 = vrot.slane %v498_v47, 4  ;;  %v502_v19 = vrot.slane %v496_v49, 4  ;;  %v6391_v10 = vcombine.low %v426_v44, %v468_v12 }
 0x13b   : > { %v6392_v3 = vcombine.high %v426_v44, %v468_v12  ;;  %v6394_v35 = vcombine.high %v428_v61, %v470_v22 }
 0x13c   : > { %v511_v50 = vsel %vm335_vm0, %v502_v19, %v503_v36  ;;  %v509_v33 = vsel %vm335_vm0, %v501_v60, %v502_v19 }
 0x13d   : > { %2185 = vmatprep.subr.bf16.mxu0 %v6392_v3  ;;  %2226 = vmatprep.subr.bf16.mxu1 %v6394_v35  ;;  %v540_v41 = vpop.permute.xlu1 %539  ;;  %v538_v54 = vpop.permute.xlu0 %537  ;;  %v512_v46 = vsel %vm505_vm5, %v496_v49, %v511_v50  ;;  %v510_v14 = vsel %vm505_vm5, %v7053_v59, %v509_v33 }
 0x13e   : > { %v545_v31 = vrot.slane %v540_v41, 4  ;;  %2186 = vmatpush1.bf16.msra.mxu0 %v6391_v10  ;;  %2227 = vmatpush1.bf16.msra.mxu1 %v6393_v1  ;;  %v544_v16 = vrot.slane %v538_v54, 4 }
 0x140   : > { %v553_v38 = vsel %vm335_vm0, %v544_v16, %v545_v31  ;;  %v551_v57 = vsel %vm335_vm0, %v543_v2, %v544_v16 }
 0x141   : > { %v554_v43 = vsel %vm547_vm6, %v538_v54, %v553_v38  ;;  %v582_v6 = vpop.permute.xlu1 %581  ;;  %v580_v17 = vpop.permute.xlu0 %579  ;;  %v552_v8 = vsel %vm547_vm6, %v7061_v63, %v551_v57 }
 0x142   : > { %v6401_v5 = vcombine.low %v512_v46, %v554_v43  ;;  %v587_v60 = vrot.slane %v582_v6, 4  ;;  %v586_v9 = vrot.slane %v580_v17, 4  ;;  %v6399_v61 = vcombine.low %v510_v14, %v552_v8 }
 0x143   : > { %v6400_v22 = vcombine.high %v510_v14, %v552_v8  ;;  %v6402_v47 = vcombine.high %v512_v46, %v554_v43 }
 0x144   : > { %v595_v44 = vsel %vm335_vm0, %v586_v9, %v587_v60  ;;  %v593_v59 = vsel %vm335_vm0, %v585_v4, %v586_v9 }
 0x145   : > { %2187 = vmatprep.subr.bf16.mxu0 %v6400_v22  ;;  %2228 = vmatprep.subr.bf16.mxu1 %v6402_v47  ;;  %v624_v2 = vpop.permute.xlu1 %623  ;;  %v622_v49 = vpop.permute.xlu0 %621  ;;  %v596_v19 = vsel %vm9500_vm8, %v580_v17, %v595_v44  ;;  %v594_v41 = vsel %vm9500_vm8, %v7100_v28, %v593_v59 }
 0x146   : > { %v629_v12 = vrot.slane %v624_v2, 4  ;;  %2188 = vmatpush1.bf16.msra.mxu0 %v6399_v61  ;;  %2229 = vmatpush1.bf16.msra.mxu1 %v6401_v5  ;;  %v628_v1 = vrot.slane %v622_v49, 4 }
 0x148   : > { %v637_v63 = vsel %vm335_vm0, %v628_v1, %v629_v12  ;;  %v635_v36 = vsel %vm335_vm0, %v627_v39, %v628_v1 }
 0x149   : > { %v638_v10 = vsel %vm9438_vm9, %v622_v49, %v637_v63  ;;  %v666_v3 = vpop.permute.xlu1 %665  ;;  %v664_v35 = vpop.permute.xlu0 %663  ;;  %v636_v54 = vsel %vm9438_vm9, %v7107_v34, %v635_v36 }
 0x14a   : > { %v6409_v50 = vcombine.low %v596_v19, %v638_v10  ;;  %v671_v4 = vrot.slane %v666_v3, 4  ;;  %v670_v31 = vrot.slane %v664_v35, 4  ;;  %v6407_v16 = vcombine.low %v594_v41, %v636_v54 }
 0x14b   : > { %v6408_v33 = vcombine.high %v594_v41, %v636_v54  ;;  %v6410_v38 = vcombine.high %v596_v19, %v638_v10 }
 0x14c   : > { %v679_v46 = vsel %vm335_vm0, %v670_v31, %v671_v4  ;;  %v677_v28 = vsel %vm335_vm0, %v669_v0, %v670_v31 }
 0x14d   : > { %2189 = vmatprep.subr.bf16.mxu0 %v6408_v33  ;;  %2230 = vmatprep.subr.bf16.mxu1 %v6410_v38  ;;  %v708_v39 = vpop.permute.xlu1 %707  ;;  %v706_v57 = vpop.permute.xlu0 %705  ;;  %v680_v14 = vsel %vm9436_vm10, %v664_v35, %v679_v46  ;;  %v678_v9 = vsel %vm9436_vm10, %v7130_v58, %v677_v28  ;;  %v859_v38 = vld [vmem:[%s6898_s10 + $0x14] sm:$0xff]  ;;  %s9565_s10 = smov 89  }
 0x14e   : > { %v713_v43 = vrot.slane %v708_v39, 4  ;;  %2190 = vmatpush1.bf16.msra.mxu0 %v6407_v16  ;;  %2231 = vmatpush1.bf16.msra.mxu1 %v6409_v50  ;;  %v712_v6 = vrot.slane %v706_v57, 4 }
 0x150   : > { %v721_v34 = vsel %vm335_vm0, %v712_v6, %v713_v43  ;;  %v719_v17 = vsel %vm335_vm0, %v711_v15, %v712_v6 }
 0x151   : > { %v722_v8 = vsel %vm9435_vm11, %v706_v57, %v721_v34  ;;  %v750_v5 = vpop.permute.xlu1 %749  ;;  %v748_v60 = vpop.permute.xlu0 %747  ;;  %v720_v61 = vsel %vm9435_vm11, %v7137_v11, %v719_v17  ;;  %vm9529_vm11 = vcmask 72704  }
 0x152   : > { %v6417_v22 = vcombine.low %v680_v14, %v722_v8  ;;  %v755_v0 = vrot.slane %v750_v5, 4  ;;  %v754_v47 = vrot.slane %v748_v60, 4  ;;  %v6415_v2 = vcombine.low %v678_v9, %v720_v61  ;;  %vm9530_vm10 = vmmov %vm9529_vm11 }
 0x153   : > { %v6416_v49 = vcombine.high %v678_v9, %v720_v61  ;;  %v6418_v44 = vcombine.high %v680_v14, %v722_v8 }
 0x154   : > { %v763_v1 = vsel %vm335_vm0, %v754_v47, %v755_v0  ;;  %v761_v58 = vsel %vm335_vm0, %v753_v45, %v754_v47 }
 0x155   : > { %2191 = vmatprep.subr.bf16.mxu0 %v6416_v49  ;;  %2232 = vmatprep.subr.bf16.mxu1 %v6418_v44  ;;  %v792_v15 = vpop.permute.xlu1 %791  ;;  %v790_v12 = vpop.permute.xlu0 %789  ;;  %v764_v19 = vsel %vm9437_vm12, %v748_v60, %v763_v1  ;;  %v762_v41 = vsel %vm9437_vm12, %v7160_v42, %v761_v58 }
 0x156   : > { %v797_v59 = vrot.slane %v792_v15, 4  ;;  %2192 = vmatpush1.bf16.msra.mxu0 %v6415_v2  ;;  %2233 = vmatpush1.bf16.msra.mxu1 %v6417_v22  ;;  %v796_v63 = vrot.slane %v790_v12, 4 }
 0x158   : > { %v805_v11 = vsel %vm335_vm0, %v796_v63, %v797_v59  ;;  %v803_v36 = vsel %vm335_vm0, %v795_v51, %v796_v63 }
 0x159   : > { %v806_v10 = vsel %vm9529_vm11, %v790_v12, %v805_v11  ;;  %v834_v3 = vpop.permute.xlu1 %833  ;;  %v832_v35 = vpop.permute.xlu0 %831  ;;  %v804_v54 = vsel %vm9530_vm10, %v7167_v48, %v803_v36  ;;  %vm9531_vm11 = vcmask 7168  }
 0x15a   : > { %v6425_v50 = vcombine.low %v764_v19, %v806_v10  ;;  %v839_v45 = vrot.slane %v834_v3, 4  ;;  %v838_v4 = vrot.slane %v832_v35, 4  ;;  %v6423_v31 = vcombine.low %v762_v41, %v804_v54  ;;  %vm9532_vm10 = vmmov %vm9531_vm11 }
 0x15b   : > { %v6424_v16 = vcombine.high %v762_v41, %v804_v54  ;;  %v6426_v33 = vcombine.high %v764_v19, %v806_v10  ;;  %v9538_v3 = vrot.slane %v7254_v55, 4 }
 0x15c   : > { %v847_v51 = vsel %vm335_vm0, %v838_v4, %v839_v45  ;;  %v845_v39 = vsel %vm335_vm0, %v837_v29, %v838_v4 }
 0x15d   : > { %v848_v57 = vsel %vm9531_vm11, %v832_v35, %v847_v51  ;;  %2193 = vmatprep.subr.bf16.mxu0 %v6424_v16  ;;  %2234 = vmatprep.subr.bf16.mxu1 %v6426_v33  ;;  %v884_v42 = vpop.permute.xlu1 %883  ;;  %v882_v46 = vpop.permute.xlu0 %881  ;;  %v846_v48 = vsel %vm9532_vm10, %v7192_v27, %v845_v39  ;;  %vm9533_vm11 = vcmask 1039360   ;;  %vm9534_vm10 = vcmask 973824  }
 0x15e   : > { %v6433_v43 = vcombine.low %v848_v57, %v7233_v20  ;;  %v889_v6 = vrot.slane %v884_v42, 4  ;;  %2194 = vmatpush1.bf16.msra.mxu0 %v6423_v31  ;;  %2235 = vmatpush1.bf16.msra.mxu1 %v6425_v50  ;;  %v888_v28 = vrot.slane %v882_v46, 4  ;;  %v6431_v34 = vcombine.low %v846_v48, %v859_v38  ;;  %vm9535_vm12 = vmmov %vm9533_vm11 }
 0x15f   : > { %v6432_v17 = vcombine.high %v846_v48, %v859_v38  ;;  %v6434_v14 = vcombine.high %v848_v57, %v7233_v20  ;;  %vm9536_vm9 = vmmov %vm9534_vm10 }
 0x160   : > { %v897_v5 = vsel %vm335_vm0, %v888_v28, %v889_v6  ;;  %v895_v9 = vsel %vm335_vm0, %v887_v53, %v888_v28 }
 0x161   : > { %2195 = vmatprep.subr.bf16.mxu0 %v6432_v17  ;;  %2236 = vmatprep.subr.bf16.mxu1 %v6434_v14  ;;  %v926_v29 = vpop.permute.xlu1 %925  ;;  %v924_v8 = vpop.permute.xlu0 %923  ;;  %v898_v22 = vsel %vm9533_vm11, %v882_v46, %v897_v5  ;;  %v896_v49 = vsel %vm9535_vm12, %v7204_v37, %v895_v9  ;;  %v9537_v37 = vrot.slane %v7239_v23, 4  ;;  %vm9540_vm12 = vcmask 957440  }
 0x162   : > { %v931_v60 = vrot.slane %v926_v29, 4  ;;  %2196 = vmatpush1.bf16.msra.mxu0 %v6431_v34  ;;  %2237 = vmatpush1.bf16.msra.mxu1 %v6433_v43  ;;  %v930_v27 = vrot.slane %v924_v8, 4  ;;  %v9544_v34 = vrot.slane %v7284_v52, 4 }
 0x164   : > { %v939_v61 = vsel %vm335_vm0, %v930_v27, %v931_v60  ;;  %v937_v20 = vsel %vm335_vm0, %v929_v13, %v930_v27 }
 0x165   : > { %v940_v0 = vsel %vm9534_vm10, %v924_v8, %v939_v61  ;;  %v968_v47 = vpop.permute.xlu1 %967  ;;  %v966_v2 = vpop.permute.xlu0 %965  ;;  %v938_v44 = vsel %vm9536_vm9, %v7221_v7, %v937_v20  ;;  %vm9539_vm9 = vcmask 965632   ;;  %vm9542_vm10 = vmmov %vm9540_vm12 }
 0x166   : > { %v6441_v15 = vcombine.low %v898_v22, %v940_v0  ;;  %v973_v53 = vrot.slane %v968_v47, 4  ;;  %v972_v12 = vrot.slane %v966_v2, 4  ;;  %v6439_v1 = vcombine.low %v896_v49, %v938_v44  ;;  %vm9541_vm11 = vmmov %vm9539_vm9 }
 0x167   : > { %v6440_v59 = vcombine.high %v896_v49, %v938_v44  ;;  %v6442_v63 = vcombine.high %v898_v22, %v940_v0 }
 0x168   : > { %v981_v11 = vsel %vm335_vm0, %v972_v12, %v973_v53  ;;  %v979_v7 = vsel %vm335_vm0, %v9537_v37, %v972_v12 }
 0x169   : > { %2197 = vmatprep.subr.bf16.mxu0 %v6440_v59  ;;  %2238 = vmatprep.subr.bf16.mxu1 %v6442_v63  ;;  %v1010_v13 = vpop.permute.xlu1 %1009  ;;  %v1008_v58 = vpop.permute.xlu0 %1007  ;;  %v982_v41 = vsel %vm9539_vm9, %v966_v2, %v981_v11  ;;  %v980_v4 = vsel %vm9541_vm11, %v7239_v23, %v979_v7  ;;  %v9543_v23 = vrot.slane %v7269_v18, 4  ;;  %vm9545_vm9 = vcmask 318464  }
 0x16a   : > { %v1015_v36 = vrot.slane %v1010_v13, 4  ;;  %2198 = vmatpush1.bf16.msra.mxu0 %v6439_v1  ;;  %2239 = vmatpush1.bf16.msra.mxu1 %v6441_v15  ;;  %v1014_v19 = vrot.slane %v1008_v58, 4  ;;  %vm9547_vm11 = vmmov %vm9545_vm9  ;;  %v9550_v1 = vrot.slane %v7314_v62, 4 }
 0x16c   : > { %v1023_v10 = vsel %vm335_vm0, %v1014_v19, %v1015_v36  ;;  %v1021_v35 = vsel %vm335_vm0, %v9538_v3, %v1014_v19 }
 0x16d   : > { %v1024_v54 = vsel %vm9540_vm12, %v1008_v58, %v1023_v10  ;;  %v1052_v50 = vpop.permute.xlu1 %1051  ;;  %v1050_v45 = vpop.permute.xlu0 %1049  ;;  %v1022_v31 = vsel %vm9542_vm10, %v7254_v55, %v1021_v35  ;;  %vm9546_vm12 = vcmask 310272  }
 0x16e   : > { %v6449_v16 = vcombine.low %v982_v41, %v1024_v54  ;;  %v1057_v33 = vrot.slane %v1052_v50, 4  ;;  %v1056_v38 = vrot.slane %v1050_v45, 4  ;;  %v6447_v51 = vcombine.low %v980_v4, %v1022_v31  ;;  %vm9548_vm10 = vmmov %vm9546_vm12 }
 0x16f   : > { %v6448_v39 = vcombine.high %v980_v4, %v1022_v31  ;;  %v6450_v57 = vcombine.high %v982_v41, %v1024_v54 }
 0x170   : > { %v1065_v48 = vsel %vm335_vm0, %v1056_v38, %v1057_v33  ;;  %v1063_v55 = vsel %vm335_vm0, %v9543_v23, %v1056_v38  ;;  %v9556_v33 = vrot.slane %v7344_v25, 4 }
 0x171   : > { %2199 = vmatprep.subr.bf16.mxu0 %v6448_v39  ;;  %2240 = vmatprep.subr.bf16.mxu1 %v6450_v57  ;;  %v1094_v42 = vpop.permute.xlu1 %1093  ;;  %v1092_v46 = vpop.permute.xlu0 %1091  ;;  %v1066_v14 = vsel %vm9545_vm9, %v1050_v45, %v1065_v48  ;;  %v1064_v60 = vsel %vm9547_vm11, %v7269_v18, %v1063_v55  ;;  %v9549_v18 = vrot.slane %v7299_v21, 4  ;;  %vm9551_vm9 = vcmask 302080  }
 0x172   : > { %v1099_v43 = vrot.slane %v1094_v42, 4  ;;  %2200 = vmatpush1.bf16.msra.mxu0 %v6447_v51  ;;  %2241 = vmatpush1.bf16.msra.mxu1 %v6449_v16  ;;  %v1098_v6 = vrot.slane %v1092_v46, 4  ;;  %vm9553_vm11 = vmmov %vm9551_vm9 }
 0x174   : > { %v1107_v28 = vsel %vm335_vm0, %v1098_v6, %v1099_v43  ;;  %v1105_v17 = vsel %vm335_vm0, %v9544_v34, %v1098_v6 }
 0x175   : > { %v1108_v29 = vsel %vm9546_vm12, %v1092_v46, %v1107_v28  ;;  %v1136_v8 = vpop.permute.xlu1 %1135  ;;  %v1134_v5 = vpop.permute.xlu0 %1133  ;;  %v1106_v27 = vsel %vm9548_vm10, %v7284_v52, %v1105_v17  ;;  %vm9552_vm12 = vcmask 236544  }
 0x176   : > { %v6457_v9 = vcombine.low %v1066_v14, %v1108_v29  ;;  %v1141_v61 = vrot.slane %v1136_v8, 4  ;;  %v1140_v20 = vrot.slane %v1134_v5, 4  ;;  %v6455_v22 = vcombine.low %v1064_v60, %v1106_v27  ;;  %vm9554_vm10 = vmmov %vm9552_vm12 }
 0x177   : > { %v6456_v0 = vcombine.high %v1064_v60, %v1106_v27  ;;  %v6458_v47 = vcombine.high %v1066_v14, %v1108_v29  ;;  %v9562_v27 = vrot.slane %v7372_v32, 4 }
 0x178   : > { %v1149_v44 = vsel %vm335_vm0, %v1140_v20, %v1141_v61  ;;  %v1147_v52 = vsel %vm335_vm0, %v9549_v18, %v1140_v20 }
 0x179   : > { %2201 = vmatprep.subr.bf16.mxu0 %v6456_v0  ;;  %2242 = vmatprep.subr.bf16.mxu1 %v6458_v47  ;;  %v1178_v2 = vpop.permute.xlu1 %1177  ;;  %v1176_v49 = vpop.permute.xlu0 %1175  ;;  %v1150_v63 = vsel %vm9551_vm9, %v1134_v5, %v1149_v44  ;;  %v1148_v36 = vsel %vm9553_vm11, %v7299_v21, %v1147_v52  ;;  %v9555_v21 = vrot.slane %v7329_v40, 4  ;;  %vm9557_vm9 = vcmask 228352  }
 0x17a   : > { %v1183_v15 = vrot.slane %v1178_v2, 4  ;;  %2202 = vmatpush1.bf16.msra.mxu0 %v6455_v22  ;;  %2243 = vmatpush1.bf16.msra.mxu1 %v6457_v9  ;;  %v1182_v53 = vrot.slane %v1176_v49, 4  ;;  %vm9559_vm11 = vmmov %vm9557_vm9 }
 0x17c   : > { %v1191_v12 = vsel %vm335_vm0, %v1182_v53, %v1183_v15  ;;  %v1189_v59 = vsel %vm335_vm0, %v9550_v1, %v1182_v53 }
 0x17d   : > { %v1192_v13 = vsel %vm9552_vm12, %v1176_v49, %v1191_v12  ;;  %v1220_v58 = vpop.permute.xlu1 %1219  ;;  %v1218_v11 = vpop.permute.xlu0 %1217  ;;  %v1190_v19 = vsel %vm9554_vm10, %v7314_v62, %v1189_v59  ;;  %vm9558_vm12 = vcmask 220160  }
 0x17e   : > { %v6465_v37 = vcombine.low %v1150_v63, %v1192_v13  ;;  %v1225_v7 = vrot.slane %v1220_v58, 4  ;;  %v1224_v10 = vrot.slane %v1218_v11, 4  ;;  %v6463_v3 = vcombine.low %v1148_v36, %v1190_v19  ;;  %vm9560_vm10 = vmmov %vm9558_vm12 }
 0x17f   : > { %v6464_v35 = vcombine.high %v1148_v36, %v1190_v19  ;;  %v6466_v41 = vcombine.high %v1150_v63, %v1192_v13 }
 0x180   : > { %v1233_v45 = vsel %vm335_vm0, %v1224_v10, %v1225_v7  ;;  %v1231_v62 = vsel %vm335_vm0, %v9555_v21, %v1224_v10  ;;  %v7607_v10 = vld [vmem:[%s9563_s1] sm:$0xff]  ;;  %s9577_s1 = smov 109  }
 0x181   : > { %2203 = vmatprep.subr.bf16.mxu0 %v6464_v35  ;;  %2244 = vmatprep.subr.bf16.mxu1 %v6466_v41  ;;  %v1262_v54 = vpop.permute.xlu1 %1261  ;;  %v1260_v50 = vpop.permute.xlu0 %1259  ;;  %v1234_v51 = vsel %vm9557_vm9, %v1218_v11, %v1233_v45  ;;  %v1232_v46 = vsel %vm9559_vm11, %v7329_v40, %v1231_v62  ;;  %v9561_v40 = vrot.slane %v7359_v30, 4  ;;  %vm9582_vm9 = vcmask 736256  }
 0x182   : > { %v1267_v4 = vrot.slane %v1262_v54, 4  ;;  %2204 = vmatpush1.bf16.msra.mxu0 %v6463_v3  ;;  %2245 = vmatpush1.bf16.msra.mxu1 %v6465_v37  ;;  %v1266_v31 = vrot.slane %v1260_v50, 4  ;;  %vm9584_vm11 = vcmask 89088  }
 0x184   : > { %v1275_v16 = vsel %vm335_vm0, %v1266_v31, %v1267_v4  ;;  %v1273_v38 = vsel %vm335_vm0, %v9556_v33, %v1266_v31 }
 0x185   : > { %v1276_v39 = vsel %vm9558_vm12, %v1260_v50, %v1275_v16  ;;  %v1304_v57 = vpop.permute.xlu1 %1303  ;;  %v1302_v42 = vpop.permute.xlu0 %1301  ;;  %v1274_v48 = vsel %vm9560_vm10, %v7344_v25, %v1273_v38  ;;  %vm9583_vm12 = vcmask 728064   ;;  %vm9585_vm10 = vcmask 80896  }
 0x186   : > { %v6473_v43 = vcombine.low %v1234_v51, %v1276_v39  ;;  %v1309_v6 = vrot.slane %v1304_v57, 4  ;;  %v1308_v23 = vrot.slane %v1302_v42, 4  ;;  %v6471_v55 = vcombine.low %v1232_v46, %v1274_v48 }
 0x187   : > { %v6472_v28 = vcombine.high %v1232_v46, %v1274_v48  ;;  %v6474_v34 = vcombine.high %v1234_v51, %v1276_v39 }
 0x188   : > { %v1317_v29 = vsel %vm335_vm0, %v1308_v23, %v1309_v6  ;;  %v1315_v25 = vsel %vm335_vm0, %v9561_v40, %v1308_v23 }
 0x189   : > { %2205 = vmatprep.subr.bf16.mxu0 %v6472_v28  ;;  %2246 = vmatprep.subr.bf16.mxu1 %v6474_v34  ;;  %v1346_v17 = vpop.permute.xlu1 %1345  ;;  %v1344_v14 = vpop.permute.xlu0 %1343  ;;  %v1318_v61 = vsel %vm1311_vm15, %v1302_v42, %v1317_v29  ;;  %v1316_v47 = vsel %vm1311_vm15, %v7359_v30, %v1315_v25 }
 0x18a   : > { %v1351_v8 = vrot.slane %v1346_v17, 4  ;;  %2206 = vmatpush1.bf16.msra.mxu0 %v6471_v55  ;;  %2247 = vmatpush1.bf16.msra.mxu1 %v6473_v43  ;;  %v1350_v5 = vrot.slane %v1344_v14, 4 }
 0x18c   : > { %v1359_v60 = vsel %vm335_vm0, %v1350_v5, %v1351_v8  ;;  %v1357_v9 = vsel %vm335_vm0, %v9562_v27, %v1350_v5 }
 0x18d   : > { %v1360_v20 = vsel %vm1353_vm14, %v1344_v14, %v1359_v60  ;;  %v1388_v22 = vpop.permute.xlu1 %1387  ;;  %v1386_v0 = vpop.permute.xlu0 %1385  ;;  %v1358_v2 = vsel %vm1353_vm14, %v7372_v32, %v1357_v9 }
 0x18e   : > { %v6481_v49 = vcombine.low %v1318_v61, %v1360_v20  ;;  %v1393_v44 = vrot.slane %v1388_v22, 4  ;;  %v1392_v15 = vrot.slane %v1386_v0, 4  ;;  %v6479_v53 = vcombine.low %v1316_v47, %v1358_v2 }
 0x18f   : > { %v6480_v18 = vcombine.high %v1316_v47, %v1358_v2  ;;  %v6482_v52 = vcombine.high %v1318_v61, %v1360_v20 }
 0x190   : > { %v1399_v12 = vsel %vm335_vm0, %v1391_v56, %v1392_v15  ;;  %v1401_v1 = vsel %vm335_vm0, %v1392_v15, %v1393_v44 }
 0x191   : > { %v1402_v59 = vsel %vm1395_vm13, %v1386_v0, %v1401_v1  ;;  %2207 = vmatprep.subr.bf16.mxu0 %v6480_v18  ;;  %2248 = vmatprep.subr.bf16.mxu1 %v6482_v52  ;;  %v1400_v30 = vsel %vm1395_vm13, %v7383_v24, %v1399_v12  ;;  %v2274_v24 = vlaneseq }
 0x192   : > { %v6489_v32 = vcombine.low %v1402_v59, %v1402_v59  ;;  %v6490_v63 = vcombine.high %v1402_v59, %v1402_v59  ;;  %2208 = vmatpush1.bf16.msra.mxu0 %v6479_v53  ;;  %2249 = vmatpush1.bf16.msra.mxu1 %v6481_v49  ;;  %v6488_v13 = vcombine.high %v1400_v30, %v1400_v30 }
 0x193   : > { %v6487_v58 = vcombine.low %v1400_v30, %v1400_v30  ;;  %v7598_v36 = vshrl.u32 %v2274_v24, 7 }
 0x194   : > { %6495 = vmatprep.subr.msk.bf16.mxu0 %vm335_vm0, %v6488_v13  ;;  %6497 = vmatprep.subr.msk.bf16.mxu1 %vm335_vm0, %v6490_v63  ;;  %v2096_v56 = vsel %vm335_vm0, %v6489_v32, 0 }
 0x195   : > { %v2090_v11 = vsel %vm335_vm0, %v6487_v58, 0  ;;  %v2276_v19 = vsub.s32 0, %v7598_v36  ;;  %v2284_v37 = vsub.s32 2, %v7598_v36  ;;  %v2280_v3 = vsub.s32 1, %v7598_v36 }
 0x196   : > { %2210 = vmatpush1.bf16.msra.mxu0 %v2090_v11  ;;  %2251 = vmatpush1.bf16.msra.mxu1 %v2096_v56  ;;  %v2288_v35 = vsub.s32 3, %v7598_v36  ;;  %v2292_v5 = vsub.s32 4, %v7598_v36  ;;  %v2300_v40 = vsub.s32 6, %v7598_v36  ;;  %v2296_v25 = vsub.s32 5, %v7598_v36 }
 0x197   : > { %v7613_v45 = vrot.slane %v7607_v10, %v2276_v19  ;;  %v7617_v21 = vrot.slane %v7607_v10, %v2284_v37  ;;  %v7621_v16 = vrot.slane %v7607_v10, %v2280_v3  ;;  %v2304_v60 = vsub.s32 7, %v7598_v36  ;;  %v7744_v19 = vld [vmem:[%s9573_s4] sm:$0xff]  ;;  %s9580_s4 = smov 99  }
 0x198   : > { %v7625_v38 = vrot.slane %v7607_v10, %v2288_v35  ;;  %v7704_v9 = vrot.slane %v7607_v10, %v2292_v5  ;;  %v7709_v0 = vrot.slane %v7607_v10, %v2300_v40  ;;  %v7712_v2 = vrot.slane %v7607_v10, %v2296_v25 }
 0x199   : > { %2216 = vmatmul.mubr.bf16.vlgmr.msra.gmra.mrb[4].mxu0 %v7400_v26  ;;  %2257 = vmatmul.mubr.bf16.vlgmr.msra.gmra.mrb[4].mxu1 %v7400_v26  ;;  %v7717_v53 = vrot.slane %v7607_v10, %v2304_v60  ;;  %v7750_v37 = vcombine.high %v7744_v19, %v7744_v19 }
 0x19b   : > { %6618 = vmatprep.mubr.msk.bf16.mxu0 %vm2072_vm7, %v7750_v37  ;;  %6620 = vmatprep.mubr.msk.bf16.mxu1 %vm2072_vm7, %v7750_v37 }
 0x19e   : > { %v7602_v7 = vpop.permute.xlu0 %1523 }
 0x204   : > { %v2135_v41 = vpop.f32.mrb[0].mxu0  ;;  %v2176_v26 = vpop.f32.mrb[0].mxu1 }
 0x205   : > { %v2136_v54 = vadd.f32 %v2135_v41, %v7602_v7  ;;  %v2137_v50 = vpop.f32.mrb[1].mxu0  ;;  %v2177_v4 = vadd.f32 %v2176_v26, %v7602_v7  ;;  %v2178_v31 = vpop.f32.mrb[1].mxu1 }
 0x206   : > { %v2138_v62 = vadd.f32 %v2137_v50, %v7602_v7  ;;  %v2179_v33 = vadd.f32 %v2178_v31, %v7602_v7  ;;  %v2139_v51 = vpop.f32.mrb[2].mxu0  ;;  %v2180_v39 = vpop.f32.mrb[2].mxu1 }
 0x207   : > { %v2265_v57 = vmax.f32 %v2136_v54, 0.0  ;;  %v2267_v42 = vmax.f32 %v2177_v4, 0.0  ;;  %v2140_v46 = vpop.f32.mrb[3].mxu0  ;;  %v2181_v48 = vpop.f32.mrb[3].mxu1 }
 0x208   : > { %v2266_v43 = vmax.f32 %v2138_v62, 0.0  ;;  %v2268_v6 = vmax.f32 %v2179_v33, 0.0 }
 0x209   : > { %v2314_v23 = vmul.f32 %v7613_v45, %v2265_v57  ;;  %v2316_v55 = vmul.f32 %v7617_v21, %v2267_v42 }
 0x20a   : > { %v2315_v28 = vmul.f32 %v7621_v16, %v2266_v43  ;;  %v2317_v34 = vmul.f32 %v7625_v38, %v2268_v6 }
 0x20c   : > { %v7631_v17 = vpack.c.bf16 %v2315_v28, %v2314_v23  ;;  %v7633_v14 = vpack.c.bf16 %v2317_v34, %v2316_v55 }
 0x20e   : > { %2354 = vst [vmem:[#allocation2 + $0x4] sm:$0xff] %v7631_v17  ;;  %2355 = vst [vmem:[#allocation2 + $0xc] sm:$0xff] %v7633_v14 }
 0x215   : > { %v2399_v29 = vld [vmem:[#allocation2] sm:$0xff]  ;;  %v2359_v8 = vld [vmem:[#allocation2 + $0x8] sm:$0xff] }
 0x216   : > { %2409 = vrot.lane.b32.xlu0 %v2399_v29, %s9449_s12  ;;  %2368 = vrot.lane.b32.xlu1 %v2399_v29, %s9451_s11 }
 0x21a   : > { %2450 = vrot.lane.b32.xlu0 %v2399_v29, %s9439_s13  ;;  %2370 = vrot.lane.b32.xlu1 %v2359_v8, %s9451_s11  ;;  %s9576_s11 = smov 110  }
 0x21e   : > { %2491 = vrot.lane.b32.xlu0 %v2399_v29, %s9441_s14  ;;  %2411 = vrot.lane.b32.xlu1 %v2359_v8, %s9449_s12  ;;  %s9572_s12 = smov 18  }
 0x222   : > { %2532 = vrot.lane.b32.xlu0 %v2399_v29, %s9443_s15  ;;  %2452 = vrot.lane.b32.xlu1 %v2359_v8, %s9439_s13  ;;  %s9567_s13 = smov 10  }
 0x226   : > { %2573 = vrot.lane.b32.xlu0 %v2399_v29, %s9445_s16  ;;  %2493 = vrot.lane.b32.xlu1 %v2359_v8, %s9441_s14  ;;  %s9568_s14 = smov 9  }
 0x22a   : > { %2614 = vrot.lane.b32.xlu0 %v2399_v29, %s9447_s17  ;;  %2534 = vrot.lane.b32.xlu1 %v2359_v8, %s9443_s15  ;;  %s9569_s15 = smov 1  }
 0x22e   : > { %2655 = vrot.lane.b32.xlu0 %v2399_v29, %s9564_s30  ;;  %2575 = vrot.lane.b32.xlu1 %v2359_v8, %s9445_s16  ;;  %s9570_s16 = smov 127  }
 0x232   : > { %2696 = vrot.lane.b32.xlu0 %v2399_v29, %s9565_s10  ;;  %2616 = vrot.lane.b32.xlu1 %v2359_v8, %s9447_s17  ;;  %s9571_s17 = smov 119  }
 0x236   : > { %2737 = vrot.lane.b32.xlu0 %v2399_v29, %s9566_s18  ;;  %2657 = vrot.lane.b32.xlu1 %v2359_v8, %s9564_s30 }
 0x23a   : > { %2778 = vrot.lane.b32.xlu0 %v2399_v29, %s9567_s13  ;;  %2698 = vrot.lane.b32.xlu1 %v2359_v8, %s9565_s10 }
 0x23e   : > { %2819 = vrot.lane.b32.xlu0 %v2399_v29, %s9568_s14  ;;  %2739 = vrot.lane.b32.xlu1 %v2359_v8, %s9566_s18 }
 0x242   : > { %2860 = vrot.lane.b32.xlu0 %v2399_v29, %s9569_s15  ;;  %2780 = vrot.lane.b32.xlu1 %v2359_v8, %s9567_s13 }
 0x246   : > { %2909 = vrot.lane.b32.xlu0 %v7631_v17, %s9570_s16  ;;  %2821 = vrot.lane.b32.xlu1 %v2359_v8, %s9568_s14 }
 0x24a   : > { %2950 = vrot.lane.b32.xlu0 %v7631_v17, %s9571_s17  ;;  %2862 = vrot.lane.b32.xlu1 %v2359_v8, %s9569_s15 }
 0x24e   : > { %2991 = vrot.lane.b32.xlu0 %v7631_v17, %s9519_s26  ;;  %2911 = vrot.lane.b32.xlu1 %v7633_v14, %s9570_s16 }
 0x252   : > { %3032 = vrot.lane.b32.xlu0 %v7631_v17, %s9520_s9  ;;  %2952 = vrot.lane.b32.xlu1 %v7633_v14, %s9571_s17 }
 0x256   : > { %3073 = vrot.lane.b32.xlu0 %v7631_v17, %s9521_s25  ;;  %2993 = vrot.lane.b32.xlu1 %v7633_v14, %s9519_s26 }
 0x25a   : > { %3114 = vrot.lane.b32.xlu0 %v7631_v17, %s9522_s24  ;;  %3034 = vrot.lane.b32.xlu1 %v7633_v14, %s9520_s9 }
 0x25e   : > { %3155 = vrot.lane.b32.xlu0 %v7631_v17, %s9523_s23  ;;  %3075 = vrot.lane.b32.xlu1 %v7633_v14, %s9521_s25 }
 0x262   : > { %3196 = vrot.lane.b32.xlu0 %v7631_v17, %s9524_s22  ;;  %3116 = vrot.lane.b32.xlu1 %v7633_v14, %s9522_s24 }
 0x266   : > { %3237 = vrot.lane.b32.xlu0 %v7631_v17, %s9525_s21  ;;  %3157 = vrot.lane.b32.xlu1 %v7633_v14, %s9523_s23 }
 0x26a   : > { %3278 = vrot.lane.b32.xlu0 %v7631_v17, %s9526_s20  ;;  %3198 = vrot.lane.b32.xlu1 %v7633_v14, %s9524_s22 }
 0x26c   : > { %v2217_v27 = vpop.f32.mrb[4].mxu0  ;;  %v2258_v61 = vpop.f32.mrb[4].mxu1 }
 0x26d   : > { %v2218_v20 = vadd.f32 %v2217_v27, %v7602_v7  ;;  %v2259_v22 = vadd.f32 %v2258_v61, %v7602_v7  ;;  %v2219_v47 = vpop.f32.mrb[5].mxu0  ;;  %v2260_v49 = vpop.f32.mrb[5].mxu1 }
 0x26e   : > { %v2220_v44 = vadd.f32 %v2219_v47, %v7602_v7  ;;  %v2261_v15 = vadd.f32 %v2260_v49, %v7602_v7  ;;  %3319 = vrot.lane.b32.xlu0 %v7631_v17, %s9527_s19  ;;  %3239 = vrot.lane.b32.xlu1 %v7633_v14, %s9525_s21  ;;  %v2221_v18 = vpop.f32.mrb[6].mxu0  ;;  %v2262_v52 = vpop.f32.mrb[6].mxu1 }
 0x26f   : > { %v2269_v12 = vmax.f32 %v2218_v20, 0.0  ;;  %v2271_v1 = vmax.f32 %v2259_v22, 0.0  ;;  %v2222_v59 = vpop.f32.mrb[7].mxu0  ;;  %v2263_v30 = vpop.f32.mrb[7].mxu1 }
 0x270   : > { %v2270_v32 = vmax.f32 %v2220_v44, 0.0  ;;  %v2272_v63 = vmax.f32 %v2261_v15, 0.0 }
 0x271   : > { %v2318_v13 = vmul.f32 %v7704_v9, %v2269_v12  ;;  %v2320_v58 = vmul.f32 %v7709_v0, %v2271_v1 }
 0x272   : > { %v2319_v56 = vmul.f32 %v7712_v2, %v2270_v32  ;;  %v2321_v11 = vmul.f32 %v7717_v53, %v2272_v63  ;;  %3360 = vrot.lane.b32.xlu0 %v7631_v17, %s9572_s12  ;;  %3280 = vrot.lane.b32.xlu1 %v7633_v14, %s9526_s20 }
 0x274   : > { %v7731_v24 = vpack.c.bf16 %v2319_v56, %v2318_v13  ;;  %v7733_v36 = vpack.c.bf16 %v2321_v11, %v2320_v58 }
 0x276   : > { %2356 = vst [vmem:[#allocation2 + $0x14] sm:$0xff] %v7731_v24  ;;  %2357 = vst [vmem:[#allocation2 + $0x1c] sm:$0xff] %v7733_v36  ;;  %3401 = vrot.lane.b32.xlu0 %v7631_v17, %s9453_s29  ;;  %3321 = vrot.lane.b32.xlu1 %v7633_v14, %s9527_s19  ;;  %s9574_s29 = smov 111  }
 0x27a   : > { %3362 = vrot.lane.b32.xlu1 %v7633_v14, %s9572_s12 }
 0x27d   : > { %v7756_v7 = vld [vmem:[#allocation2 + $0x10] sm:$0xff]  ;;  %v7762_v10 = vld [vmem:[#allocation2 + $0x18] sm:$0xff] }
 0x27e   : > { %2372 = vrot.lane.b32.xlu0 %v7756_v7, %s9574_s29  ;;  %3403 = vrot.lane.b32.xlu1 %v7633_v14, %s9575_s0 }
 0x282   : > { %2413 = vrot.lane.b32.xlu0 %v7756_v7, %s9576_s11  ;;  %2374 = vrot.lane.b32.xlu1 %v7762_v10, %s9574_s29 }
 0x286   : > { %2454 = vrot.lane.b32.xlu0 %v7756_v7, %s9577_s1  ;;  %2415 = vrot.lane.b32.xlu1 %v7762_v10, %s9576_s11 }
 0x288   : > { %v2410_v3 = vpop.permute.xlu0 %2409  ;;  %v2369_v35 = vpop.permute.xlu1 %2368 }
 0x289   : > { %v2378_v50 = vrot.slane %v2369_v35, 4  ;;  %v2419_v62 = vrot.slane %v2410_v3, 4 }
 0x28a   : > { %2495 = vrot.lane.b32.xlu0 %v7756_v7, %s9578_s2  ;;  %2456 = vrot.lane.b32.xlu1 %v7762_v10, %s9577_s1 }
 0x28c   : > { %v2451_v41 = vpop.permute.xlu0 %2450  ;;  %v7776_v26 = vpop.permute.xlu1 %2370 }
 0x28d   : > { %v2379_v54 = vrot.slane %v7776_v26, 4  ;;  %v2460_v55 = vrot.slane %v2451_v41, 4 }
 0x28e   : > { %2536 = vrot.lane.b32.xlu0 %v7756_v7, %s9579_s3  ;;  %2497 = vrot.lane.b32.xlu1 %v7762_v10, %s9578_s2 }
 0x28f   : > { %v2383_v51 = vsel %vm335_vm0, %v2378_v50, %v2379_v54 }
 0x290   : > { %v2492_v4 = vpop.permute.xlu0 %2491  ;;  %v7783_v31 = vpop.permute.xlu1 %2411  ;;  %v2384_v46 = vsel %vm337_vm1, %v2369_v35, %v2383_v51 }
 0x291   : > { %v2420_v33 = vrot.slane %v7783_v31, 4  ;;  %v2501_v14 = vrot.slane %v2492_v4, 4 }
 0x292   : > { %2577 = vrot.lane.b32.xlu0 %v7756_v7, %s9580_s4  ;;  %2538 = vrot.lane.b32.xlu1 %v7762_v10, %s9579_s3 }
 0x293   : > { %v2424_v39 = vsel %vm335_vm0, %v2419_v62, %v2420_v33 }
 0x294   : > { %v2533_v57 = vpop.permute.xlu0 %2532  ;;  %v7796_v42 = vpop.permute.xlu1 %2452  ;;  %v2425_v48 = vsel %vm379_vm2, %v2410_v3, %v2424_v39 }
 0x295   : > { %v2461_v43 = vrot.slane %v7796_v42, 4  ;;  %v6505_v6 = vcombine.low %v2384_v46, %v2425_v48  ;;  %v6506_v23 = vcombine.high %v2384_v46, %v2425_v48  ;;  %v2542_v47 = vrot.slane %v2533_v57, 4 }
 0x296   : > { %2618 = vrot.lane.b32.xlu0 %v7756_v7, %s9581_s27  ;;  %2579 = vrot.lane.b32.xlu1 %v7762_v10, %s9580_s4 }
 0x297   : > { %4132 = vmatprep.subr.bf16.mxu0 %v6506_v23  ;;  %v2465_v8 = vsel %vm335_vm0, %v2460_v55, %v2461_v43 }
 0x298   : > { %v2574_v28 = vpop.permute.xlu0 %2573  ;;  %4133 = vmatpush1.bf16.msra.mxu0 %v6505_v6  ;;  %v7805_v34 = vpop.permute.xlu1 %2493  ;;  %v2466_v60 = vsel %vm421_vm3, %v2451_v41, %v2465_v8 }
 0x299   : > { %v2502_v29 = vrot.slane %v7805_v34, 4  ;;  %v2583_v15 = vrot.slane %v2574_v28, 4 }
 0x29a   : > { %2659 = vrot.lane.b32.xlu0 %v7756_v7, %s9564_s30  ;;  %2620 = vrot.lane.b32.xlu1 %v7762_v10, %s9581_s27 }
 0x29b   : > { %v2506_v5 = vsel %vm335_vm0, %v2501_v14, %v2502_v29 }
 0x29c   : > { %v2615_v40 = vpop.permute.xlu0 %2614  ;;  %v7818_v25 = vpop.permute.xlu1 %2534  ;;  %v2507_v27 = vsel %vm463_vm4, %v2492_v4, %v2506_v5 }
 0x29d   : > { %v2543_v61 = vrot.slane %v7818_v25, 4  ;;  %v6513_v20 = vcombine.low %v2466_v60, %v2507_v27  ;;  %v6514_v22 = vcombine.high %v2466_v60, %v2507_v27  ;;  %v2624_v56 = vrot.slane %v2615_v40, 4 }
 0x29e   : > { %2700 = vrot.lane.b32.xlu0 %v7756_v7, %s9565_s10  ;;  %2661 = vrot.lane.b32.xlu1 %v7762_v10, %s9564_s30 }
 0x29f   : > { %4134 = vmatprep.subr.bf16.mxu0 %v6514_v22  ;;  %v2547_v52 = vsel %vm335_vm0, %v2542_v47, %v2543_v61 }
 0x2a0   : > { %v2656_v49 = vpop.permute.xlu0 %2655  ;;  %4135 = vmatpush1.bf16.msra.mxu0 %v6513_v20  ;;  %v7827_v44 = vpop.permute.xlu1 %2575  ;;  %v2548_v30 = vsel %vm505_vm5, %v2533_v57, %v2547_v52 }
 0x2a1   : > { %v2584_v18 = vrot.slane %v7827_v44, 4  ;;  %v2665_v35 = vrot.slane %v2656_v49, 4 }
 0x2a2   : > { %2741 = vrot.lane.b32.xlu0 %v7756_v7, %s9566_s18  ;;  %2702 = vrot.lane.b32.xlu1 %v7762_v10, %s9565_s10 }
 0x2a3   : > { %v2588_v12 = vsel %vm335_vm0, %v2583_v15, %v2584_v18 }
 0x2a4   : > { %v2697_v1 = vpop.permute.xlu0 %2696  ;;  %v7840_v59 = vpop.permute.xlu1 %2616  ;;  %v2589_v32 = vsel %vm547_vm6, %v2574_v28, %v2588_v12 }
 0x2a5   : > { %v2625_v63 = vrot.slane %v7840_v59, 4  ;;  %v6521_v13 = vcombine.low %v2548_v30, %v2589_v32  ;;  %v6522_v58 = vcombine.high %v2548_v30, %v2589_v32  ;;  %v2706_v23 = vrot.slane %v2697_v1, 4 }
 0x2a6   : > { %2782 = vrot.lane.b32.xlu0 %v7756_v7, %s9567_s13  ;;  %2743 = vrot.lane.b32.xlu1 %v7762_v10, %s9566_s18 }
 0x2a7   : > { %4136 = vmatprep.subr.bf16.mxu0 %v6522_v58  ;;  %v2629_v50 = vsel %vm335_vm0, %v2624_v56, %v2625_v63 }
 0x2a8   : > { %v2738_v11 = vpop.permute.xlu0 %2737  ;;  %4137 = vmatpush1.bf16.msra.mxu0 %v6521_v13  ;;  %v7849_v3 = vpop.permute.xlu1 %2657  ;;  %v2630_v39 = vsel %vm9500_vm8, %v2615_v40, %v2629_v50 }
 0x2a9   : > { %v2666_v41 = vrot.slane %v7849_v3, 4  ;;  %v2747_v14 = vrot.slane %v2738_v11, 4 }
 0x2aa   : > { %2823 = vrot.lane.b32.xlu0 %v7756_v7, %s9568_s14  ;;  %2784 = vrot.lane.b32.xlu1 %v7762_v10, %s9567_s13 }
 0x2ab   : > { %v2670_v4 = vsel %vm335_vm0, %v2665_v35, %v2666_v41 }
 0x2ac   : > { %v2779_v62 = vpop.permute.xlu0 %2778  ;;  %v7862_v51 = vpop.permute.xlu1 %2698  ;;  %v2671_v57 = vsel %vm9582_vm9, %v2656_v49, %v2670_v4  ;;  %vm9586_vm9 = vcmask 72704  }
 0x2ad   : > { %v2707_v46 = vrot.slane %v7862_v51, 4  ;;  %v6529_v48 = vcombine.low %v2630_v39, %v2671_v57  ;;  %v6530_v6 = vcombine.high %v2630_v39, %v2671_v57 }
 0x2ae   : > { %2864 = vrot.lane.b32.xlu0 %v7756_v7, %s9569_s15  ;;  %2825 = vrot.lane.b32.xlu1 %v7762_v10, %s9568_s14 }
 0x2af   : > { %4138 = vmatprep.subr.bf16.mxu0 %v6530_v6  ;;  %v2711_v5 = vsel %vm335_vm0, %v2706_v23, %v2707_v46 }
 0x2b0   : > { %v2820_v55 = vpop.permute.xlu0 %2819  ;;  %4139 = vmatpush1.bf16.msra.mxu0 %v6529_v48  ;;  %v7871_v28 = vpop.permute.xlu1 %2739  ;;  %v2712_v27 = vsel %vm9583_vm12, %v2697_v1, %v2711_v5  ;;  %vm9587_vm12 = vcmask 7168  }
 0x2b1   : > { %v2748_v8 = vrot.slane %v7871_v28, 4  ;;  %v2829_v12 = vrot.slane %v2820_v55, 4 }
 0x2b2   : > { %2913 = vrot.lane.b32.xlu0 %v7731_v24, %s9570_s16  ;;  %2866 = vrot.lane.b32.xlu1 %v7762_v10, %s9569_s15  ;;  %v2788_v10 = vrot.slane %v2779_v62, 4 }
 0x2b3   : > { %v2752_v7 = vsel %vm335_vm0, %v2747_v14, %v2748_v8 }
 0x2b4   : > { %v2861_v40 = vpop.permute.xlu0 %2860  ;;  %v7884_v60 = vpop.permute.xlu1 %2780  ;;  %v2753_v20 = vsel %vm9584_vm11, %v2738_v11, %v2752_v7  ;;  %vm9588_vm11 = vcmask 1039360  }
 0x2b5   : > { %v9469_v22 = vrot.slane %v7884_v60, 4  ;;  %v6537_v47 = vcombine.low %v2712_v27, %v2753_v20  ;;  %v6538_v49 = vcombine.high %v2712_v27, %v2753_v20  ;;  %v2870_v35 = vrot.slane %v2861_v40, 4 }
 0x2b6   : > { %2954 = vrot.lane.b32.xlu0 %v7731_v24, %s9571_s17  ;;  %2915 = vrot.lane.b32.xlu1 %v7733_v36, %s9570_s16 }
 0x2b7   : > { %4140 = vmatprep.subr.bf16.mxu0 %v6538_v49  ;;  %v2793_v30 = vsel %vm335_vm0, %v2788_v10, %v9469_v22 }
 0x2b8   : > { %v2910_v15 = vpop.permute.xlu0 %2909  ;;  %4141 = vmatpush1.bf16.msra.mxu0 %v6537_v47  ;;  %v7893_v52 = vpop.permute.xlu1 %2821  ;;  %v2794_v56 = vsel %vm9585_vm10, %v2779_v62, %v2793_v30  ;;  %vm9589_vm10 = vcmask 973824  }
 0x2b9   : > { %v9467_v1 = vrot.slane %v7893_v52, 4  ;;  %v2919_v5 = vrot.slane %v2910_v15, 4 }
 0x2ba   : > { %2995 = vrot.lane.b32.xlu0 %v7731_v24, %s9519_s26  ;;  %2956 = vrot.lane.b32.xlu1 %v7733_v36, %s9571_s17 }
 0x2bb   : > { %v2834_v32 = vsel %vm335_vm0, %v2829_v12, %v9467_v1 }
 0x2bc   : > { %v2951_v13 = vpop.permute.xlu0 %2950  ;;  %v7906_v58 = vpop.permute.xlu1 %2862  ;;  %v2835_v11 = vsel %vm9586_vm9, %v2820_v55, %v2834_v32  ;;  %vm9590_vm9 = vcmask 965632  }
 0x2bd   : > { %v9466_v50 = vrot.slane %v7906_v58, 4  ;;  %v6545_v4 = vcombine.low %v2794_v56, %v2835_v11  ;;  %v6546_v39 = vcombine.high %v2794_v56, %v2835_v11  ;;  %v2960_v20 = vrot.slane %v2951_v13, 4 }
 0x2be   : > { %3036 = vrot.lane.b32.xlu0 %v7731_v24, %s9520_s9  ;;  %2997 = vrot.lane.b32.xlu1 %v7733_v36, %s9519_s26 }
 0x2bf   : > { %4142 = vmatprep.subr.bf16.mxu0 %v6546_v39  ;;  %v2875_v57 = vsel %vm335_vm0, %v2870_v35, %v9466_v50 }
 0x2c0   : > { %v2992_v48 = vpop.permute.xlu0 %2991  ;;  %4143 = vmatpush1.bf16.msra.mxu0 %v6545_v4  ;;  %v7918_v62 = vpop.permute.xlu1 %2911  ;;  %v2876_v6 = vsel %vm9587_vm12, %v2861_v40, %v2875_v57  ;;  %vm9591_vm12 = vcmask 957440  }
 0x2c1   : > { %v9464_v23 = vrot.slane %v7918_v62, 4  ;;  %v6553_v55 = vcombine.low %v2876_v6, %v7631_v17  ;;  %v6554_v14 = vcombine.high %v2876_v6, %v7631_v17  ;;  %v3001_v35 = vrot.slane %v2992_v48, 4 }
 0x2c2   : > { %3077 = vrot.lane.b32.xlu0 %v7731_v24, %s9521_s25  ;;  %3038 = vrot.lane.b32.xlu1 %v7733_v36, %s9520_s9 }
 0x2c3   : > { %4144 = vmatprep.subr.bf16.mxu0 %v6554_v14  ;;  %v2924_v47 = vsel %vm335_vm0, %v2919_v5, %v9464_v23 }
 0x2c4   : > { %v3033_v7 = vpop.permute.xlu0 %3032  ;;  %4145 = vmatpush1.bf16.msra.mxu0 %v6553_v55  ;;  %v7928_v27 = vpop.permute.xlu1 %2952  ;;  %v2925_v12 = vsel %vm9588_vm11, %v2910_v15, %v2924_v47  ;;  %vm9592_vm11 = vcmask 318464  }
 0x2c5   : > { %v9462_v40 = vrot.slane %v7928_v27, 4  ;;  %v3042_v57 = vrot.slane %v3033_v7, 4 }
 0x2c6   : > { %3118 = vrot.lane.b32.xlu0 %v7731_v24, %s9522_s24  ;;  %3079 = vrot.lane.b32.xlu1 %v7733_v36, %s9521_s25 }
 0x2c7   : > { %v2965_v17 = vsel %vm335_vm0, %v2960_v20, %v9462_v40  ;;  %v2444_v40 = vld [vmem:[#allocation2 + $0x20] sm:$0xf] }
 0x2c8   : > { %v3074_v49 = vpop.permute.xlu0 %3073  ;;  %v7941_v10 = vpop.permute.xlu1 %2993  ;;  %v2966_v30 = vsel %vm9589_vm10, %v2951_v13, %v2965_v17  ;;  %vm9593_vm10 = vcmask 310272  }
 0x2c9   : > { %v9460_v32 = vrot.slane %v7941_v10, 4  ;;  %v6561_v56 = vcombine.low %v2925_v12, %v2966_v30  ;;  %v6562_v11 = vcombine.high %v2925_v12, %v2966_v30  ;;  %v3083_v30 = vrot.slane %v3074_v49, 4 }
 0x2ca   : > { %3159 = vrot.lane.b32.xlu0 %v7731_v24, %s9523_s23  ;;  %3120 = vrot.lane.b32.xlu1 %v7733_v36, %s9522_s24 }
 0x2cb   : > { %4146 = vmatprep.subr.bf16.mxu0 %v6562_v11  ;;  %v3006_v13 = vsel %vm335_vm0, %v3001_v35, %v9460_v32 }
 0x2cc   : > { %v3115_v4 = vpop.permute.xlu0 %3114  ;;  %4147 = vmatpush1.bf16.msra.mxu0 %v6561_v56  ;;  %v7950_v39 = vpop.permute.xlu1 %3034  ;;  %v3007_v5 = vsel %vm9590_vm9, %v2992_v48, %v3006_v13  ;;  %vm9594_vm9 = vcmask 302080  }
 0x2cd   : > { %v9458_v15 = vrot.slane %v7950_v39, 4  ;;  %v3124_v35 = vrot.slane %v3115_v4, 4 }
 0x2ce   : > { %3200 = vrot.lane.b32.xlu0 %v7731_v24, %s9524_s22  ;;  %3161 = vrot.lane.b32.xlu1 %v7733_v36, %s9523_s23 }
 0x2cf   : > { %v3047_v6 = vsel %vm335_vm0, %v3042_v57, %v9458_v15 }
 0x2d0   : > { %v3156_v55 = vpop.permute.xlu0 %3155  ;;  %v7963_v14 = vpop.permute.xlu1 %3075  ;;  %v3048_v20 = vsel %vm9591_vm12, %v3033_v7, %v3047_v6  ;;  %vm9595_vm12 = vcmask 236544  }
 0x2d1   : > { %v9456_v47 = vrot.slane %v7963_v14, 4  ;;  %v6569_v17 = vcombine.low %v3007_v5, %v3048_v20  ;;  %v6570_v12 = vcombine.high %v3007_v5, %v3048_v20 }
 0x2d2   : > { %3241 = vrot.lane.b32.xlu0 %v7731_v24, %s9525_s21  ;;  %3202 = vrot.lane.b32.xlu1 %v7733_v36, %s9524_s22 }
 0x2d3   : > { %4148 = vmatprep.subr.bf16.mxu0 %v6570_v12  ;;  %v3088_v7 = vsel %vm335_vm0, %v3083_v30, %v9456_v47  ;;  %v3165_v47 = vrot.slane %v3156_v55, 4 }
 0x2d4   : > { %v3197_v56 = vpop.permute.xlu0 %3196  ;;  %4149 = vmatpush1.bf16.msra.mxu0 %v6569_v17  ;;  %v7972_v11 = vpop.permute.xlu1 %3116  ;;  %v3089_v5 = vsel %vm9592_vm11, %v3074_v49, %v3088_v7  ;;  %vm9596_vm11 = vcmask 228352  }
 0x2d5   : > { %v9457_v48 = vrot.slane %v7972_v11, 4  ;;  %v3206_v15 = vrot.slane %v3197_v56, 4 }
 0x2d6   : > { %3282 = vrot.lane.b32.xlu0 %v7731_v24, %s9526_s20  ;;  %3243 = vrot.lane.b32.xlu1 %v7733_v36, %s9525_s21 }
 0x2d7   : > { %v3129_v57 = vsel %vm335_vm0, %v3124_v35, %v9457_v48 }
 0x2d8   : > { %v3238_v13 = vpop.permute.xlu0 %3237  ;;  %v7985_v6 = vpop.permute.xlu1 %3157  ;;  %v3130_v20 = vsel %vm9593_vm10, %v3115_v4, %v3129_v57  ;;  %vm9597_vm10 = vcmask 220160  }
 0x2d9   : > { %v9459_v17 = vrot.slane %v7985_v6, 4  ;;  %v6577_v12 = vcombine.low %v3089_v5, %v3130_v20  ;;  %v6578_v30 = vcombine.high %v3089_v5, %v3130_v20  ;;  %v3247_v32 = vrot.slane %v3238_v13, 4 }
 0x2da   : > { %3323 = vrot.lane.b32.xlu0 %v7731_v24, %s9527_s19  ;;  %3284 = vrot.lane.b32.xlu1 %v7733_v36, %s9526_s20 }
 0x2db   : > { %4150 = vmatprep.subr.bf16.mxu0 %v6578_v30  ;;  %v3170_v4 = vsel %vm335_vm0, %v3165_v47, %v9459_v17 }
 0x2dc   : > { %v3279_v35 = vpop.permute.xlu0 %3278  ;;  %4151 = vmatpush1.bf16.msra.mxu0 %v6577_v12  ;;  %v7994_v48 = vpop.permute.xlu1 %3198  ;;  %v3171_v20 = vsel %vm9594_vm9, %v3156_v55, %v3170_v4  ;;  %v2362_v4 = vld [vmem:[#allocation2 + $0x20] sm:$0xf]  ;;  %vm9598_vm9 = vcmask 736256  }
 0x2dd   : > { %v9461_v49 = vrot.slane %v7994_v48, 4 }
 0x2de   : > { %3364 = vrot.lane.b32.xlu0 %v7731_v24, %s9572_s12  ;;  %3325 = vrot.lane.b32.xlu1 %v7733_v36, %s9527_s19 }
 0x2df   : > { %v3211_v7 = vsel %vm335_vm0, %v3206_v15, %v9461_v49  ;;  %v3288_v49 = vrot.slane %v3279_v35, 4 }
 0x2e0   : > { %v3320_v57 = vpop.permute.xlu0 %3319  ;;  %v8007_v5 = vpop.permute.xlu1 %3239  ;;  %v3212_v12 = vsel %vm9595_vm12, %v3197_v56, %v3211_v7  ;;  %vm9599_vm12 = vmmov %vm9598_vm9 }
 0x2e1   : > { %v9463_v30 = vrot.slane %v8007_v5, 4  ;;  %v6585_v47 = vcombine.low %v3171_v20, %v3212_v12  ;;  %v6586_v17 = vcombine.high %v3171_v20, %v3212_v12 }
 0x2e2   : > { %3405 = vrot.lane.b32.xlu0 %v7731_v24, %s9575_s0  ;;  %3366 = vrot.lane.b32.xlu1 %v7733_v36, %s9572_s12 }
 0x2e3   : > { %4152 = vmatprep.subr.bf16.mxu0 %v6586_v17  ;;  %v3252_v56 = vsel %vm335_vm0, %v3247_v32, %v9463_v30  ;;  %v2403_v32 = vld [vmem:[#allocation2 + $0x20] sm:$0xf] }
 0x2e4   : > { %4153 = vmatpush1.bf16.msra.mxu0 %v6585_v47  ;;  %v8016_v15 = vpop.permute.xlu1 %3280  ;;  %v3361_v7 = vpop.permute.xlu0 %3360  ;;  %v3253_v20 = vsel %vm9596_vm11, %v3238_v13, %v3252_v56  ;;  %v2485_v56 = vld [vmem:[#allocation2 + $0x20] sm:$0xf]  ;;  %vm9600_vm11 = vcmask 728064  }
 0x2e5   : > { %v9465_v55 = vrot.slane %v8016_v15, 4 }
 0x2e6   : > { %2376 = vrot.lane.b32.xlu0 %v2362_v4, %s9574_s29  ;;  %3407 = vrot.lane.b32.xlu1 %v7733_v36, %s9575_s0  ;;  %v3329_v36 = vrot.slane %v3320_v57, 4 }
 0x2e7   : > { %v3293_v24 = vsel %vm335_vm0, %v3288_v49, %v9465_v55  ;;  %v3370_v55 = vrot.slane %v3361_v7, 4 }
 0x2e8   : > { %v8028_v17 = vpop.permute.xlu1 %3321  ;;  %v3294_v12 = vsel %vm9597_vm10, %v3279_v35, %v3293_v24  ;;  %v3402_v4 = vpop.permute.xlu0 %3401  ;;  %v2526_v35 = vld [vmem:[#allocation2 + $0x20] sm:$0xf]  ;;  %vm9601_vm10 = vcmask 89088  }
 0x2e9   : > { %v9468_v47 = vrot.slane %v8028_v17, 4  ;;  %v6593_v30 = vcombine.low %v3253_v20, %v3294_v12  ;;  %v6594_v23 = vcombine.high %v3253_v20, %v3294_v12 }
 0x2ea   : > { %2458 = vrot.lane.b32.xlu0 %v2444_v40, %s9577_s1  ;;  %2417 = vrot.lane.b32.xlu1 %v2403_v32, %s9576_s11  ;;  %v3411_v40 = vrot.slane %v3402_v4, 4 }
 0x2eb   : > { %4154 = vmatprep.subr.bf16.mxu0 %v6594_v23  ;;  %v3334_v24 = vsel %vm335_vm0, %v3329_v36, %v9468_v47  ;;  %v2608_v36 = vld [vmem:[#allocation2 + $0x20] sm:$0xf] }
 0x2ec   : > { %4155 = vmatpush1.bf16.msra.mxu0 %v6593_v30  ;;  %v8035_v49 = vpop.permute.xlu1 %3362  ;;  %v3335_v12 = vsel %vm1311_vm15, %v3320_v57, %v3334_v24  ;;  %v2567_v47 = vld [vmem:[#allocation2 + $0x20] sm:$0xf] }
 0x2ed   : > { %v9470_v13 = vrot.slane %v8035_v49, 4 }
 0x2ee   : > { %2540 = vrot.lane.b32.xlu0 %v2526_v35, %s9579_s3  ;;  %2499 = vrot.lane.b32.xlu1 %v2485_v56, %s9578_s2 }
 0x2ef   : > { %v3375_v23 = vsel %vm335_vm0, %v3370_v55, %v9470_v13 }
 0x2f0   : > { %v2373_v30 = vpop.permute.xlu0 %2372  ;;  %v8046_v20 = vpop.permute.xlu1 %3403  ;;  %v3376_v32 = vsel %vm1353_vm14, %v3361_v7, %v3375_v23 }
 0x2f1   : > { %v2380_v50 = vrot.slane %v2373_v30, 4  ;;  %v9471_v1 = vrot.slane %v8046_v20, 4  ;;  %v6601_v35 = vcombine.low %v3335_v12, %v3376_v32  ;;  %v6602_v22 = vcombine.high %v3335_v12, %v3376_v32  ;;  %v2690_v32 = vld [vmem:[#allocation2 + $0x20] sm:$0xf] }
 0x2f2   : > { %2622 = vrot.lane.b32.xlu0 %v2608_v36, %s9581_s27  ;;  %2581 = vrot.lane.b32.xlu1 %v2567_v47, %s9580_s4  ;;  %v2649_v47 = vld [vmem:[#allocation2 + $0x20] sm:$0xf] }
 0x2f3   : > { %v3416_v55 = vsel %vm335_vm0, %v3411_v40, %v9471_v1  ;;  %4156 = vmatprep.subr.bf16.mxu0 %v6602_v22  ;;  %v2385_v24 = vsel %vm335_vm0, %v2379_v54, %v2380_v50 }
 0x2f4   : > { %v2414_v56 = vpop.permute.xlu0 %2413  ;;  %4157 = vmatpush1.bf16.msra.mxu0 %v6601_v35  ;;  %v8056_v57 = vpop.permute.xlu1 %2374  ;;  %v3417_v7 = vsel %vm1395_vm13, %v3402_v4, %v3416_v55  ;;  %v8069_v4 = vcombine.low %v7744_v19, %v7744_v19  ;;  %v2386_v55 = vsel %vm337_vm1, %v7776_v26, %v2385_v24 }
 0x2f5   : > { %v2421_v23 = vrot.slane %v2414_v56, 4  ;;  %v2381_v12 = vrot.slane %v8056_v57, 4  ;;  %v6610_v36 = vcombine.high %v3417_v7, %v3417_v7  ;;  %v6609_v13 = vcombine.low %v3417_v7, %v3417_v7 }
 0x2f6   : > { %2704 = vrot.lane.b32.xlu0 %v2690_v32, %s9565_s10  ;;  %2663 = vrot.lane.b32.xlu1 %v2649_v47, %s9564_s30  ;;  %v2772_v47 = vld [vmem:[#allocation2 + $0x20] sm:$0xf] }
 0x2f7   : > { %6617 = vmatprep.subr.msk.bf16.mxu0 %vm335_vm0, %v6610_v36  ;;  %v4109_v22 = vsel %vm335_vm0, %v6609_v13, 0  ;;  %v2426_v54 = vsel %vm335_vm0, %v2420_v33, %v2421_v23  ;;  %v2387_v13 = vsel %vm335_vm0, %v2380_v50, %v2381_v12  ;;  %v2731_v36 = vld [vmem:[#allocation2 + $0x20] sm:$0xf] }
 0x2f8   : > { %v2455_v40 = vpop.permute.xlu0 %2454  ;;  %4159 = vmatpush1.bf16.msra.mxu0 %v4109_v22  ;;  %v8074_v35 = vpop.permute.xlu1 %2415  ;;  %v2427_v7 = vsel %vm379_vm2, %v7783_v31, %v2426_v54  ;;  %v2388_v24 = vsel %vm337_vm1, %v2373_v30, %v2387_v13  ;;  %v2944_v30 = vld [vmem:[#allocation2 + $0x24] sm:$0xf] }
 0x2f9   : > { %v2462_v19 = vrot.slane %v2455_v40, 4  ;;  %v9472_v32 = vrot.slane %v8074_v35, 4  ;;  %v6507_v33 = vcombine.low %v2386_v55, %v2427_v7  ;;  %v6508_v1 = vcombine.high %v2386_v55, %v2427_v7  ;;  %v2854_v7 = vld [vmem:[#allocation2 + $0x20] sm:$0xf] }
 0x2fa   : > { %2786 = vrot.lane.b32.xlu0 %v2772_v47, %s9567_s13  ;;  %2745 = vrot.lane.b32.xlu1 %v2731_v36, %s9566_s18 }
 0x2fb   : > { %4165 = vmatmul.mubr.bf16.vlgmr.msra.gmra.mrb[8].mxu0 %v8069_v4  ;;  %4173 = vmatprep.subr.bf16.mxu1 %v6508_v1  ;;  %v2428_v26 = vsel %vm335_vm0, %v2421_v23, %v9472_v32  ;;  %v2467_v54 = vsel %vm335_vm0, %v2461_v43, %v2462_v19  ;;  %v2813_v23 = vld [vmem:[#allocation2 + $0x20] sm:$0xf] }
 0x2fc   : > { %v2496_v31 = vpop.permute.xlu0 %2495  ;;  %4174 = vmatpush1.bf16.msra.mxu1 %v6507_v33  ;;  %v8090_v50 = vpop.permute.xlu1 %2456  ;;  %v2429_v22 = vsel %vm379_vm2, %v2414_v56, %v2428_v26  ;;  %6622 = vmatprep.mubr.msk.bf16.mxu0 %vm2072_vm7, %v7750_v37  ;;  %v2903_v56 = vld [vmem:[#allocation2 + $0x24] sm:$0xf]  ;;  %v2468_v26 = vsel %vm421_vm3, %v7796_v42, %v2467_v54 }
 0x2fd   : > { %v2503_v1 = vrot.slane %v2496_v31, 4  ;;  %v2463_v55 = vrot.slane %v8090_v50, 4  ;;  %v6509_v47 = vcombine.low %v2388_v24, %v2429_v22  ;;  %v6510_v36 = vcombine.high %v2388_v24, %v2429_v22 }
 0x2fe   : > { %2868 = vrot.lane.b32.xlu0 %v2854_v7, %s9569_s15  ;;  %2827 = vrot.lane.b32.xlu1 %v2813_v23, %s9568_s14 }
 0x2ff   : > { %4214 = vmatprep.subr.bf16.mxu0 %v6510_v36  ;;  %v2508_v43 = vsel %vm335_vm0, %v2502_v29, %v2503_v1  ;;  %v2469_v22 = vsel %vm335_vm0, %v2462_v19, %v2463_v55  ;;  %v3026_v29 = vld [vmem:[#allocation2 + $0x24] sm:$0xf] }
 0x300   : > { %v2537_v13 = vpop.permute.xlu0 %2536  ;;  %4215 = vmatpush1.bf16.msra.mxu0 %v6509_v47  ;;  %v8105_v33 = vpop.permute.xlu1 %2497  ;;  %v2509_v24 = vsel %vm463_vm4, %v7805_v34, %v2508_v43  ;;  %v2985_v47 = vld [vmem:[#allocation2 + $0x24] sm:$0xf]  ;;  %v2470_v19 = vsel %vm421_vm3, %v2455_v40, %v2469_v22 }
 0x301   : > { %v2544_v7 = vrot.slane %v2537_v13, 4  ;;  %v2504_v23 = vrot.slane %v8105_v33, 4  ;;  %v6515_v36 = vcombine.low %v2468_v26, %v2509_v24  ;;  %v6516_v32 = vcombine.high %v2468_v26, %v2509_v24 }
 0x302   : > { %2958 = vrot.lane.b32.xlu0 %v2944_v30, %s9571_s17  ;;  %2917 = vrot.lane.b32.xlu1 %v2903_v56, %s9570_s16 }
 0x303   : > { %4175 = vmatprep.subr.bf16.mxu1 %v6516_v32  ;;  %v2510_v42 = vsel %vm335_vm0, %v2503_v1, %v2504_v23  ;;  %v2549_v30 = vsel %vm335_vm0, %v2543_v61, %v2544_v7  ;;  %v3108_v1 = vld [vmem:[#allocation2 + $0x24] sm:$0xf] }
 0x304   : > { %v2578_v34 = vpop.permute.xlu0 %2577  ;;  %4176 = vmatpush1.bf16.msra.mxu1 %v6515_v36  ;;  %v8120_v54 = vpop.permute.xlu1 %2538  ;;  %v2511_v43 = vsel %vm463_vm4, %v2496_v31, %v2510_v42  ;;  %v3067_v36 = vld [vmem:[#allocation2 + $0x24] sm:$0xf]  ;;  %v2550_v61 = vsel %vm505_vm5, %v7818_v25, %v2549_v30 }
 0x305   : > { %v2585_v56 = vrot.slane %v2578_v34, 4  ;;  %v2545_v32 = vrot.slane %v8120_v54, 4  ;;  %v6517_v26 = vcombine.low %v2470_v19, %v2511_v43  ;;  %v6518_v24 = vcombine.high %v2470_v19, %v2511_v43 }
 0x306   : > { %3040 = vrot.lane.b32.xlu0 %v3026_v29, %s9520_s9  ;;  %2999 = vrot.lane.b32.xlu1 %v2985_v47, %s9519_s26 }
 0x307   : > { %4216 = vmatprep.subr.bf16.mxu0 %v6518_v24  ;;  %v2590_v40 = vsel %vm335_vm0, %v2584_v18, %v2585_v56  ;;  %v2551_v29 = vsel %vm335_vm0, %v2544_v7, %v2545_v32  ;;  %v3190_v18 = vld [vmem:[#allocation2 + $0x24] sm:$0xf] }
 0x308   : > { %v2619_v31 = vpop.permute.xlu0 %2618  ;;  %4217 = vmatpush1.bf16.msra.mxu0 %v6517_v26  ;;  %v8133_v22 = vpop.permute.xlu1 %2579  ;;  %v2591_v42 = vsel %vm547_vm6, %v7827_v44, %v2590_v40  ;;  %v3149_v26 = vld [vmem:[#allocation2 + $0x24] sm:$0xf]  ;;  %v2552_v7 = vsel %vm505_vm5, %v2537_v13, %v2551_v29 }
 0x309   : > { %v2626_v47 = vrot.slane %v2619_v31, 4  ;;  %v2586_v19 = vrot.slane %v8133_v22, 4  ;;  %v6523_v43 = vcombine.low %v2550_v61, %v2591_v42  ;;  %v6524_v24 = vcombine.high %v2550_v61, %v2591_v42 }
 0x30a   : > { %3122 = vrot.lane.b32.xlu0 %v3108_v1, %s9522_s24  ;;  %3081 = vrot.lane.b32.xlu1 %v3067_v36, %s9521_s25 }
 0x30b   : > { %4177 = vmatprep.subr.bf16.mxu1 %v6524_v24  ;;  %v2592_v25 = vsel %vm335_vm0, %v2585_v56, %v2586_v19  ;;  %v2631_v1 = vsel %vm335_vm0, %v2625_v63, %v2626_v47  ;;  %v3272_v56 = vld [vmem:[#allocation2 + $0x24] sm:$0xf] }
 0x30c   : > { %v2660_v44 = vpop.permute.xlu0 %2659  ;;  %4178 = vmatpush1.bf16.msra.mxu1 %v6523_v43  ;;  %v8148_v30 = vpop.permute.xlu1 %2620  ;;  %v2593_v40 = vsel %vm547_vm6, %v2578_v34, %v2592_v25  ;;  %v3231_v43 = vld [vmem:[#allocation2 + $0x24] sm:$0xf]  ;;  %v2632_v63 = vsel %vm9500_vm8, %v7840_v59, %v2631_v1 }
 0x30d   : > { %v2667_v36 = vrot.slane %v2660_v44, 4  ;;  %v9492_v61 = vrot.slane %v8148_v30, 4  ;;  %v6525_v42 = vcombine.low %v2552_v7, %v2593_v40  ;;  %v6526_v24 = vcombine.high %v2552_v7, %v2593_v40 }
 0x30e   : > { %3204 = vrot.lane.b32.xlu0 %v3190_v18, %s9524_s22  ;;  %3163 = vrot.lane.b32.xlu1 %v3149_v26, %s9523_s23 }
 0x30f   : > { %4218 = vmatprep.subr.bf16.mxu0 %v6526_v24  ;;  %v2672_v13 = vsel %vm335_vm0, %v2666_v41, %v2667_v36  ;;  %v2633_v18 = vsel %vm335_vm0, %v2626_v47, %v9492_v61  ;;  %v3354_v41 = vld [vmem:[#allocation2 + $0x24] sm:$0xf] }
 0x310   : > { %v2701_v34 = vpop.permute.xlu0 %2700  ;;  %4219 = vmatpush1.bf16.msra.mxu0 %v6525_v42  ;;  %v8161_v29 = vpop.permute.xlu1 %2661  ;;  %v2673_v25 = vsel %vm9598_vm9, %v7849_v3, %v2672_v13  ;;  %v3313_v42 = vld [vmem:[#allocation2 + $0x24] sm:$0xf]  ;;  %v2634_v47 = vsel %vm9500_vm8, %v2619_v31, %v2633_v18  ;;  %vm9602_vm9 = vmmov %vm9600_vm11 }
 0x311   : > { %v2708_v26 = vrot.slane %v2701_v34, 4  ;;  %v9479_v7 = vrot.slane %v8161_v29, 4  ;;  %v6531_v40 = vcombine.low %v2632_v63, %v2673_v25  ;;  %v6532_v24 = vcombine.high %v2632_v63, %v2673_v25  ;;  %v3553_v31 = vld [vmem:[%s9373_s5] sm:$0xff] }
 0x312   : > { %3286 = vrot.lane.b32.xlu0 %v3272_v56, %s9526_s20  ;;  %3245 = vrot.lane.b32.xlu1 %v3231_v43, %s9525_s21  ;;  %v5024_v61 = vld [vmem:[#allocation2 + $0x24] sm:$0xf] }
 0x313   : > { %4179 = vmatprep.subr.bf16.mxu1 %v6532_v24  ;;  %v2674_v59 = vsel %vm335_vm0, %v2667_v36, %v9479_v7  ;;  %v2713_v56 = vsel %vm335_vm0, %v2707_v46, %v2708_v26  ;;  %v3395_v36 = vld [vmem:[#allocation2 + $0x24] sm:$0xf] }
 0x314   : > { %v2742_v3 = vpop.permute.xlu0 %2741  ;;  %4180 = vmatpush1.bf16.msra.mxu1 %v6531_v40  ;;  %v8176_v1 = vpop.permute.xlu1 %2702  ;;  %v2675_v13 = vsel %vm9599_vm12, %v2660_v44, %v2674_v59  ;;  %v2714_v40 = vsel %vm9600_vm11, %v7862_v51, %v2713_v56  ;;  %vm9603_vm12 = vmmov %vm9601_vm10  ;;  %vm9606_vm11 = vcmask 80896  }
 0x315   : > { %v2749_v43 = vrot.slane %v2742_v3, 4  ;;  %v9478_v63 = vrot.slane %v8176_v1, 4  ;;  %v6533_v25 = vcombine.low %v2634_v47, %v2675_v13  ;;  %v6534_v24 = vcombine.high %v2634_v47, %v2675_v13 }
 0x316   : > { %3368 = vrot.lane.b32.xlu0 %v3354_v41, %s9572_s12  ;;  %3327 = vrot.lane.b32.xlu1 %v3313_v42, %s9527_s19 }
 0x317   : > { %4220 = vmatprep.subr.bf16.mxu0 %v6534_v24  ;;  %v2754_v44 = vsel %vm335_vm0, %v2748_v8, %v2749_v43  ;;  %v2715_v42 = vsel %vm335_vm0, %v2708_v26, %v9478_v63  ;;  %v4901_v8 = vld [vmem:[#allocation2 + $0x24] sm:$0xf] }
 0x318   : > { %v2783_v46 = vpop.permute.xlu0 %2782  ;;  %4221 = vmatpush1.bf16.msra.mxu0 %v6533_v25  ;;  %v8192_v18 = vpop.permute.xlu1 %2743  ;;  %v2755_v41 = vsel %vm9601_vm10, %v7871_v28, %v2754_v44  ;;  %v2716_v26 = vsel %vm9602_vm9, %v2701_v34, %v2715_v42  ;;  %v9604_v44 = vrot.slane %v7884_v60, 4  ;;  %vm9607_vm10 = vcmask 72704  }
 0x319   : > { %v2790_v59 = vrot.slane %v2783_v46, 4  ;;  %v9474_v47 = vrot.slane %v8192_v18, 4  ;;  %v6539_v13 = vcombine.low %v2714_v40, %v2755_v41  ;;  %v6540_v24 = vcombine.high %v2714_v40, %v2755_v41 }
 0x31a   : > { %3556 = vperm.xlu0 %6797, %v3553_v31   ;;  %3409 = vrot.lane.b32.xlu1 %v3395_v36, %s9575_s0  ;;  %vm9609_vm9 = vcmask 7168  }
 0x31b   : > { %4181 = vmatprep.subr.bf16.mxu1 %v6540_v24  ;;  %v2756_v51 = vsel %vm335_vm0, %v2749_v43, %v9474_v47  ;;  %v2795_v31 = vsel %vm335_vm0, %v9604_v44, %v2790_v59  ;;  %v9605_v43 = vrot.slane %v7893_v52, 4  ;;  %v4942_v47 = vld [vmem:[#allocation2 + $0x24] sm:$0xf] }
 0x31c   : > { %v2824_v56 = vpop.permute.xlu0 %2823  ;;  %4182 = vmatpush1.bf16.msra.mxu1 %v6539_v13  ;;  %v8206_v28 = vpop.permute.xlu1 %2784  ;;  %v2757_v25 = vsel %vm9603_vm12, %v2742_v3, %v2756_v51  ;;  %v2796_v42 = vsel %vm9606_vm11, %v7884_v60, %v2795_v31  ;;  %vm9610_vm12 = vmmov %vm9606_vm11 }
 0x31d   : > { %v2831_v40 = vrot.slane %v2824_v56, 4  ;;  %v9476_v36 = vrot.slane %v8206_v28, 4  ;;  %v6541_v41 = vcombine.low %v2716_v26, %v2757_v25  ;;  %v6542_v24 = vcombine.high %v2716_v26, %v2757_v25  ;;  %vm9611_vm11 = vmmov %vm9607_vm10 }
 0x31e   : > { %4915 = vrot.lane.b32.xlu0 %v4901_v8, %s9570_s16 }
 0x31f   : > { %4222 = vmatprep.subr.bf16.mxu0 %v6542_v24  ;;  %v2836_v13 = vsel %vm335_vm0, %v9605_v43, %v2831_v40  ;;  %v2797_v8 = vsel %vm335_vm0, %v2790_v59, %v9476_v36 }
 0x320   : > { %v2865_v34 = vpop.permute.xlu0 %2864  ;;  %4223 = vmatpush1.bf16.msra.mxu0 %v6541_v41  ;;  %v8218_v3 = vpop.permute.xlu1 %2825  ;;  %v2837_v51 = vsel %vm9607_vm10, %v7893_v52, %v2836_v13  ;;  %v9608_v41 = vrot.slane %v7906_v58, 4  ;;  %v8239_v13 = vld [vmem:[#allocation2 + $0xc] sm:$0xff]  ;;  %vm9612_vm10 = vmmov %vm9609_vm9 }
 0x321   : > { %v2872_v26 = vrot.slane %v2865_v34, 4  ;;  %v9475_v25 = vrot.slane %v8218_v3, 4  ;;  %v6547_v44 = vcombine.low %v2796_v42, %v2837_v51  ;;  %v6548_v24 = vcombine.high %v2796_v42, %v2837_v51 }
 0x322   : > { %4956 = vrot.lane.b32.xlu0 %v4942_v47, %s9571_s17  ;;  %v2798_v47 = vsel %vm9610_vm12, %v2783_v46, %v2797_v8  ;;  %v8252_v8 = vld [vmem:[#allocation2 + $0x14] sm:$0xff]  ;;  %vm9616_vm12 = vcmask 973824  }
 0x323   : > { %4183 = vmatprep.subr.bf16.mxu1 %v6548_v24  ;;  %v2877_v43 = vsel %vm335_vm0, %v9608_v41, %v2872_v26  ;;  %v2838_v60 = vsel %vm335_vm0, %v2831_v40, %v9475_v25 }
 0x324   : > { %v2914_v52 = vpop.permute.xlu0 %2913  ;;  %4184 = vmatpush1.bf16.msra.mxu1 %v6547_v44  ;;  %v8235_v31 = vpop.permute.xlu1 %2866  ;;  %v2878_v59 = vsel %vm9609_vm9, %v7906_v58, %v2877_v43  ;;  %v2839_v42 = vsel %vm9611_vm11, %v2824_v56, %v2838_v60  ;;  %v9613_v60 = vrot.slane %v7918_v62, 4  ;;  %vm9615_vm9 = vcmask 1039360  }
 0x325   : > { %v2921_v51 = vrot.slane %v2914_v52, 4  ;;  %v9477_v24 = vrot.slane %v8235_v31, 4  ;;  %v6555_v41 = vcombine.low %v2878_v59, %v8239_v13  ;;  %v6556_v40 = vcombine.high %v2878_v59, %v8239_v13  ;;  %vm9617_vm11 = vmmov %vm9615_vm9 }
 0x326   : > { %v6549_v25 = vcombine.low %v2798_v47, %v2839_v42  ;;  %v6550_v44 = vcombine.high %v2798_v47, %v2839_v42 }
 0x327   : > { %4185 = vmatprep.subr.bf16.mxu1 %v6556_v40  ;;  %v2879_v58 = vsel %vm335_vm0, %v2872_v26, %v9477_v24  ;;  %v2926_v59 = vsel %vm335_vm0, %v9613_v60, %v2921_v51 }
 0x328   : > { %4224 = vmatprep.subr.bf16.mxu0 %v6550_v44  ;;  %v2955_v43 = vpop.permute.xlu0 %2954  ;;  %4186 = vmatpush1.bf16.msra.mxu1 %v6555_v41  ;;  %v8249_v46 = vpop.permute.xlu1 %2915  ;;  %v2880_v56 = vsel %vm9612_vm10, %v2865_v34, %v2879_v58  ;;  %v9614_v41 = vrot.slane %v7928_v27, 4  ;;  %v2927_v58 = vsel %vm9615_vm9, %v7918_v62, %v2926_v59  ;;  %vm9618_vm10 = vmmov %vm9616_vm12  ;;  %vm9621_vm9 = vcmask 965632  }
 0x329   : > { %v2962_v36 = vrot.slane %v2955_v43, 4  ;;  %4225 = vmatpush1.bf16.msra.mxu0 %v6549_v25  ;;  %v9480_v47 = vrot.slane %v8249_v46, 4  ;;  %v6557_v42 = vcombine.low %v2880_v56, %v8252_v8  ;;  %v6558_v26 = vcombine.high %v2880_v56, %v8252_v8 }
 0x32b   : > { %4226 = vmatprep.subr.bf16.mxu0 %v6558_v26  ;;  %v2967_v40 = vsel %vm335_vm0, %v9614_v41, %v2962_v36  ;;  %v2928_v60 = vsel %vm335_vm0, %v2921_v51, %v9480_v47  ;;  %v9619_v51 = vrot.slane %v7941_v10, 4 }
 0x32c   : > { %v2996_v34 = vpop.permute.xlu0 %2995  ;;  %v8263_v44 = vpop.permute.xlu1 %2956  ;;  %v2968_v25 = vsel %vm9616_vm12, %v7928_v27, %v2967_v40  ;;  %v2929_v27 = vsel %vm9617_vm11, %v2914_v52, %v2928_v60  ;;  %vm9622_vm12 = vcmask 957440   ;;  %vm9623_vm11 = vmmov %vm9621_vm9 }
 0x32d   : > { %v3003_v24 = vrot.slane %v2996_v34, 4  ;;  %4227 = vmatpush1.bf16.msra.mxu0 %v6557_v42  ;;  %v9481_v56 = vrot.slane %v8263_v44, 4  ;;  %v6563_v26 = vcombine.low %v2927_v58, %v2968_v25  ;;  %v6564_v63 = vcombine.high %v2927_v58, %v2968_v25 }
 0x32f   : > { %4187 = vmatprep.subr.bf16.mxu1 %v6564_v63  ;;  %v2969_v41 = vsel %vm335_vm0, %v2962_v36, %v9481_v56  ;;  %v3008_v42 = vsel %vm335_vm0, %v9619_v51, %v3003_v24  ;;  %v9620_v36 = vrot.slane %v7950_v39, 4 }
 0x330   : > { %v3037_v7 = vpop.permute.xlu0 %3036  ;;  %4188 = vmatpush1.bf16.msra.mxu1 %v6563_v26  ;;  %v8276_v62 = vpop.permute.xlu1 %2997  ;;  %v2970_v59 = vsel %vm9618_vm10, %v2955_v43, %v2969_v41  ;;  %v3009_v52 = vsel %vm9621_vm9, %v7941_v10, %v3008_v42  ;;  %vm9624_vm10 = vmmov %vm9622_vm12  ;;  %vm9627_vm9 = vcmask 318464  }
 0x331   : > { %v3044_v40 = vrot.slane %v3037_v7, 4  ;;  %v9482_v58 = vrot.slane %v8276_v62, 4  ;;  %v6565_v63 = vcombine.low %v2929_v27, %v2970_v59  ;;  %v6566_v25 = vcombine.high %v2929_v27, %v2970_v59 }
 0x333   : > { %4228 = vmatprep.subr.bf16.mxu0 %v6566_v25  ;;  %v3049_v26 = vsel %vm335_vm0, %v9620_v36, %v3044_v40  ;;  %v3010_v60 = vsel %vm335_vm0, %v3003_v24, %v9482_v58  ;;  %v9625_v24 = vrot.slane %v7963_v14, 4 }
 0x334   : > { %v3078_v47 = vpop.permute.xlu0 %3077  ;;  %4229 = vmatpush1.bf16.msra.mxu0 %v6565_v63  ;;  %v8287_v56 = vpop.permute.xlu1 %3038  ;;  %v3050_v43 = vsel %vm9622_vm12, %v7950_v39, %v3049_v26  ;;  %v3011_v39 = vsel %vm9623_vm11, %v2996_v34, %v3010_v60  ;;  %vm9628_vm12 = vcmask 310272   ;;  %vm9629_vm11 = vmmov %vm9627_vm9 }
 0x335   : > { %v3085_v41 = vrot.slane %v3078_v47, 4  ;;  %v9483_v27 = vrot.slane %v8287_v56, 4  ;;  %v6571_v59 = vcombine.low %v3009_v52, %v3050_v43  ;;  %v6572_v51 = vcombine.high %v3009_v52, %v3050_v43 }
 0x337   : > { %4189 = vmatprep.subr.bf16.mxu1 %v6572_v51  ;;  %v3051_v63 = vsel %vm335_vm0, %v3044_v40, %v9483_v27  ;;  %v3090_v36 = vsel %vm335_vm0, %v9625_v24, %v3085_v41  ;;  %v9626_v40 = vrot.slane %v7972_v11, 4 }
 0x338   : > { %v3119_v25 = vpop.permute.xlu0 %3118  ;;  %4190 = vmatpush1.bf16.msra.mxu1 %v6571_v59  ;;  %v8300_v10 = vpop.permute.xlu1 %3079  ;;  %v3052_v42 = vsel %vm9624_vm10, %v3037_v7, %v3051_v63  ;;  %v3091_v7 = vsel %vm9627_vm9, %v7963_v14, %v3090_v36  ;;  %vm9630_vm10 = vmmov %vm9628_vm12  ;;  %vm9633_vm9 = vcmask 302080  }
 0x339   : > { %v3126_v26 = vrot.slane %v3119_v25, 4  ;;  %v9484_v52 = vrot.slane %v8300_v10, 4  ;;  %v6573_v43 = vcombine.low %v3011_v39, %v3052_v42  ;;  %v6574_v51 = vcombine.high %v3011_v39, %v3052_v42 }
 0x33b   : > { %4230 = vmatprep.subr.bf16.mxu0 %v6574_v51  ;;  %v3131_v59 = vsel %vm335_vm0, %v9626_v40, %v3126_v26  ;;  %v3092_v60 = vsel %vm335_vm0, %v3085_v41, %v9484_v52  ;;  %v9631_v41 = vrot.slane %v7985_v6, 4 }
 0x33c   : > { %v3160_v58 = vpop.permute.xlu0 %3159  ;;  %4231 = vmatpush1.bf16.msra.mxu0 %v6573_v43  ;;  %v8311_v27 = vpop.permute.xlu1 %3120  ;;  %v3132_v34 = vsel %vm9628_vm12, %v7972_v11, %v3131_v59  ;;  %v3093_v11 = vsel %vm9629_vm11, %v3078_v47, %v3092_v60  ;;  %vm9634_vm12 = vcmask 236544   ;;  %vm9635_vm11 = vmmov %vm9633_vm9 }
 0x33d   : > { %v3167_v63 = vrot.slane %v3160_v58, 4  ;;  %v9485_v39 = vrot.slane %v8311_v27, 4  ;;  %v6579_v42 = vcombine.low %v3091_v7, %v3132_v34  ;;  %v6580_v24 = vcombine.high %v3091_v7, %v3132_v34 }
 0x33f   : > { %4191 = vmatprep.subr.bf16.mxu1 %v6580_v24  ;;  %v3133_v43 = vsel %vm335_vm0, %v3126_v26, %v9485_v39  ;;  %v3172_v40 = vsel %vm335_vm0, %v9631_v41, %v3167_v63  ;;  %v9632_v26 = vrot.slane %v7994_v48, 4 }
 0x340   : > { %v3201_v51 = vpop.permute.xlu0 %3200  ;;  %4192 = vmatpush1.bf16.msra.mxu1 %v6579_v42  ;;  %v8324_v14 = vpop.permute.xlu1 %3161  ;;  %v3134_v36 = vsel %vm9630_vm10, %v3119_v25, %v3133_v43  ;;  %v3173_v47 = vsel %vm9633_vm9, %v7985_v6, %v3172_v40  ;;  %vm9636_vm10 = vmmov %vm9634_vm12  ;;  %vm9639_vm9 = vcmask 228352  }
 0x341   : > { %v3208_v59 = vrot.slane %v3201_v51, 4  ;;  %v9486_v7 = vrot.slane %v8324_v14, 4  ;;  %v6581_v34 = vcombine.low %v3093_v11, %v3134_v36  ;;  %v6582_v24 = vcombine.high %v3093_v11, %v3134_v36 }
 0x343   : > { %4232 = vmatprep.subr.bf16.mxu0 %v6582_v24  ;;  %v3213_v42 = vsel %vm335_vm0, %v9632_v26, %v3208_v59  ;;  %v3174_v60 = vsel %vm335_vm0, %v3167_v63, %v9486_v7  ;;  %v9637_v63 = vrot.slane %v8007_v5, 4 }
 0x344   : > { %v3242_v52 = vpop.permute.xlu0 %3241  ;;  %4233 = vmatpush1.bf16.msra.mxu0 %v6581_v34  ;;  %v8335_v39 = vpop.permute.xlu1 %3202  ;;  %v3214_v25 = vsel %vm9634_vm12, %v7994_v48, %v3213_v42  ;;  %v3175_v48 = vsel %vm9635_vm11, %v3160_v58, %v3174_v60  ;;  %vm9640_vm12 = vcmask 220160   ;;  %vm9641_vm11 = vmmov %vm9639_vm9 }
 0x345   : > { %v3249_v43 = vrot.slane %v3242_v52, 4  ;;  %v9487_v11 = vrot.slane %v8335_v39, 4  ;;  %v6587_v36 = vcombine.low %v3173_v47, %v3214_v25  ;;  %v6588_v41 = vcombine.high %v3173_v47, %v3214_v25 }
 0x347   : > { %4193 = vmatprep.subr.bf16.mxu1 %v6588_v41  ;;  %v3215_v34 = vsel %vm335_vm0, %v3208_v59, %v9487_v11  ;;  %v3254_v26 = vsel %vm335_vm0, %v9637_v63, %v3249_v43  ;;  %v9638_v59 = vrot.slane %v8016_v15, 4 }
 0x348   : > { %v3283_v24 = vpop.permute.xlu0 %3282  ;;  %4194 = vmatpush1.bf16.msra.mxu1 %v6587_v36  ;;  %v8348_v6 = vpop.permute.xlu1 %3243  ;;  %v3216_v40 = vsel %vm9636_vm10, %v3201_v51, %v3215_v34  ;;  %v3255_v58 = vsel %vm9639_vm9, %v8007_v5, %v3254_v26  ;;  %vm9642_vm10 = vmmov %vm9640_vm12  ;;  %vm9650_vm9 = vcmask 736256  }
 0x349   : > { %v3290_v42 = vrot.slane %v3283_v24, 4  ;;  %v9488_v47 = vrot.slane %v8348_v6, 4  ;;  %v6589_v25 = vcombine.low %v3175_v48, %v3216_v40  ;;  %v6590_v41 = vcombine.high %v3175_v48, %v3216_v40 }
 0x34b   : > { %4234 = vmatprep.subr.bf16.mxu0 %v6590_v41  ;;  %v3295_v36 = vsel %vm335_vm0, %v9638_v59, %v3290_v42  ;;  %v3256_v60 = vsel %vm335_vm0, %v3249_v43, %v9488_v47  ;;  %v9643_v43 = vrot.slane %v8028_v17, 4 }
 0x34c   : > { %v3324_v7 = vpop.permute.xlu0 %3323  ;;  %4235 = vmatpush1.bf16.msra.mxu0 %v6589_v25  ;;  %v8359_v11 = vpop.permute.xlu1 %3284  ;;  %v3296_v51 = vsel %vm9640_vm12, %v8016_v15, %v3295_v36  ;;  %v3257_v15 = vsel %vm9641_vm11, %v3242_v52, %v3256_v60  ;;  %vm9653_vm12 = vcmask 728064   ;;  %vm9654_vm11 = vcmask 89088  }
 0x34d   : > { %v3331_v34 = vrot.slane %v3324_v7, 4  ;;  %v9489_v48 = vrot.slane %v8359_v11, 4  ;;  %v6595_v40 = vcombine.low %v3255_v58, %v3296_v51  ;;  %v6596_v63 = vcombine.high %v3255_v58, %v3296_v51 }
 0x34f   : > { %4195 = vmatprep.subr.bf16.mxu1 %v6596_v63  ;;  %v3297_v25 = vsel %vm335_vm0, %v3290_v42, %v9489_v48  ;;  %v3336_v59 = vsel %vm335_vm0, %v9643_v43, %v3331_v34  ;;  %v9644_v42 = vrot.slane %v8035_v49, 4 }
 0x350   : > { %v3365_v41 = vpop.permute.xlu0 %3364  ;;  %4196 = vmatpush1.bf16.msra.mxu1 %v6595_v40  ;;  %v8372_v5 = vpop.permute.xlu1 %3325  ;;  %v3298_v26 = vsel %vm9642_vm10, %v3283_v24, %v3297_v25  ;;  %v3337_v52 = vsel %vm1311_vm15, %v8028_v17, %v3336_v59  ;;  %v4983_v59 = vld [vmem:[#allocation2 + $0x24] sm:$0xf]  ;;  %vm9657_vm10 = vcmask 80896  }
 0x351   : > { %v3372_v36 = vrot.slane %v3365_v41, 4  ;;  %v9490_v58 = vrot.slane %v8372_v5, 4  ;;  %v6597_v51 = vcombine.low %v3257_v15, %v3298_v26  ;;  %v6598_v63 = vcombine.high %v3257_v15, %v3298_v26  ;;  %4997 = vrot.lane.b32.xlu0 %v4983_v59, %s9519_s26 }
 0x353   : > { %4236 = vmatprep.subr.bf16.mxu0 %v6598_v63  ;;  %v3377_v40 = vsel %vm335_vm0, %v9644_v42, %v3372_v36  ;;  %v3338_v60 = vsel %vm335_vm0, %v3331_v34, %v9490_v58  ;;  %v9645_v63 = vrot.slane %v8046_v20, 4 }
 0x354   : > { %v3406_v47 = vpop.permute.xlu0 %3405  ;;  %4237 = vmatpush1.bf16.msra.mxu0 %v6597_v51  ;;  %v8383_v48 = vpop.permute.xlu1 %3366  ;;  %v3378_v24 = vsel %vm1353_vm14, %v8035_v49, %v3377_v40  ;;  %v3339_v40 = vsel %vm1311_vm15, %v3324_v7, %v3338_v60 }
 0x355   : > { %v3413_v25 = vrot.slane %v3406_v47, 4  ;;  %v9491_v15 = vrot.slane %v8383_v48, 4  ;;  %v6603_v26 = vcombine.low %v3337_v52, %v3378_v24  ;;  %v6604_v43 = vcombine.high %v3337_v52, %v3378_v24  ;;  %5038 = vrot.lane.b32.xlu0 %v5024_v61, %s9520_s9 }
 0x357   : > { %v3418_v51 = vsel %vm335_vm0, %v9645_v63, %v3413_v25  ;;  %4197 = vmatprep.subr.bf16.mxu1 %v6604_v43  ;;  %v3379_v17 = vsel %vm335_vm0, %v3372_v36, %v9491_v15 }
 0x358   : > { %v2377_v49 = vpop.permute.xlu0 %2376  ;;  %4198 = vmatpush1.bf16.msra.mxu1 %v6603_v26  ;;  %v8399_v42 = vpop.permute.xlu1 %3407  ;;  %v3419_v34 = vsel %vm1395_vm13, %v8046_v20, %v3418_v51  ;;  %v3380_v52 = vsel %vm1353_vm14, %v3365_v41, %v3379_v17 }
 0x359   : > { %v2382_v24 = vrot.slane %v2377_v49, 4  ;;  %v3414_v43 = vrot.slane %v8399_v42, 4  ;;  %v6612_v63 = vcombine.high %v3419_v34, %v3419_v34  ;;  %v6605_v58 = vcombine.low %v3339_v40, %v3380_v52 }
 0x35a   : > { %v6606_v36 = vcombine.high %v3339_v40, %v3380_v52  ;;  %v6611_v15 = vcombine.low %v3419_v34, %v3419_v34  ;;  %v5065_v34 = vld [vmem:[#allocation2 + $0x24] sm:$0xf]  ;;  %v9646_v40 = vrot.slane %v8074_v35, 4 }
 0x35b   : > { %v3420_v26 = vsel %vm335_vm0, %v3413_v25, %v3414_v43  ;;  %6619 = vmatprep.subr.msk.bf16.mxu1 %vm335_vm0, %v6612_v63  ;;  %v2389_v20 = vsel %vm335_vm0, %v2381_v12, %v2382_v24  ;;  %5079 = vrot.lane.b32.xlu0 %v5065_v34, %s9521_s25 }
 0x35c   : > { %4238 = vmatprep.subr.bf16.mxu0 %v6606_v36  ;;  %v2459_v7 = vpop.permute.xlu0 %2458  ;;  %v4115_v41 = vsel %vm335_vm0, %v6611_v15, 0  ;;  %v2418_v60 = vpop.permute.xlu1 %2417  ;;  %v3421_v51 = vsel %vm1395_vm13, %v3406_v47, %v3420_v26  ;;  %v2390_v52 = vsel %vm337_vm1, %v8056_v57, %v2389_v20 }
 0x35d   : > { %v2464_v17 = vrot.slane %v2459_v7, 4  ;;  %4200 = vmatpush1.bf16.msra.mxu1 %v4115_v41  ;;  %4239 = vmatpush1.bf16.msra.mxu0 %v6605_v58  ;;  %v2423_v59 = vrot.slane %v2418_v60, 4  ;;  %v6614_v25 = vcombine.high %v3421_v51, %v3421_v51  ;;  %v6613_v49 = vcombine.low %v3421_v51, %v3421_v51 }
 0x35f   : > { %v2430_v12 = vsel %vm335_vm0, %v9646_v40, %v2423_v59  ;;  %6621 = vmatprep.subr.msk.bf16.mxu0 %vm335_vm0, %v6614_v25  ;;  %v4121_v15 = vsel %vm335_vm0, %v6613_v49, 0  ;;  %v2471_v47 = vsel %vm335_vm0, %v2463_v55, %v2464_v17  ;;  %v5106_v55 = vld [vmem:[#allocation2 + $0x24] sm:$0xf]  ;;  %v9647_v25 = vrot.slane %v8148_v30, 4 }
 0x360   : > { %4206 = vmatmul.mubr.bf16.vlgmr.msra.gmra.mrb[8].mxu1 %v8069_v4  ;;  %v2541_v61 = vpop.permute.xlu0 %2540  ;;  %v2500_v58 = vpop.permute.xlu1 %2499  ;;  %v2431_v24 = vsel %vm379_vm2, %v8074_v35, %v2430_v12  ;;  %v2472_v60 = vsel %vm421_vm3, %v8090_v50, %v2471_v47  ;;  %5120 = vrot.lane.b32.xlu0 %v5106_v55, %s9522_s24 }
 0x361   : > { %v2546_v63 = vrot.slane %v2541_v61, 4  ;;  %4241 = vmatpush1.bf16.msra.mxu0 %v4121_v15  ;;  %v2505_v36 = vrot.slane %v2500_v58, 4  ;;  %v6511_v26 = vcombine.low %v2390_v52, %v2431_v24  ;;  %v6512_v7 = vcombine.high %v2390_v52, %v2431_v24  ;;  %6624 = vmatprep.mubr.msk.bf16.mxu1 %vm2072_vm7, %v7750_v37 }
 0x362   : > { %v9649_v52 = vrot.slane %v8176_v1, 4 }
 0x363   : > { %v2512_v41 = vsel %vm335_vm0, %v2504_v23, %v2505_v36  ;;  %4255 = vmatprep.subr.bf16.mxu1 %v6512_v7  ;;  %v2553_v57 = vsel %vm335_vm0, %v2545_v32, %v2546_v63 }
 0x364   : > { %4247 = vmatmul.mubr.bf16.vlgmr.msra.gmra.mrb[12].mxu0 %v8069_v4  ;;  %v2623_v35 = vpop.permute.xlu0 %2622  ;;  %4256 = vmatpush1.bf16.msra.mxu1 %v6511_v26  ;;  %v2582_v20 = vpop.permute.xlu1 %2581  ;;  %v2513_v37 = vsel %vm463_vm4, %v8105_v33, %v2512_v41  ;;  %v2554_v33 = vsel %vm505_vm5, %v8120_v54, %v2553_v57  ;;  %v9651_v57 = vrot.slane %v8192_v18, 4 }
 0x365   : > { %v2628_v51 = vrot.slane %v2623_v35, 4  ;;  %v2587_v17 = vrot.slane %v2582_v20, 4  ;;  %v6519_v59 = vcombine.low %v2472_v60, %v2513_v37  ;;  %v6520_v23 = vcombine.high %v2472_v60, %v2513_v37 }
 0x366   : > { %v9652_v20 = vrot.slane %v8206_v28, 4 }
 0x367   : > { %v2594_v32 = vsel %vm335_vm0, %v2586_v19, %v2587_v17  ;;  %4257 = vmatprep.subr.bf16.mxu1 %v6520_v23  ;;  %v2635_v49 = vsel %vm335_vm0, %v9647_v25, %v2628_v51  ;;  %v9648_v19 = vrot.slane %v8161_v29, 4  ;;  %v9655_v25 = vrot.slane %v8235_v31, 4 }
 0x368   : > { %v2705_v34 = vpop.permute.xlu0 %2704  ;;  %4258 = vmatpush1.bf16.msra.mxu1 %v6519_v59  ;;  %v2664_v50 = vpop.permute.xlu1 %2663  ;;  %v2595_v40 = vsel %vm547_vm6, %v8133_v22, %v2594_v32  ;;  %v2636_v54 = vsel %vm9500_vm8, %v8148_v30, %v2635_v49 }
 0x369   : > { %v2710_v12 = vrot.slane %v2705_v34, 4  ;;  %v2669_v15 = vrot.slane %v2664_v50, 4  ;;  %v6527_v47 = vcombine.low %v2554_v33, %v2595_v40  ;;  %v6528_v61 = vcombine.high %v2554_v33, %v2595_v40 }
 0x36a   : > { %v9656_v34 = vrot.slane %v8218_v3, 4 }
 0x36b   : > { %v2676_v58 = vsel %vm335_vm0, %v9648_v19, %v2669_v15  ;;  %4259 = vmatprep.subr.bf16.mxu1 %v6528_v61  ;;  %v2717_v24 = vsel %vm335_vm0, %v9649_v52, %v2710_v12  ;;  %v9660_v52 = vrot.slane %v8263_v44, 4 }
 0x36c   : > { %v2787_v63 = vpop.permute.xlu0 %2786  ;;  %4260 = vmatpush1.bf16.msra.mxu1 %v6527_v47  ;;  %v2746_v36 = vpop.permute.xlu1 %2745  ;;  %v2677_v22 = vsel %vm9650_vm9, %v8161_v29, %v2676_v58  ;;  %v2718_v30 = vsel %vm9653_vm12, %v8176_v1, %v2717_v24  ;;  %vm9658_vm9 = vcmask 72704   ;;  %vm9659_vm12 = vcmask 7168   ;;  %v8487_v58 = vld [vmem:[#allocation2 + $0x1c] sm:$0xff] }
 0x36d   : > { %v2792_v26 = vrot.slane %v2787_v63, 4  ;;  %v2751_v7 = vrot.slane %v2746_v36, 4  ;;  %v6535_v55 = vcombine.low %v2636_v54, %v2677_v22  ;;  %v6536_v41 = vcombine.high %v2636_v54, %v2677_v22 }
 0x36e   : > { %v9661_v63 = vrot.slane %v8249_v46, 4 }
 0x36f   : > { %v2758_v35 = vsel %vm335_vm0, %v9651_v57, %v2751_v7  ;;  %4261 = vmatprep.subr.bf16.mxu1 %v6536_v41  ;;  %v2799_v60 = vsel %vm335_vm0, %v9652_v20, %v2792_v26  ;;  %v9664_v41 = vrot.slane %v8287_v56, 4 }
 0x370   : > { %v2869_v37 = vpop.permute.xlu0 %2868  ;;  %4262 = vmatpush1.bf16.msra.mxu1 %v6535_v55  ;;  %v2828_v51 = vpop.permute.xlu1 %2827  ;;  %v2759_v29 = vsel %vm9654_vm11, %v8192_v18, %v2758_v35  ;;  %v2800_v1 = vsel %vm9657_vm10, %v8206_v28, %v2799_v60  ;;  %vm9662_vm11 = vcmask 1039360   ;;  %vm9663_vm10 = vcmask 973824  }
 0x371   : > { %v2874_v17 = vrot.slane %v2869_v37, 4  ;;  %v2833_v59 = vrot.slane %v2828_v51, 4  ;;  %v6543_v23 = vcombine.low %v2718_v30, %v2759_v29  ;;  %v6544_v32 = vcombine.high %v2718_v30, %v2759_v29 }
 0x372   : > { %v9665_v35 = vrot.slane %v8276_v62, 4 }
 0x373   : > { %v2881_v49 = vsel %vm335_vm0, %v9655_v25, %v2874_v17  ;;  %v2840_v50 = vsel %vm335_vm0, %v9656_v34, %v2833_v59  ;;  %4263 = vmatprep.subr.bf16.mxu1 %v6544_v32  ;;  %v9668_v59 = vrot.slane %v8311_v27, 4  ;;  %v9669_v32 = vrot.slane %v8300_v10, 4 }
 0x374   : > { %v2959_v33 = vpop.permute.xlu0 %2958  ;;  %4264 = vmatpush1.bf16.msra.mxu1 %v6543_v23  ;;  %v2918_v40 = vpop.permute.xlu1 %2917  ;;  %v2841_v18 = vsel %vm9658_vm9, %v8218_v3, %v2840_v50  ;;  %v2882_v12 = vsel %vm9659_vm12, %v8235_v31, %v2881_v49  ;;  %vm9666_vm9 = vcmask 965632   ;;  %vm9667_vm12 = vcmask 957440  }
 0x375   : > { %v2964_v15 = vrot.slane %v2959_v33, 4  ;;  %v2923_v47 = vrot.slane %v2918_v40, 4  ;;  %v6551_v61 = vcombine.low %v2800_v1, %v2841_v18  ;;  %v6552_v19 = vcombine.high %v2800_v1, %v2841_v18 }
 0x376   : > { %v6560_v3 = vcombine.high %v2882_v12, %v8487_v58  ;;  %v6559_v55 = vcombine.low %v2882_v12, %v8487_v58  ;;  %v9672_v18 = vrot.slane %v8335_v39, 4 }
 0x377   : > { %v2971_v24 = vsel %vm335_vm0, %v9660_v52, %v2964_v15  ;;  %v2930_v28 = vsel %vm335_vm0, %v9661_v63, %v2923_v47  ;;  %4265 = vmatprep.subr.bf16.mxu1 %v6552_v19  ;;  %v9673_v15 = vrot.slane %v8324_v14, 4 }
 0x378   : > { %v3041_v36 = vpop.permute.xlu0 %3040  ;;  %4266 = vmatpush1.bf16.msra.mxu1 %v6551_v61  ;;  %v3000_v31 = vpop.permute.xlu1 %2999  ;;  %v2931_v54 = vsel %vm9662_vm11, %v8249_v46, %v2930_v28  ;;  %v2972_v22 = vsel %vm9663_vm10, %v8263_v44, %v2971_v24  ;;  %vm9670_vm11 = vcmask 318464   ;;  %vm9671_vm10 = vcmask 310272  }
 0x379   : > { %v3046_v26 = vrot.slane %v3041_v36, 4  ;;  %v3005_v7 = vrot.slane %v3000_v31, 4  ;;  %4267 = vmatprep.subr.bf16.mxu1 %v6560_v3  ;;  %v6568_v60 = vcombine.high %v2931_v54, %v2972_v22  ;;  %v6567_v17 = vcombine.low %v2931_v54, %v2972_v22 }
 0x37a   : > { %v9676_v3 = vrot.slane %v8359_v11, 4  ;;  %v9677_v31 = vrot.slane %v8348_v6, 4 }
 0x37b   : > { %v3053_v57 = vsel %vm335_vm0, %v9664_v41, %v3046_v26  ;;  %v3012_v20 = vsel %vm335_vm0, %v9665_v35, %v3005_v7  ;;  %v9680_v35 = vrot.slane %v8383_v48, 4 }
 0x37c   : > { %v3123_v37 = vpop.permute.xlu0 %3122  ;;  %4268 = vmatpush1.bf16.msra.mxu1 %v6559_v55  ;;  %v3082_v46 = vpop.permute.xlu1 %3081  ;;  %v3013_v44 = vsel %vm9666_vm9, %v8276_v62, %v3012_v20  ;;  %v3054_v51 = vsel %vm9667_vm12, %v8287_v56, %v3053_v57  ;;  %vm9674_vm9 = vcmask 302080   ;;  %vm9675_vm12 = vcmask 236544  }
 0x37d   : > { %v3128_v30 = vrot.slane %v3123_v37, 4  ;;  %v3087_v29 = vrot.slane %v3082_v46, 4  ;;  %4269 = vmatprep.subr.bf16.mxu1 %v6568_v60  ;;  %v6576_v49 = vcombine.high %v3013_v44, %v3054_v51  ;;  %v6575_v1 = vcombine.low %v3013_v44, %v3054_v51 }
 0x37e   : > { %v9681_v60 = vrot.slane %v8372_v5, 4 }
 0x37f   : > { %v3135_v23 = vsel %vm335_vm0, %v9668_v59, %v3128_v30  ;;  %v3094_v25 = vsel %vm335_vm0, %v9669_v32, %v3087_v29 }
 0x380   : > { %v3205_v34 = vpop.permute.xlu0 %3204  ;;  %4270 = vmatpush1.bf16.msra.mxu1 %v6567_v17  ;;  %v3164_v50 = vpop.permute.xlu1 %3163  ;;  %v3095_v62 = vsel %vm9670_vm11, %v8300_v10, %v3094_v25  ;;  %v3136_v56 = vsel %vm9671_vm10, %v8311_v27, %v3135_v23  ;;  %vm9678_vm11 = vcmask 228352   ;;  %vm9679_vm10 = vcmask 220160  }
 0x381   : > { %v3210_v33 = vrot.slane %v3205_v34, 4  ;;  %v3169_v40 = vrot.slane %v3164_v50, 4  ;;  %4271 = vmatprep.subr.bf16.mxu1 %v6576_v49  ;;  %v6584_v61 = vcombine.high %v3095_v62, %v3136_v56  ;;  %v6583_v28 = vcombine.low %v3095_v62, %v3136_v56 }
 0x383   : > { %v3217_v12 = vsel %vm335_vm0, %v9672_v18, %v3210_v33  ;;  %v3176_v47 = vsel %vm335_vm0, %v9673_v15, %v3169_v40 }
 0x384   : > { %v3287_v19 = vpop.permute.xlu0 %3286  ;;  %4272 = vmatpush1.bf16.msra.mxu1 %v6575_v1  ;;  %v3246_v52 = vpop.permute.xlu1 %3245  ;;  %v3177_v10 = vsel %vm9674_vm9, %v8324_v14, %v3176_v47  ;;  %v3218_v27 = vsel %vm9675_vm12, %v8335_v39, %v3217_v12  ;;  %vm9682_vm9 = vcmask 736256  }
 0x385   : > { %v3292_v24 = vrot.slane %v3287_v19, 4  ;;  %v3251_v63 = vrot.slane %v3246_v52, 4  ;;  %4273 = vmatprep.subr.bf16.mxu1 %v6584_v61  ;;  %v6592_v22 = vcombine.high %v3177_v10, %v3218_v27  ;;  %v6591_v57 = vcombine.low %v3177_v10, %v3218_v27  ;;  %vm9683_vm12 = vmmov %vm9682_vm9 }
 0x386   : > { %v3439_v27 = vunpack.c.h.bf16 %v8239_v13 }
 0x387   : > { %v3299_v36 = vsel %vm335_vm0, %v9676_v3, %v3292_v24  ;;  %v3258_v54 = vsel %vm335_vm0, %v9677_v31, %v3251_v63 }
 0x388   : > { %v3369_v26 = vpop.permute.xlu0 %3368  ;;  %4274 = vmatpush1.bf16.msra.mxu1 %v6583_v28  ;;  %v3328_v7 = vpop.permute.xlu1 %3327  ;;  %v3259_v14 = vsel %vm9678_vm11, %v8348_v6, %v3258_v54  ;;  %v3300_v39 = vsel %vm9679_vm10, %v8359_v11, %v3299_v36  ;;  %vm9684_vm11 = vcmask 728064   ;;  %vm9685_vm10 = vcmask 89088  }
 0x389   : > { %v3374_v55 = vrot.slane %v3369_v26, 4  ;;  %v3333_v41 = vrot.slane %v3328_v7, 4  ;;  %4275 = vmatprep.subr.bf16.mxu1 %v6592_v22  ;;  %v6600_v46 = vcombine.high %v3259_v14, %v3300_v39  ;;  %v6599_v30 = vcombine.low %v3259_v14, %v3300_v39 }
 0x38a   : > { %v3440_v22 = vunpack.c.l.bf16 %v8252_v8  ;;  %v3441_v39 = vunpack.c.h.bf16 %v8252_v8 }
 0x38b   : > { %v3381_v20 = vsel %vm335_vm0, %v9680_v35, %v3374_v55  ;;  %v3340_v37 = vsel %vm335_vm0, %v9681_v60, %v3333_v41 }
 0x38c   : > { %4276 = vmatpush1.bf16.msra.mxu1 %v6591_v57  ;;  %v3410_v44 = vpop.permute.xlu1 %3409  ;;  %v3341_v6 = vsel %vm1311_vm15, %v8372_v5, %v3340_v37  ;;  %v3382_v11 = vsel %vm1353_vm14, %v8383_v48, %v3381_v20  ;;  %v3432_v5 = vld [vmem:[#allocation2 + $0x4] sm:$0xff] }
 0x38d   : > { %v3415_v51 = vrot.slane %v3410_v44, 4  ;;  %4277 = vmatprep.subr.bf16.mxu1 %v6600_v46  ;;  %v6608_v17 = vcombine.high %v3341_v6, %v3382_v11  ;;  %v6607_v23 = vcombine.low %v3341_v6, %v3382_v11  ;;  %v3436_v34 = vunpack.c.l.bf16 %v3432_v5 }
 0x38e   : > { %v3437_v62 = vunpack.c.h.bf16 %v3432_v5  ;;  %v3443_v5 = vunpack.c.h.bf16 %v8487_v58 }
 0x38f   : > { %v3422_v29 = vsel %vm335_vm0, %v3414_v43, %v3415_v51 }
 0x390   : > { %4278 = vmatpush1.bf16.msra.mxu1 %v6599_v30  ;;  %v3423_v59 = vsel %vm1395_vm13, %v8399_v42, %v3422_v29 }
 0x391   : > { %4279 = vmatprep.subr.bf16.mxu1 %v6608_v17  ;;  %v6616_v32 = vcombine.high %v3423_v59, %v3423_v59  ;;  %v6615_v25 = vcombine.low %v3423_v59, %v3423_v59 }
 0x393   : > { %v4127_v48 = vsel %vm335_vm0, %v6615_v25, 0 }
 0x394   : > { %4280 = vmatpush1.bf16.msra.mxu1 %v6607_v23 }
 0x395   : > { %6623 = vmatprep.subr.msk.bf16.mxu1 %vm335_vm0, %v6616_v32  ;;  %v3442_v32 = vunpack.c.l.bf16 %v8487_v58 }
 0x398   : > { %4282 = vmatpush1.bf16.msra.mxu1 %v4127_v48 }
 0x399   : > { %v8559_v49 = vpop.permute.xlu0 %3556 }
 0x39b   : > { %4288 = vmatmul.mubr.bf16.vlgmr.msra.gmra.mrb[12].mxu1 %v8069_v4 }
 0x39d   : > { %v8626_v51 = vpop.permute.xlu0 %4915 }
 0x3a1   : > { %v8630_v30 = vpop.permute.xlu0 %4956 }
 0x3ce   : > { %v4166_v43 = vpop.f32.mrb[8].mxu0 }
 0x3cf   : > { %v4167_v50 = vadd.f32 %v4166_v43, %v8559_v49  ;;  %v4168_v42 = vpop.f32.mrb[9].mxu0 }
 0x3d0   : > { %v4169_v56 = vadd.f32 %v4168_v42, %v8559_v49  ;;  %v4170_v33 = vpop.f32.mrb[10].mxu0 }
 0x3d1   : > { %v4296_v40 = vadd.f32 %v4167_v50, %v3436_v34  ;;  %v4171_v1 = vpop.f32.mrb[11].mxu0 }
 0x3d2   : > { %v4297_v18 = vadd.f32 %v4169_v56, %v3437_v62 }
 0x3d3   : > { %v4304_v12 = vmax.f32 %v4296_v40, 0.0 }
 0x3d4   : > { %v4305_v15 = vmax.f32 %v4297_v18, 0.0 }
 0x3d5   : > { %v4312_v47 = vmul.f32 %v4304_v12, %v7613_v45 }
 0x3d6   : > { %v4313_v4 = vmul.f32 %v4305_v15, %v7621_v16  ;;  %v3438_v16 = vunpack.c.l.bf16 %v8239_v13 }
 0x3d8   : > { %v8565_v61 = vpack.c.bf16 %v4313_v4, %v4312_v47 }
 0x3da   : > { %4352 = vst [vmem:[#allocation2 + $0x4] sm:$0xff] %v8565_v61 }
 0x3e1   : > { %v4397_v19 = vld [vmem:[#allocation2] sm:$0xff] }
 0x3e2   : > { %4407 = vrot.lane.b32.xlu0 %v4397_v19, %s9576_s11  ;;  %4366 = vrot.lane.b32.xlu1 %v4397_v19, %s9574_s29 }
 0x3e6   : > { %4489 = vrot.lane.b32.xlu0 %v4397_v19, %s9578_s2  ;;  %4448 = vrot.lane.b32.xlu1 %v4397_v19, %s9577_s1 }
 0x3ea   : > { %4571 = vrot.lane.b32.xlu0 %v4397_v19, %s9580_s4  ;;  %4530 = vrot.lane.b32.xlu1 %v4397_v19, %s9579_s3 }
 0x3ee   : > { %4653 = vrot.lane.b32.xlu0 %v4397_v19, %s9564_s30  ;;  %4612 = vrot.lane.b32.xlu1 %v4397_v19, %s9581_s27 }
 0x3f2   : > { %4735 = vrot.lane.b32.xlu0 %v4397_v19, %s9566_s18  ;;  %4694 = vrot.lane.b32.xlu1 %v4397_v19, %s9565_s10 }
 0x3f6   : > { %4817 = vrot.lane.b32.xlu0 %v4397_v19, %s9568_s14  ;;  %4776 = vrot.lane.b32.xlu1 %v4397_v19, %s9567_s13 }
 0x3fa   : > { %4907 = vrot.lane.b32.xlu0 %v8565_v61, %s9570_s16  ;;  %4858 = vrot.lane.b32.xlu1 %v4397_v19, %s9569_s15 }
 0x3fe   : > { %4989 = vrot.lane.b32.xlu0 %v8565_v61, %s9519_s26  ;;  %4948 = vrot.lane.b32.xlu1 %v8565_v61, %s9571_s17 }
 0x402   : > { %5071 = vrot.lane.b32.xlu0 %v8565_v61, %s9521_s25  ;;  %5030 = vrot.lane.b32.xlu1 %v8565_v61, %s9520_s9 }
 0x406   : > { %5153 = vrot.lane.b32.xlu0 %v8565_v61, %s9523_s23  ;;  %5112 = vrot.lane.b32.xlu1 %v8565_v61, %s9522_s24 }
 0x40a   : > { %5235 = vrot.lane.b32.xlu0 %v8565_v61, %s9525_s21  ;;  %5194 = vrot.lane.b32.xlu1 %v8565_v61, %s9524_s22 }
 0x40e   : > { %5317 = vrot.lane.b32.xlu0 %v8565_v61, %s9527_s19  ;;  %5276 = vrot.lane.b32.xlu1 %v8565_v61, %s9526_s20 }
 0x412   : > { %5399 = vrot.lane.b32.xlu0 %v8565_v61, %s9575_s0  ;;  %5358 = vrot.lane.b32.xlu1 %v8565_v61, %s9572_s12 }
 0x433   : > { %v4207_v45 = vpop.f32.mrb[8].mxu1 }
 0x434   : > { %v4208_v52 = vadd.f32 %v4207_v45, %v8559_v49  ;;  %v4209_v10 = vpop.f32.mrb[9].mxu1 }
 0x435   : > { %v4210_v24 = vadd.f32 %v4209_v10, %v8559_v49  ;;  %v4211_v63 = vpop.f32.mrb[10].mxu1 }
 0x436   : > { %v4298_v28 = vadd.f32 %v4208_v52, %v3438_v16  ;;  %v4212_v3 = vpop.f32.mrb[11].mxu1 }
 0x437   : > { %v4299_v36 = vadd.f32 %v4210_v24, %v3439_v27  ;;  %v4248_v31 = vpop.f32.mrb[12].mxu0 }
 0x438   : > { %v4306_v54 = vmax.f32 %v4298_v28, 0.0  ;;  %v4249_v26 = vadd.f32 %v4248_v31, %v8559_v49  ;;  %v4250_v7 = vpop.f32.mrb[13].mxu0 }
 0x439   : > { %v4307_v14 = vmax.f32 %v4299_v36, 0.0  ;;  %v4251_v55 = vadd.f32 %v4250_v7, %v8559_v49  ;;  %v4252_v41 = vpop.f32.mrb[14].mxu0  ;;  %v8774_v7 = vld.sshfl [vmem:[%s9374_s6] sm:$0x33 pattern:$0x76325410] }
 0x43a   : > { %v4314_v13 = vmul.f32 %v4306_v54, %v7617_v21  ;;  %v4300_v57 = vadd.f32 %v4249_v26, %v3440_v22  ;;  %v4253_v35 = vpop.f32.mrb[15].mxu0 }
 0x43b   : > { %v4315_v20 = vmul.f32 %v4307_v14, %v7625_v38  ;;  %v4301_v60 = vadd.f32 %v4251_v55, %v3441_v39  ;;  %v8780_v55 = vcombine.high %v8774_v7, %v8774_v7 }
 0x43c   : > { %v4308_v37 = vmax.f32 %v4300_v57, 0.0 }
 0x43d   : > { %v8617_v46 = vpack.c.bf16 %v4315_v20, %v4314_v13  ;;  %v4309_v44 = vmax.f32 %v4301_v60, 0.0  ;;  %6743 = vmatprep.mubr.msk.bf16.mxu0 %vm2072_vm7, %v8780_v55  ;;  %6745 = vmatprep.mubr.msk.bf16.mxu1 %vm2072_vm7, %v8780_v55 }
 0x43e   : > { %v4316_v6 = vmul.f32 %v4308_v37, %v7704_v9  ;;  %v8636_v9 = vpop.permute.xlu0 %4997 }
 0x43f   : > { %4353 = vst [vmem:[#allocation2 + $0xc] sm:$0xff] %v8617_v46  ;;  %v4317_v8 = vmul.f32 %v4309_v44, %v7712_v2 }
 0x441   : > { %v8622_v11 = vpack.c.bf16 %v4317_v8, %v4316_v6 }
 0x442   : > { %v8640_v2 = vpop.permute.xlu0 %5038 }
 0x443   : > { %4354 = vst [vmem:[#allocation2 + $0x14] sm:$0xff] %v8622_v11 }
 0x446   : > { %v4357_v21 = vld [vmem:[#allocation2 + $0x8] sm:$0xff]  ;;  %v8646_v29 = vpop.permute.xlu0 %5079 }
 0x447   : > { %4368 = vrot.lane.b32.xlu0 %v4357_v21, %s9574_s29 }
 0x44a   : > { %v4399_v38 = vld [vmem:[#allocation2 + $0x10] sm:$0xff]  ;;  %v8650_v17 = vpop.permute.xlu0 %5120 }
 0x44b   : > { %4411 = vrot.lane.b32.xlu0 %v4399_v38, %s9576_s11  ;;  %4370 = vrot.lane.b32.xlu1 %v4399_v38, %s9574_s29 }
 0x44f   : > { %4450 = vrot.lane.b32.xlu0 %v4357_v21, %s9577_s1  ;;  %4409 = vrot.lane.b32.xlu1 %v4357_v21, %s9576_s11 }
 0x453   : > { %4493 = vrot.lane.b32.xlu0 %v4399_v38, %s9578_s2  ;;  %4452 = vrot.lane.b32.xlu1 %v4399_v38, %s9577_s1 }
 0x454   : > { %v8656_v59 = vpop.permute.xlu0 %4407  ;;  %v8664_v34 = vpop.permute.xlu1 %4366 }
 0x457   : > { %4532 = vrot.lane.b32.xlu0 %v4357_v21, %s9579_s3  ;;  %4491 = vrot.lane.b32.xlu1 %v4357_v21, %s9578_s2 }
 0x458   : > { %v8666_v33 = vpop.permute.xlu0 %4489  ;;  %v8672_v12 = vpop.permute.xlu1 %4448 }
 0x45b   : > { %4575 = vrot.lane.b32.xlu0 %v4399_v38, %s9580_s4  ;;  %4534 = vrot.lane.b32.xlu1 %v4399_v38, %s9579_s3 }
 0x45c   : > { %v8678_v15 = vpop.permute.xlu0 %4571 }
 0x45f   : > { %4614 = vrot.lane.b32.xlu0 %v4357_v21, %s9581_s27  ;;  %4573 = vrot.lane.b32.xlu1 %v4357_v21, %s9580_s4 }
 0x463   : > { %4657 = vrot.lane.b32.xlu0 %v4399_v38, %s9564_s30  ;;  %4616 = vrot.lane.b32.xlu1 %v4399_v38, %s9581_s27 }
 0x467   : > { %4696 = vrot.lane.b32.xlu0 %v4357_v21, %s9565_s10  ;;  %4655 = vrot.lane.b32.xlu1 %v4357_v21, %s9564_s30 }
 0x46b   : > { %4739 = vrot.lane.b32.xlu0 %v4399_v38, %s9566_s18  ;;  %4698 = vrot.lane.b32.xlu1 %v4399_v38, %s9565_s10 }
 0x46e   : > { %v4289_v23 = vpop.f32.mrb[12].mxu1 }
 0x46f   : > { %4778 = vrot.lane.b32.xlu0 %v4357_v21, %s9567_s13  ;;  %4737 = vrot.lane.b32.xlu1 %v4357_v21, %s9566_s18  ;;  %v4290_v25 = vadd.f32 %v4289_v23, %v8559_v49  ;;  %v4291_v48 = vpop.f32.mrb[13].mxu1 }
 0x470   : > { %v4292_v43 = vadd.f32 %v4291_v48, %v8559_v49  ;;  %v4293_v42 = vpop.f32.mrb[14].mxu1 }
 0x471   : > { %v4302_v50 = vadd.f32 %v4290_v25, %v3442_v32  ;;  %v4294_v56 = vpop.f32.mrb[15].mxu1 }
 0x472   : > { %v4303_v62 = vadd.f32 %v4292_v43, %v3443_v5 }
 0x473   : > { %v4310_v40 = vmax.f32 %v4302_v50, 0.0  ;;  %4821 = vrot.lane.b32.xlu0 %v4399_v38, %s9568_s14  ;;  %4780 = vrot.lane.b32.xlu1 %v4399_v38, %s9567_s13 }
 0x474   : > { %v4311_v1 = vmax.f32 %v4303_v62, 0.0 }
 0x475   : > { %v4318_v18 = vmul.f32 %v4310_v40, %v7709_v0  ;;  %v8684_v0 = vpop.permute.xlu1 %4530 }
 0x476   : > { %v4319_v58 = vmul.f32 %v4311_v1, %v7717_v53  ;;  %v8686_v53 = vpop.permute.xlu0 %4653 }
 0x477   : > { %4860 = vrot.lane.b32.xlu0 %v4357_v21, %s9569_s15  ;;  %4819 = vrot.lane.b32.xlu1 %v4357_v21, %s9568_s14  ;;  %v4376_v21 = vrot.slane %v8664_v34, 4 }
 0x478   : > { %v8676_v49 = vpack.c.bf16 %v4319_v58, %v4318_v18 }
 0x479   : > { %v8692_v47 = vpop.permute.xlu1 %4612 }
 0x47a   : > { %4355 = vst [vmem:[#allocation2 + $0x1c] sm:$0xff] %v8676_v49  ;;  %v8698_v4 = vpop.permute.xlu0 %4735 }
 0x47b   : > { %4911 = vrot.lane.b32.xlu0 %v8622_v11, %s9570_s16  ;;  %4862 = vrot.lane.b32.xlu1 %v4399_v38, %s9569_s15  ;;  %v4417_v38 = vrot.slane %v8656_v59, 4 }
 0x47d   : > { %v8704_v19 = vpop.permute.xlu1 %4694 }
 0x47e   : > { %v8706_v45 = vpop.permute.xlu0 %4817 }
 0x47f   : > { %4950 = vrot.lane.b32.xlu0 %v8617_v46, %s9571_s17  ;;  %4909 = vrot.lane.b32.xlu1 %v8617_v46, %s9570_s16 }
 0x481   : > { %v8712_v16 = vpop.permute.xlu1 %4776  ;;  %v4360_v22 = vld [vmem:[#allocation2 + $0x20] sm:$0xf]  ;;  %v8776_v39 = vld [vmem:[#allocation2 + $0x18] sm:$0xff] }
 0x482   : > { %v8718_v52 = vpop.permute.xlu0 %4907  ;;  %v4401_v14 = vld [vmem:[#allocation2 + $0x20] sm:$0xf] }
 0x483   : > { %4993 = vrot.lane.b32.xlu0 %v8622_v11, %s9519_s26  ;;  %4952 = vrot.lane.b32.xlu1 %v8622_v11, %s9571_s17  ;;  %v4442_v57 = vld [vmem:[#allocation2 + $0x20] sm:$0xf] }
 0x484   : > { %v4483_v60 = vld [vmem:[#allocation2 + $0x20] sm:$0xf] }
 0x485   : > { %v8724_v10 = vpop.permute.xlu1 %4858  ;;  %v4565_v50 = vld [vmem:[#allocation2 + $0x20] sm:$0xf] }
 0x486   : > { %v8726_v27 = vpop.permute.xlu0 %4989 }
 0x487   : > { %5032 = vrot.lane.b32.xlu0 %v8617_v46, %s9520_s9  ;;  %4991 = vrot.lane.b32.xlu1 %v8617_v46, %s9519_s26 }
 0x489   : > { %v8732_v24 = vpop.permute.xlu1 %4948 }
 0x48a   : > { %v8738_v63 = vpop.permute.xlu0 %5071 }
 0x48b   : > { %5075 = vrot.lane.b32.xlu0 %v8622_v11, %s9521_s25  ;;  %5034 = vrot.lane.b32.xlu1 %v8622_v11, %s9520_s9 }
 0x48d   : > { %v8744_v28 = vpop.permute.xlu1 %5030 }
 0x48e   : > { %v8746_v3 = vpop.permute.xlu0 %5153 }
 0x48f   : > { %5114 = vrot.lane.b32.xlu0 %v8617_v46, %s9522_s24  ;;  %5073 = vrot.lane.b32.xlu1 %v8617_v46, %s9521_s25 }
 0x491   : > { %v8752_v36 = vpop.permute.xlu1 %5112 }
 0x492   : > { %v8758_v31 = vpop.permute.xlu0 %5235 }
 0x493   : > { %5157 = vrot.lane.b32.xlu0 %v8622_v11, %s9523_s23  ;;  %5116 = vrot.lane.b32.xlu1 %v8622_v11, %s9522_s24 }
 0x495   : > { %v8764_v54 = vpop.permute.xlu1 %5194 }
 0x496   : > { %v8766_v26 = vpop.permute.xlu0 %5317 }
 0x497   : > { %5196 = vrot.lane.b32.xlu0 %v8617_v46, %s9524_s22  ;;  %5155 = vrot.lane.b32.xlu1 %v8617_v46, %s9523_s23 }
 0x499   : > { %v8782_v41 = vpop.permute.xlu1 %5276 }
 0x49a   : > { %v8791_v13 = vpop.permute.xlu0 %5399 }
 0x49b   : > { %5239 = vrot.lane.b32.xlu0 %v8622_v11, %s9525_s21  ;;  %5198 = vrot.lane.b32.xlu1 %v8622_v11, %s9524_s22 }
 0x49d   : > { %v8796_v35 = vpop.permute.xlu1 %5358 }
 0x49f   : > { %5278 = vrot.lane.b32.xlu0 %v8617_v46, %s9526_s20  ;;  %5237 = vrot.lane.b32.xlu1 %v8617_v46, %s9525_s21 }
 0x4a3   : > { %5321 = vrot.lane.b32.xlu0 %v8622_v11, %s9527_s19  ;;  %5280 = vrot.lane.b32.xlu1 %v8622_v11, %s9526_s20 }
 0x4a7   : > { %5360 = vrot.lane.b32.xlu0 %v8617_v46, %s9572_s12  ;;  %5319 = vrot.lane.b32.xlu1 %v8617_v46, %s9527_s19 }
 0x4ab   : > { %5403 = vrot.lane.b32.xlu0 %v8622_v11, %s9575_s0  ;;  %5362 = vrot.lane.b32.xlu1 %v8622_v11, %s9572_s12  ;;  %v4524_v11 = vld [vmem:[#allocation2 + $0x20] sm:$0xf] }
 0x4af   : > { %5401 = vrot.lane.b32.xlu1 %v8617_v46, %s9575_s0  ;;  %4374 = vrot.lane.b32.xlu0 %v4360_v22, %s9574_s29 }
 0x4b3   : > { %4415 = vrot.lane.b32.xlu0 %v4401_v14, %s9576_s11  ;;  %4372 = vrot.lane.b32.xlu1 %v8776_v39, %s9574_s29 }
 0x4b7   : > { %4456 = vrot.lane.b32.xlu0 %v4442_v57, %s9577_s1  ;;  %4413 = vrot.lane.b32.xlu1 %v8776_v39, %s9576_s11 }
 0x4b9   : > { %v4369_v20 = vpop.permute.xlu0 %4368 }
 0x4ba   : > { %v4377_v6 = vrot.slane %v4369_v20, 4 }
 0x4bb   : > { %4497 = vrot.lane.b32.xlu0 %v4483_v60, %s9578_s2  ;;  %4454 = vrot.lane.b32.xlu1 %v8776_v39, %s9577_s1 }
 0x4bc   : > { %v4381_v25 = vsel %vm335_vm0, %v4376_v21, %v4377_v6 }
 0x4bd   : > { %v8801_v37 = vpop.permute.xlu0 %4411  ;;  %v8803_v44 = vpop.permute.xlu1 %4370  ;;  %v4382_v58 = vsel %vm337_vm1, %v8664_v34, %v4381_v25  ;;  %v4499_v34 = vrot.slane %v8666_v33, 4 }
 0x4be   : > { %v4378_v8 = vrot.slane %v8803_v44, 4  ;;  %v4419_v48 = vrot.slane %v8801_v37, 4 }
 0x4bf   : > { %4538 = vrot.lane.b32.xlu0 %v4524_v11, %s9579_s3  ;;  %4495 = vrot.lane.b32.xlu1 %v8776_v39, %s9578_s2 }
 0x4c0   : > { %v4383_v5 = vsel %vm335_vm0, %v4377_v6, %v4378_v8  ;;  %v4606_v6 = vld [vmem:[#allocation2 + $0x20] sm:$0xf] }
 0x4c1   : > { %v4451_v23 = vpop.permute.xlu0 %4450  ;;  %v4410_v32 = vpop.permute.xlu1 %4409  ;;  %v4384_v56 = vsel %vm337_vm1, %v4369_v20, %v4383_v5 }
 0x4c2   : > { %v4418_v43 = vrot.slane %v4410_v32, 4  ;;  %v4459_v14 = vrot.slane %v4451_v23, 4 }
 0x4c3   : > { %4579 = vrot.lane.b32.xlu0 %v4565_v50, %s9580_s4  ;;  %4536 = vrot.lane.b32.xlu1 %v8776_v39, %s9579_s3  ;;  %s9762_s3 = sld [smem:[#allocation5_spill]] }
 0x4c4   : > { %v4424_v42 = vsel %vm335_vm0, %v4418_v43, %v4419_v48  ;;  %v4422_v62 = vsel %vm335_vm0, %v4417_v38, %v4418_v43  ;;  %v4458_v38 = vrot.slane %v8672_v12, 4 }
 0x4c5   : > { %v4425_v40 = vsel %vm379_vm2, %v4410_v32, %v4424_v42  ;;  %v8825_v1 = vpop.permute.xlu0 %4493  ;;  %v8827_v18 = vpop.permute.xlu1 %4452  ;;  %v4423_v22 = vsel %vm379_vm2, %v8656_v59, %v4422_v62  ;;  %v4647_v42 = vld [vmem:[#allocation2 + $0x20] sm:$0xf] }
 0x4c6   : > { %v6632_v57 = vcombine.low %v4384_v56, %v4425_v40  ;;  %v4460_v60 = vrot.slane %v8827_v18, 4  ;;  %v6630_v11 = vcombine.low %v4382_v58, %v4423_v22  ;;  %v6631_v20 = vcombine.high %v4382_v58, %v4423_v22 }
 0x4c7   : > { %4620 = vrot.lane.b32.xlu0 %v4606_v6, %s9581_s27  ;;  %4577 = vrot.lane.b32.xlu1 %v8776_v39, %s9580_s4  ;;  %v6633_v21 = vcombine.high %v4384_v56, %v4425_v40  ;;  %v4463_v25 = vsel %vm335_vm0, %v4458_v38, %v4459_v14  ;;  %v4501_v5 = vrot.slane %v8825_v1, 4 }
 0x4c8   : > { %6122 = vmatprep.subr.bf16.mxu0 %v6631_v20  ;;  %v4465_v43 = vsel %vm335_vm0, %v4459_v14, %v4460_v60 }
 0x4c9   : > { %6163 = vmatprep.subr.bf16.mxu1 %v6633_v21  ;;  %v4533_v59 = vpop.permute.xlu0 %4532  ;;  %v4492_v32 = vpop.permute.xlu1 %4491  ;;  %6123 = vmatpush1.bf16.msra.mxu0 %v6630_v11  ;;  %v4466_v40 = vsel %vm421_vm3, %v4451_v23, %v4465_v43  ;;  %v4688_v21 = vld [vmem:[#allocation2 + $0x20] sm:$0xf]  ;;  %v4540_v43 = vrot.slane %v8684_v0, 4 }
 0x4ca   : > { %6164 = vmatpush1.bf16.msra.mxu1 %v6632_v57  ;;  %v4500_v50 = vrot.slane %v4492_v32, 4  ;;  %v4464_v57 = vsel %vm421_vm3, %v8672_v12, %v4463_v25 }
 0x4cb   : > { %4661 = vrot.lane.b32.xlu0 %v4647_v42, %s9564_s30  ;;  %4618 = vrot.lane.b32.xlu1 %v8776_v39, %s9581_s27 }
 0x4cc   : > { %v4506_v62 = vsel %vm335_vm0, %v4500_v50, %v4501_v5  ;;  %v4504_v56 = vsel %vm335_vm0, %v4499_v34, %v4500_v50  ;;  %v4541_v34 = vrot.slane %v4533_v59, 4 }
 0x4cd   : > { %v4507_v58 = vsel %vm463_vm4, %v4492_v32, %v4506_v62  ;;  %v8853_v22 = vpop.permute.xlu0 %4575  ;;  %v8855_v14 = vpop.permute.xlu1 %4534  ;;  %v4505_v6 = vsel %vm463_vm4, %v8666_v33, %v4504_v56  ;;  %v4581_v33 = vrot.slane %v8678_v15, 4  ;;  %v4729_v56 = vld [vmem:[#allocation2 + $0x20] sm:$0xf] }
 0x4ce   : > { %v6640_v11 = vcombine.low %v4466_v40, %v4507_v58  ;;  %v9499_v20 = vrot.slane %v8855_v14, 4  ;;  %v6638_v38 = vcombine.low %v4464_v57, %v4505_v6  ;;  %v6639_v23 = vcombine.high %v4464_v57, %v4505_v6 }
 0x4cf   : > { %4702 = vrot.lane.b32.xlu0 %v4688_v21, %s9565_s10  ;;  %4659 = vrot.lane.b32.xlu1 %v8776_v39, %s9564_s30  ;;  %v6641_v32 = vcombine.high %v4466_v40, %v4507_v58  ;;  %v9494_v50 = vrot.slane %v8853_v22, 4  ;;  %v4545_v40 = vsel %vm335_vm0, %v4540_v43, %v4541_v34 }
 0x4d0   : > { %6124 = vmatprep.subr.bf16.mxu0 %v6639_v23  ;;  %v4547_v42 = vsel %vm335_vm0, %v4541_v34, %v9499_v20 }
 0x4d1   : > { %6165 = vmatprep.subr.bf16.mxu1 %v6641_v32  ;;  %v4615_v12 = vpop.permute.xlu0 %4614  ;;  %v4574_v25 = vpop.permute.xlu1 %4573  ;;  %6125 = vmatpush1.bf16.msra.mxu0 %v6638_v38  ;;  %v4548_v6 = vsel %vm505_vm5, %v4533_v59, %v4547_v42  ;;  %v4622_v42 = vrot.slane %v8692_v47, 4 }
 0x4d2   : > { %6166 = vmatpush1.bf16.msra.mxu1 %v6640_v11  ;;  %v4582_v62 = vrot.slane %v4574_v25, 4 }
 0x4d3   : > { %4743 = vrot.lane.b32.xlu0 %v4729_v56, %s9566_s18  ;;  %4700 = vrot.lane.b32.xlu1 %v8776_v39, %s9565_s10  ;;  %v4546_v56 = vsel %vm505_vm5, %v8684_v0, %v4545_v40 }
 0x4d4   : > { %v4586_v58 = vsel %vm335_vm0, %v4581_v33, %v4582_v62  ;;  %v4588_v57 = vsel %vm335_vm0, %v4582_v62, %v9494_v50  ;;  %v4770_v33 = vld [vmem:[#allocation2 + $0x20] sm:$0xf]  ;;  %v4623_v62 = vrot.slane %v4615_v12, 4 }
 0x4d5   : > { %v4589_v11 = vsel %vm547_vm6, %v4574_v25, %v4588_v57  ;;  %v8881_v21 = vpop.permute.xlu0 %4657  ;;  %v8883_v38 = vpop.permute.xlu1 %4616  ;;  %v4587_v34 = vsel %vm547_vm6, %v8678_v15, %v4586_v58  ;;  %v4663_v57 = vrot.slane %v8686_v53, 4 }
 0x4d6   : > { %v6648_v23 = vcombine.low %v4548_v6, %v4589_v11  ;;  %v6649_v32 = vcombine.high %v4548_v6, %v4589_v11  ;;  %v9493_v43 = vrot.slane %v8883_v38, 4  ;;  %v6646_v59 = vcombine.low %v4546_v56, %v4587_v34  ;;  %v4811_v11 = vld [vmem:[#allocation2 + $0x20] sm:$0xf] }
 0x4d7   : > { %4784 = vrot.lane.b32.xlu0 %v4770_v33, %s9567_s13  ;;  %4741 = vrot.lane.b32.xlu1 %v8776_v39, %s9566_s18  ;;  %v6647_v25 = vcombine.high %v4546_v56, %v4587_v34  ;;  %v9498_v6 = vrot.slane %v8881_v21, 4  ;;  %v4627_v34 = vsel %vm335_vm0, %v4622_v42, %v4623_v62 }
 0x4d8   : > { %6167 = vmatprep.subr.bf16.mxu1 %v6649_v32  ;;  %v4629_v0 = vsel %vm335_vm0, %v4623_v62, %v9493_v43  ;;  %v4628_v50 = vsel %vm9500_vm8, %v8692_v47, %v4627_v34 }
 0x4d9   : > { %6126 = vmatprep.subr.bf16.mxu0 %v6647_v25  ;;  %v4697_v15 = vpop.permute.xlu0 %4696  ;;  %6168 = vmatpush1.bf16.msra.mxu1 %v6648_v23  ;;  %v4656_v58 = vpop.permute.xlu1 %4655  ;;  %v4630_v33 = vsel %vm9500_vm8, %v4615_v12, %v4629_v0  ;;  %v5147_v0 = vld [vmem:[#allocation2 + $0x24] sm:$0xf]  ;;  %vm9692_vm8 = vcmask 7168  }
 0x4da   : > { %6127 = vmatpush1.bf16.msra.mxu0 %v6646_v59  ;;  %v4664_v40 = vrot.slane %v4656_v58, 4 }
 0x4db   : > { %4825 = vrot.lane.b32.xlu0 %v4811_v11, %s9568_s14  ;;  %4782 = vrot.lane.b32.xlu1 %v8776_v39, %s9567_s13 }
 0x4dc   : > { %v4668_v23 = vsel %vm335_vm0, %v4663_v57, %v4664_v40  ;;  %v4670_v32 = vsel %vm335_vm0, %v4664_v40, %v9498_v6  ;;  %v4852_v57 = vld [vmem:[#allocation2 + $0x20] sm:$0xf]  ;;  %v4705_v40 = vrot.slane %v4697_v15, 4 }
 0x4dd   : > { %v4671_v56 = vsel %vm9682_vm9, %v4656_v58, %v4670_v32  ;;  %v8909_v59 = vpop.permute.xlu0 %4739  ;;  %v8911_v25 = vpop.permute.xlu1 %4698  ;;  %v4669_v62 = vsel %vm9683_vm12, %v8686_v53, %v4668_v23  ;;  %v4704_v53 = vrot.slane %v8704_v19, 4  ;;  %vm9686_vm9 = vmmov %vm9685_vm10 }
 0x4de   : > { %v6656_v42 = vcombine.low %v4630_v33, %v4671_v56  ;;  %v6657_v11 = vcombine.high %v4630_v33, %v4671_v56  ;;  %v9495_v43 = vrot.slane %v8911_v25, 4  ;;  %v6654_v12 = vcombine.low %v4628_v50, %v4669_v62  ;;  %vm9687_vm12 = vmmov %vm9684_vm11 }
 0x4df   : > { %4866 = vrot.lane.b32.xlu0 %v4852_v57, %s9569_s15  ;;  %4823 = vrot.lane.b32.xlu1 %v8776_v39, %s9568_s14  ;;  %v6655_v58 = vcombine.high %v4628_v50, %v4669_v62  ;;  %v4745_v33 = vrot.slane %v8698_v4, 4  ;;  %v9496_v47 = vrot.slane %v8909_v59, 4  ;;  %v4709_v50 = vsel %vm335_vm0, %v4704_v53, %v4705_v40 }
 0x4e0   : > { %6169 = vmatprep.subr.bf16.mxu1 %v6657_v11  ;;  %v4711_v34 = vsel %vm335_vm0, %v4705_v40, %v9495_v43  ;;  %v5188_v11 = vld [vmem:[#allocation2 + $0x24] sm:$0xf] }
 0x4e1   : > { %6128 = vmatprep.subr.bf16.mxu0 %v6655_v58  ;;  %v4779_v23 = vpop.permute.xlu0 %4778  ;;  %6170 = vmatpush1.bf16.msra.mxu1 %v6656_v42  ;;  %v4738_v32 = vpop.permute.xlu1 %4737 }
 0x4e2   : > { %6129 = vmatpush1.bf16.msra.mxu0 %v6654_v12  ;;  %v4746_v56 = vrot.slane %v4738_v32, 4  ;;  %v4787_v57 = vrot.slane %v4779_v23, 4  ;;  %v4712_v12 = vsel %vm9684_vm11, %v4697_v15, %v4711_v34  ;;  %v5229_v34 = vld [vmem:[#allocation2 + $0x24] sm:$0xf]  ;;  %vm9688_vm11 = vcmask 80896  }
 0x4e3   : > { %4864 = vrot.lane.b32.xlu1 %v8776_v39, %s9569_s15  ;;  %5161 = vrot.lane.b32.xlu0 %v5147_v0, %s9523_s23  ;;  %s9763_s15 = sld [smem:[#allocation11_spill]] }
 0x4e4   : > { %v4750_v62 = vsel %vm335_vm0, %v4745_v33, %v4746_v56  ;;  %v4752_v42 = vsel %vm335_vm0, %v4746_v56, %v9496_v47  ;;  %v4710_v56 = vsel %vm9687_vm12, %v8704_v19, %v4709_v50  ;;  %v4786_v47 = vrot.slane %v8712_v16, 4 }
 0x4e5   : > { %v4753_v58 = vsel %vm9685_vm10, %v4738_v32, %v4752_v42  ;;  %v8937_v43 = vpop.permute.xlu0 %4821  ;;  %v8939_v40 = vpop.permute.xlu1 %4780  ;;  %v4751_v39 = vsel %vm9686_vm9, %v8698_v4, %v4750_v62  ;;  %v4827_v4 = vrot.slane %v8706_v45, 4  ;;  %v4868_v62 = vrot.slane %v8724_v10, 4  ;;  %vm9690_vm9 = vmmov %vm9688_vm11 }
 0x4e6   : > { %v6664_v0 = vcombine.low %v4712_v12, %v4753_v58  ;;  %v6665_v53 = vcombine.high %v4712_v12, %v4753_v58  ;;  %v9497_v33 = vrot.slane %v8939_v40, 4  ;;  %v6662_v15 = vcombine.low %v4710_v56, %v4751_v39 }
 0x4e7   : > { %4913 = vrot.lane.b32.xlu1 %v8676_v49, %s9570_s16  ;;  %v6663_v32 = vcombine.high %v4710_v56, %v4751_v39  ;;  %5202 = vrot.lane.b32.xlu0 %v5188_v11, %s9524_s22  ;;  %v4791_v42 = vsel %vm335_vm0, %v4786_v47, %v4787_v57  ;;  %v4829_v50 = vrot.slane %v8937_v43, 4  ;;  %vm9689_vm10 = vcmask 72704  }
 0x4e8   : > { %6171 = vmatprep.subr.bf16.mxu1 %v6665_v53  ;;  %v4793_v11 = vsel %vm335_vm0, %v4787_v57, %v9497_v33  ;;  %v4792_v33 = vsel %vm9690_vm9, %v8712_v16, %v4791_v42  ;;  %vm9691_vm12 = vmmov %vm9689_vm10  ;;  %v4958_v42 = vrot.slane %v8732_v24, 4 }
 0x4e9   : > { %6130 = vmatprep.subr.bf16.mxu0 %v6663_v32  ;;  %v4861_v12 = vpop.permute.xlu0 %4860  ;;  %6172 = vmatpush1.bf16.msra.mxu1 %v6664_v0  ;;  %v4820_v19 = vpop.permute.xlu1 %4819  ;;  %v4794_v56 = vsel %vm9688_vm11, %v4779_v23, %v4793_v11  ;;  %vm9693_vm11 = vcmask 1039360  }
 0x4ea   : > { %v4869_v58 = vrot.slane %v4861_v12, 4  ;;  %6131 = vmatpush1.bf16.msra.mxu0 %v6662_v15  ;;  %v4828_v39 = vrot.slane %v4820_v19, 4  ;;  %vm9695_vm9 = vmmov %vm9693_vm11 }
 0x4eb   : > { %4954 = vrot.lane.b32.xlu1 %v8676_v49, %s9571_s17  ;;  %5243 = vrot.lane.b32.xlu0 %v5229_v34, %s9525_s21 }
 0x4ec   : > { %v4873_v47 = vsel %vm335_vm0, %v4868_v62, %v4869_v58  ;;  %v4832_v53 = vsel %vm335_vm0, %v4827_v4, %v4828_v39  ;;  %v4834_v0 = vsel %vm335_vm0, %v4828_v39, %v4829_v50  ;;  %v5270_v62 = vld [vmem:[#allocation2 + $0x24] sm:$0xf] }
 0x4ed   : > { %v4835_v15 = vsel %vm9689_vm10, %v4820_v19, %v4834_v0  ;;  %v8967_v32 = vpop.permute.xlu0 %4911  ;;  %v8969_v57 = vpop.permute.xlu1 %4862  ;;  %v4833_v34 = vsel %vm9691_vm12, %v8706_v45, %v4832_v53  ;;  %v4874_v23 = vsel %vm9692_vm8, %v8724_v10, %v4873_v47  ;;  %v4917_v45 = vrot.slane %v8718_v52, 4 }
 0x4ee   : > { %v6672_v4 = vcombine.low %v4794_v56, %v4835_v15  ;;  %v6673_v6 = vcombine.high %v4794_v56, %v4835_v15  ;;  %v4870_v20 = vrot.slane %v8969_v57, 4  ;;  %v6670_v19 = vcombine.low %v4792_v33, %v4833_v34 }
 0x4ef   : > { %4995 = vrot.lane.b32.xlu1 %v8676_v49, %s9519_s26  ;;  %v6671_v11 = vcombine.high %v4792_v33, %v4833_v34  ;;  %5284 = vrot.lane.b32.xlu0 %v5270_v62, %s9526_s20  ;;  %v6679_v47 = vcombine.high %v4874_v23, %v8565_v61  ;;  %v5311_v33 = vld [vmem:[#allocation2 + $0x24] sm:$0xf]  ;;  %v4919_v15 = vrot.slane %v8967_v32, 4  ;;  %vm9694_vm10 = vcmask 973824  }
 0x4f0   : > { %v4875_v16 = vsel %vm335_vm0, %v4869_v58, %v4870_v20  ;;  %6173 = vmatprep.subr.bf16.mxu1 %v6673_v6  ;;  %vm9696_vm12 = vmmov %vm9694_vm10 }
 0x4f1   : > { %6132 = vmatprep.subr.bf16.mxu0 %v6671_v11  ;;  %v4951_v39 = vpop.permute.xlu0 %4950  ;;  %6174 = vmatpush1.bf16.msra.mxu1 %v6672_v4  ;;  %v4910_v10 = vpop.permute.xlu1 %4909  ;;  %v4876_v53 = vsel %vm9692_vm8, %v4861_v12, %v4875_v16  ;;  %v6678_v12 = vcombine.low %v4874_v23, %v8565_v61  ;;  %v5352_v16 = vld [vmem:[#allocation2 + $0x24] sm:$0xf]  ;;  %vm9697_vm8 = vcmask 965632  }
 0x4f2   : > { %v4959_v0 = vrot.slane %v4951_v39, 4  ;;  %6133 = vmatpush1.bf16.msra.mxu0 %v6670_v19  ;;  %v4918_v56 = vrot.slane %v4910_v10, 4  ;;  %v6680_v6 = vcombine.low %v4876_v53, %v8617_v46  ;;  %v6681_v58 = vcombine.high %v4876_v53, %v8617_v46 }
 0x4f3   : > { %6134 = vmatprep.subr.bf16.mxu0 %v6679_v47  ;;  %5036 = vrot.lane.b32.xlu1 %v8676_v49, %s9520_s9  ;;  %v5040_v47 = vrot.slane %v8744_v28, 4 }
 0x4f4   : > { %v4963_v34 = vsel %vm335_vm0, %v4958_v42, %v4959_v0  ;;  %v4922_v62 = vsel %vm335_vm0, %v4917_v45, %v4918_v56  ;;  %6175 = vmatprep.subr.bf16.mxu1 %v6681_v58  ;;  %5325 = vrot.lane.b32.xlu0 %v5311_v33, %s9527_s19  ;;  %v4924_v45 = vsel %vm335_vm0, %v4918_v56, %v4919_v15  ;;  %v5393_v58 = vld [vmem:[#allocation2 + $0x24] sm:$0xf] }
 0x4f5   : > { %v8997_v4 = vpop.permute.xlu0 %4993  ;;  %6176 = vmatpush1.bf16.msra.mxu1 %v6680_v6  ;;  %v8999_v19 = vpop.permute.xlu1 %4952  ;;  %v4923_v46 = vsel %vm9693_vm11, %v8718_v52, %v4922_v62  ;;  %v4964_v11 = vsel %vm9694_vm10, %v8732_v24, %v4963_v34  ;;  %v4999_v24 = vrot.slane %v8726_v27, 4  ;;  %v4925_v53 = vsel %vm9695_vm9, %v4910_v10, %v4924_v45  ;;  %vm9699_vm10 = vmmov %vm9697_vm8 }
 0x4f6   : > { %6135 = vmatpush1.bf16.msra.mxu0 %v6678_v12  ;;  %v4960_v61 = vrot.slane %v8999_v19, 4  ;;  %v6686_v23 = vcombine.low %v4923_v46, %v4964_v11  ;;  %v6687_v42 = vcombine.high %v4923_v46, %v4964_v11  ;;  %vm9698_vm11 = vcmask 957440  }
 0x4f7   : > { %5077 = vrot.lane.b32.xlu1 %v8676_v49, %s9521_s25  ;;  %vm9700_vm9 = vmmov %vm9698_vm11 }
 0x4f8   : > { %v4965_v52 = vsel %vm335_vm0, %v4959_v0, %v4960_v61  ;;  %6136 = vmatprep.subr.bf16.mxu0 %v6687_v42  ;;  %5366 = vrot.lane.b32.xlu0 %v5352_v16, %s9572_s12  ;;  %v5001_v0 = vrot.slane %v8997_v4, 4 }
 0x4f9   : > { %v5033_v33 = vpop.permute.xlu0 %5032  ;;  %v4992_v56 = vpop.permute.xlu1 %4991  ;;  %v4966_v6 = vsel %vm9696_vm12, %v4951_v39, %v4965_v52  ;;  %vm9701_vm12 = vcmask 318464  }
 0x4fa   : > { %v5041_v34 = vrot.slane %v5033_v33, 4  ;;  %6137 = vmatpush1.bf16.msra.mxu0 %v6686_v23  ;;  %v5000_v62 = vrot.slane %v4992_v56, 4  ;;  %v6688_v12 = vcombine.low %v4925_v53, %v4966_v6  ;;  %v6689_v46 = vcombine.high %v4925_v53, %v4966_v6 }
 0x4fb   : > { %5118 = vrot.lane.b32.xlu1 %v8676_v49, %s9522_s24 }
 0x4fc   : > { %v5045_v11 = vsel %vm335_vm0, %v5040_v47, %v5041_v34  ;;  %v5004_v16 = vsel %vm335_vm0, %v4999_v24, %v5000_v62  ;;  %6177 = vmatprep.subr.bf16.mxu1 %v6689_v46  ;;  %5407 = vrot.lane.b32.xlu0 %v5393_v58, %s9575_s0  ;;  %v5006_v42 = vsel %vm335_vm0, %v5000_v62, %v5001_v0 }
 0x4fd   : > { %v9025_v10 = vpop.permute.xlu0 %5075  ;;  %6178 = vmatpush1.bf16.msra.mxu1 %v6688_v12  ;;  %v9027_v39 = vpop.permute.xlu1 %5034  ;;  %v5005_v45 = vsel %vm9697_vm8, %v8726_v27, %v5004_v16  ;;  %v5046_v23 = vsel %vm9698_vm11, %v8744_v28, %v5045_v11  ;;  %v5081_v27 = vrot.slane %v8738_v63, 4  ;;  %v5122_v28 = vrot.slane %v8752_v36, 4  ;;  %vm9703_vm11 = vmmov %vm9701_vm12 }
 0x4fe   : > { %v9507_v52 = vrot.slane %v9027_v39, 4  ;;  %v6694_v24 = vcombine.low %v5005_v45, %v5046_v23  ;;  %v6695_v47 = vcombine.high %v5005_v45, %v5046_v23  ;;  %v5007_v6 = vsel %vm9699_vm10, %v4992_v56, %v5006_v42 }
 0x4ff   : > { %5159 = vrot.lane.b32.xlu1 %v8676_v49, %s9523_s23  ;;  %vm9702_vm8 = vcmask 310272  }
 0x500   : > { %v5047_v53 = vsel %vm335_vm0, %v5041_v34, %v9507_v52  ;;  %6138 = vmatprep.subr.bf16.mxu0 %v6695_v47  ;;  %v9501_v34 = vrot.slane %v9025_v10, 4  ;;  %vm9704_vm10 = vmmov %vm9702_vm8 }
 0x501   : > { %v5115_v58 = vpop.permute.xlu0 %5114  ;;  %6139 = vmatpush1.bf16.msra.mxu0 %v6694_v24  ;;  %v5074_v62 = vpop.permute.xlu1 %5073  ;;  %v5048_v12 = vsel %vm9700_vm9, %v5033_v33, %v5047_v53  ;;  %vm9705_vm9 = vcmask 302080  }
 0x502   : > { %v5123_v46 = vrot.slane %v5115_v58, 4  ;;  %v5082_v11 = vrot.slane %v5074_v62, 4  ;;  %v6696_v16 = vcombine.low %v5007_v6, %v5048_v12  ;;  %v6697_v45 = vcombine.high %v5007_v6, %v5048_v12 }
 0x503   : > { %5200 = vrot.lane.b32.xlu1 %v8676_v49, %s9524_s22 }
 0x504   : > { %v5127_v23 = vsel %vm335_vm0, %v5122_v28, %v5123_v46  ;;  %v5086_v47 = vsel %vm335_vm0, %v5081_v27, %v5082_v11  ;;  %6179 = vmatprep.subr.bf16.mxu1 %v6697_v45  ;;  %v5088_v53 = vsel %vm335_vm0, %v5082_v11, %v9501_v34 }
 0x505   : > { %v9051_v56 = vpop.permute.xlu0 %5157  ;;  %6180 = vmatpush1.bf16.msra.mxu1 %v6696_v16  ;;  %v9053_v42 = vpop.permute.xlu1 %5116  ;;  %v5087_v33 = vsel %vm9701_vm12, %v8738_v63, %v5086_v47  ;;  %v5128_v24 = vsel %vm9702_vm8, %v8752_v36, %v5127_v23  ;;  %v5163_v63 = vrot.slane %v8746_v3, 4  ;;  %v5204_v36 = vrot.slane %v8764_v54, 4  ;;  %vm9707_vm8 = vmmov %vm9705_vm9 }
 0x506   : > { %v9502_v28 = vrot.slane %v9053_v42, 4  ;;  %v6702_v6 = vcombine.low %v5087_v33, %v5128_v24  ;;  %v6703_v27 = vcombine.high %v5087_v33, %v5128_v24  ;;  %v5089_v16 = vsel %vm9703_vm11, %v5074_v62, %v5088_v53 }
 0x507   : > { %5241 = vrot.lane.b32.xlu1 %v8676_v49, %s9525_s21  ;;  %vm9706_vm12 = vcmask 236544  }
 0x508   : > { %v5129_v12 = vsel %vm335_vm0, %v5123_v46, %v9502_v28  ;;  %6140 = vmatprep.subr.bf16.mxu0 %v6703_v27  ;;  %v9503_v46 = vrot.slane %v9051_v56, 4  ;;  %vm9708_vm11 = vmmov %vm9706_vm12 }
 0x509   : > { %v5197_v45 = vpop.permute.xlu0 %5196  ;;  %6141 = vmatpush1.bf16.msra.mxu0 %v6702_v6  ;;  %v5156_v11 = vpop.permute.xlu1 %5155  ;;  %v5130_v23 = vsel %vm9704_vm10, %v5115_v58, %v5129_v12  ;;  %vm9709_vm10 = vcmask 228352  }
 0x50a   : > { %v5205_v47 = vrot.slane %v5197_v45, 4  ;;  %v5164_v33 = vrot.slane %v5156_v11, 4  ;;  %v6704_v24 = vcombine.low %v5089_v16, %v5130_v23  ;;  %v6705_v34 = vcombine.high %v5089_v16, %v5130_v23 }
 0x50b   : > { %5282 = vrot.lane.b32.xlu1 %v8676_v49, %s9526_s20 }
 0x50c   : > { %v5209_v27 = vsel %vm335_vm0, %v5204_v36, %v5205_v47  ;;  %v5168_v28 = vsel %vm335_vm0, %v5163_v63, %v5164_v33  ;;  %6181 = vmatprep.subr.bf16.mxu1 %v6705_v34  ;;  %v5170_v12 = vsel %vm335_vm0, %v5164_v33, %v9503_v46 }
 0x50d   : > { %v9077_v62 = vpop.permute.xlu0 %5239  ;;  %6182 = vmatpush1.bf16.msra.mxu1 %v6704_v24  ;;  %v9079_v53 = vpop.permute.xlu1 %5198  ;;  %v5169_v58 = vsel %vm9705_vm9, %v8746_v3, %v5168_v28  ;;  %v5210_v6 = vsel %vm9706_vm12, %v8764_v54, %v5209_v27  ;;  %v5245_v3 = vrot.slane %v8758_v31, 4  ;;  %v5286_v54 = vrot.slane %v8782_v41, 4  ;;  %vm9711_vm12 = vmmov %vm9709_vm10 }
 0x50e   : > { %v9504_v36 = vrot.slane %v9079_v53, 4  ;;  %v6710_v16 = vcombine.low %v5169_v58, %v5210_v6  ;;  %v6711_v63 = vcombine.high %v5169_v58, %v5210_v6  ;;  %v5171_v28 = vsel %vm9707_vm8, %v5156_v11, %v5170_v12 }
 0x50f   : > { %5323 = vrot.lane.b32.xlu1 %v8676_v49, %s9527_s19  ;;  %vm9710_vm9 = vcmask 220160  }
 0x510   : > { %v5211_v34 = vsel %vm335_vm0, %v5205_v47, %v9504_v36  ;;  %6142 = vmatprep.subr.bf16.mxu0 %v6711_v63  ;;  %v9506_v47 = vrot.slane %v9077_v62, 4  ;;  %vm9712_vm8 = vmmov %vm9710_vm9 }
 0x511   : > { %v5279_v23 = vpop.permute.xlu0 %5278  ;;  %6143 = vmatpush1.bf16.msra.mxu0 %v6710_v16  ;;  %v5238_v33 = vpop.permute.xlu1 %5237  ;;  %v5212_v24 = vsel %vm9708_vm11, %v5197_v45, %v5211_v34 }
 0x512   : > { %v5287_v27 = vrot.slane %v5279_v23, 4  ;;  %v5246_v58 = vrot.slane %v5238_v33, 4  ;;  %v6712_v6 = vcombine.low %v5171_v28, %v5212_v24  ;;  %v6713_v46 = vcombine.high %v5171_v28, %v5212_v24 }
 0x513   : > { %5364 = vrot.lane.b32.xlu1 %v8676_v49, %s9572_s12  ;;  %s6752_s12 = sshll.u32 %s9762_s3, 5 }
 0x514   : > { %v5291_v63 = vsel %vm335_vm0, %v5286_v54, %v5287_v27  ;;  %v5250_v36 = vsel %vm335_vm0, %v5245_v3, %v5246_v58  ;;  %6183 = vmatprep.subr.bf16.mxu1 %v6713_v46  ;;  %v5252_v34 = vsel %vm335_vm0, %v5246_v58, %v9506_v47  ;;  %s305_s16 = scalar_lea.vmem %s9763_s15, %s6752_s12 }
 0x515   : > { %v9103_v11 = vpop.permute.xlu0 %5321  ;;  %6184 = vmatpush1.bf16.msra.mxu1 %v6712_v6  ;;  %v9105_v12 = vpop.permute.xlu1 %5280  ;;  %v5251_v45 = vsel %vm9709_vm10, %v8758_v31, %v5250_v36  ;;  %v5292_v16 = vsel %vm9710_vm9, %v8782_v41, %v5291_v63  ;;  %v5539_v31 = vld [vmem:[%s9375_s7] sm:$0xf]  ;;  %v5327_v41 = vrot.slane %v8766_v26, 4  ;;  %v5368_v36 = vrot.slane %v8796_v35, 4 }
 0x516   : > { %v9505_v54 = vrot.slane %v9105_v12, 4  ;;  %v6718_v28 = vcombine.low %v5251_v45, %v5292_v16  ;;  %v6719_v3 = vcombine.high %v5251_v45, %v5292_v16  ;;  %v5253_v24 = vsel %vm9711_vm12, %v5238_v33, %v5252_v34 }
 0x517   : > { %5405 = vrot.lane.b32.xlu1 %v8676_v49, %s9575_s0  ;;  %vm9728_vm10 = vcmask 80896   ;;  %vm9729_vm9 = vcmask 72704  }
 0x518   : > { %v5293_v46 = vsel %vm335_vm0, %v5287_v27, %v9505_v54  ;;  %6144 = vmatprep.subr.bf16.mxu0 %v6719_v3  ;;  %v5329_v3 = vrot.slane %v9103_v11, 4  ;;  %vm9730_vm12 = vmmov %vm9728_vm10 }
 0x519   : > { %v5361_v58 = vpop.permute.xlu0 %5360  ;;  %6145 = vmatpush1.bf16.msra.mxu0 %v6718_v28  ;;  %v5320_v6 = vpop.permute.xlu1 %5319  ;;  %v5294_v49 = vsel %vm9712_vm8, %v5279_v23, %v5293_v46  ;;  %vm9731_vm8 = vmmov %vm9729_vm9 }
 0x51a   : > { %v5369_v63 = vrot.slane %v5361_v58, 4  ;;  %v5328_v45 = vrot.slane %v5320_v6, 4  ;;  %v6720_v16 = vcombine.low %v5253_v24, %v5294_v49  ;;  %v6721_v27 = vcombine.high %v5253_v24, %v5294_v49 }
 0x51b   : > { %5542 = vperm.xlu1 %6798, %v5539_v31   ;;  %v5409_v24 = vrot.slane %v8791_v13, 4 }
 0x51c   : > { %v5373_v54 = vsel %vm335_vm0, %v5368_v36, %v5369_v63  ;;  %v5332_v47 = vsel %vm335_vm0, %v5327_v41, %v5328_v45  ;;  %6185 = vmatprep.subr.bf16.mxu1 %v6721_v27  ;;  %v5334_v28 = vsel %vm335_vm0, %v5328_v45, %v5329_v3 }
 0x51d   : > { %v9130_v52 = vpop.permute.xlu0 %5403  ;;  %6186 = vmatpush1.bf16.msra.mxu1 %v6720_v16  ;;  %v9132_v33 = vpop.permute.xlu1 %5362  ;;  %v5333_v23 = vsel %vm1311_vm15, %v8766_v26, %v5332_v47  ;;  %v5374_v34 = vsel %vm1353_vm14, %v8796_v35, %v5373_v54  ;;  %v5335_v26 = vsel %vm1311_vm15, %v5320_v6, %v5334_v28 }
 0x51e   : > { %v9508_v46 = vrot.slane %v9132_v33, 4  ;;  %v6726_v31 = vcombine.low %v5333_v23, %v5374_v34  ;;  %v6727_v41 = vcombine.high %v5333_v23, %v5374_v34  ;;  %v5411_v49 = vrot.slane %v9130_v52, 4 }
 0x520   : > { %v5375_v36 = vsel %vm335_vm0, %v5369_v63, %v9508_v46  ;;  %6146 = vmatprep.subr.bf16.mxu0 %v6727_v41 }
 0x521   : > { %v4375_v47 = vpop.permute.xlu0 %4374  ;;  %6147 = vmatpush1.bf16.msra.mxu0 %v6726_v31  ;;  %v5402_v35 = vpop.permute.xlu1 %5401  ;;  %v5376_v54 = vsel %vm1353_vm14, %v5361_v58, %v5375_v36 }
 0x522   : > { %v5410_v45 = vrot.slane %v5402_v35, 4  ;;  %v6728_v16 = vcombine.low %v5335_v26, %v5376_v54  ;;  %v6729_v27 = vcombine.high %v5335_v26, %v5376_v54  ;;  %v4380_v54 = vrot.slane %v4375_v47, 4 }
 0x524   : > { %v5414_v23 = vsel %vm335_vm0, %v5409_v24, %v5410_v45  ;;  %v5416_v63 = vsel %vm335_vm0, %v5410_v45, %v5411_v49  ;;  %6187 = vmatprep.subr.bf16.mxu1 %v6729_v27 }
 0x525   : > { %v5417_v34 = vsel %vm1395_vm13, %v5402_v35, %v5416_v63  ;;  %v4416_v6 = vpop.permute.xlu0 %4415  ;;  %6188 = vmatpush1.bf16.msra.mxu1 %v6728_v16  ;;  %v4373_v28 = vpop.permute.xlu1 %4372  ;;  %v5415_v58 = vsel %vm1395_vm13, %v8791_v13, %v5414_v23 }
 0x526   : > { %v6736_v31 = vcombine.low %v5417_v34, %v5417_v34  ;;  %v6737_v41 = vcombine.high %v5417_v34, %v5417_v34  ;;  %v4379_v36 = vrot.slane %v4373_v28, 4  ;;  %v6735_v46 = vcombine.high %v5415_v58, %v5415_v58 }
 0x527   : > { %v6734_v26 = vcombine.low %v5415_v58, %v5415_v58  ;;  %v4421_v27 = vrot.slane %v4416_v6, 4 }
 0x528   : > { %6744 = vmatprep.subr.msk.bf16.mxu1 %vm335_vm0, %v6737_v41  ;;  %v6105_v24 = vsel %vm335_vm0, %v6736_v31, 0  ;;  %6742 = vmatprep.subr.msk.bf16.mxu0 %vm335_vm0, %v6735_v46  ;;  %v4387_v13 = vsel %vm335_vm0, %v4379_v36, %v4380_v54  ;;  %v4385_v47 = vsel %vm335_vm0, %v4378_v8, %v4379_v36 }
 0x529   : > { %v4457_v45 = vpop.permute.xlu0 %4456  ;;  %v6099_v35 = vsel %vm335_vm0, %v6734_v26, 0  ;;  %6190 = vmatpush1.bf16.msra.mxu1 %v6105_v24  ;;  %v4414_v16 = vpop.permute.xlu1 %4413  ;;  %v4388_v34 = vsel %vm337_vm1, %v4373_v28, %v4387_v13  ;;  %v4386_v26 = vsel %vm337_vm1, %v8803_v44, %v4385_v47  ;;  %vm9717_vm1 = vcmask 744448  }
 0x52a   : > { %6149 = vmatpush1.bf16.msra.mxu0 %v6099_v35  ;;  %v4420_v23 = vrot.slane %v4414_v16, 4  ;;  %v4462_v24 = vrot.slane %v4457_v45, 4 }
 0x52c   : > { %v4426_v63 = vsel %vm335_vm0, %v4419_v48, %v4420_v23  ;;  %v4428_v46 = vsel %vm335_vm0, %v4420_v23, %v4421_v27  ;;  %6196 = vmatmul.mubr.bf16.vlgmr.msra.gmra.mrb[16].mxu1 %v8774_v7 }
 0x52d   : > { %v4429_v6 = vsel %vm379_vm2, %v4414_v16, %v4428_v46  ;;  %v4498_v58 = vpop.permute.xlu0 %4497  ;;  %v4455_v31 = vpop.permute.xlu1 %4454  ;;  %v4427_v41 = vsel %vm379_vm2, %v8801_v37, %v4426_v63  ;;  %6155 = vmatmul.mubr.bf16.vlgmr.msra.gmra.mrb[16].mxu0 %v8774_v7  ;;  %6749 = vmatprep.mubr.msk.bf16.mxu1 %vm2072_vm7, %v8780_v55  ;;  %vm9718_vm2 = vcmask 736256  }
 0x52e   : > { %v6636_v8 = vcombine.low %v4388_v34, %v4429_v6  ;;  %v6637_v48 = vcombine.high %v4388_v34, %v4429_v6  ;;  %v4461_v36 = vrot.slane %v4455_v31, 4  ;;  %6747 = vmatprep.mubr.msk.bf16.mxu0 %vm2072_vm7, %v8780_v55  ;;  %v6634_v28 = vcombine.low %v4386_v26, %v4427_v41 }
 0x52f   : > { %v6635_v54 = vcombine.high %v4386_v26, %v4427_v41  ;;  %v4503_v35 = vrot.slane %v4498_v58, 4 }
 0x530   : > { %6245 = vmatprep.subr.bf16.mxu1 %v6637_v48  ;;  %v4469_v16 = vsel %vm335_vm0, %v4461_v36, %v4462_v24  ;;  %v4467_v44 = vsel %vm335_vm0, %v4460_v60, %v4461_v36  ;;  %v9714_v24 = vrot.slane %v8853_v22, 4 }
 0x531   : > { %6204 = vmatprep.subr.bf16.mxu0 %v6635_v54  ;;  %v4539_v37 = vpop.permute.xlu0 %4538  ;;  %6246 = vmatpush1.bf16.msra.mxu1 %v6636_v8  ;;  %v4496_v7 = vpop.permute.xlu1 %4495  ;;  %v4470_v13 = vsel %vm421_vm3, %v4455_v31, %v4469_v16  ;;  %v4468_v60 = vsel %vm421_vm3, %v8827_v18, %v4467_v44  ;;  %vm9719_vm3 = vmmov %vm9718_vm2 }
 0x532   : > { %6205 = vmatpush1.bf16.msra.mxu0 %v6634_v28  ;;  %v4502_v27 = vrot.slane %v4496_v7, 4 }
 0x534   : > { %v4508_v55 = vsel %vm335_vm0, %v4501_v5, %v4502_v27  ;;  %v4510_v45 = vsel %vm335_vm0, %v4502_v27, %v4503_v35  ;;  %v4544_v5 = vrot.slane %v4539_v37, 4 }
 0x535   : > { %v4511_v23 = vsel %vm463_vm4, %v4496_v7, %v4510_v45  ;;  %v4580_v47 = vpop.permute.xlu0 %4579  ;;  %v4537_v63 = vpop.permute.xlu1 %4536  ;;  %v4509_v46 = vsel %vm463_vm4, %v8825_v1, %v4508_v55  ;;  %v9713_v1 = vrot.slane %v8855_v14, 4  ;;  %vm9720_vm4 = vmmov %vm9717_vm1 }
 0x536   : > { %v6644_v34 = vcombine.low %v4470_v13, %v4511_v23  ;;  %v6645_v6 = vcombine.high %v4470_v13, %v4511_v23  ;;  %v4543_v58 = vrot.slane %v4537_v63, 4  ;;  %v6642_v41 = vcombine.low %v4468_v60, %v4509_v46 }
 0x537   : > { %v6643_v8 = vcombine.high %v4468_v60, %v4509_v46  ;;  %v4585_v36 = vrot.slane %v4580_v47, 4 }
 0x538   : > { %6247 = vmatprep.subr.bf16.mxu1 %v6645_v6  ;;  %v4551_v26 = vsel %vm335_vm0, %v4543_v58, %v4544_v5  ;;  %v4549_v54 = vsel %vm335_vm0, %v9713_v1, %v4543_v58  ;;  %v9716_v5 = vrot.slane %v8881_v21, 4 }
 0x539   : > { %6206 = vmatprep.subr.bf16.mxu0 %v6643_v8  ;;  %v4621_v48 = vpop.permute.xlu0 %4620  ;;  %6248 = vmatpush1.bf16.msra.mxu1 %v6644_v34  ;;  %v4578_v31 = vpop.permute.xlu1 %4577  ;;  %v4552_v7 = vsel %vm505_vm5, %v4537_v63, %v4551_v26  ;;  %v4550_v23 = vsel %vm505_vm5, %v8855_v14, %v4549_v54  ;;  %vm9723_vm5 = vcmask 728064  }
 0x53a   : > { %6207 = vmatpush1.bf16.msra.mxu0 %v6642_v41  ;;  %v4584_v28 = vrot.slane %v4578_v31, 4  ;;  %v4626_v34 = vrot.slane %v4621_v48, 4  ;;  %vm9726_vm11 = vmmov %vm9723_vm5 }
 0x53c   : > { %v4590_v18 = vsel %vm335_vm0, %v9714_v24, %v4584_v28  ;;  %v4592_v37 = vsel %vm335_vm0, %v4584_v28, %v4585_v36 }
 0x53d   : > { %v4593_v35 = vsel %vm547_vm6, %v4578_v31, %v4592_v37  ;;  %v4662_v16 = vpop.permute.xlu0 %4661  ;;  %v4619_v27 = vpop.permute.xlu1 %4618  ;;  %v4591_v44 = vsel %vm547_vm6, %v8853_v22, %v4590_v18  ;;  %v9715_v22 = vrot.slane %v8883_v38, 4  ;;  %vm9724_vm6 = vcmask 89088  }
 0x53e   : > { %v6652_v55 = vcombine.low %v4552_v7, %v4593_v35  ;;  %v6653_v45 = vcombine.high %v4552_v7, %v4593_v35  ;;  %v4625_v13 = vrot.slane %v4619_v27, 4  ;;  %v6650_v47 = vcombine.low %v4550_v23, %v4591_v44  ;;  %vm9725_vm7 = vmmov %vm9724_vm6 }
 0x53f   : > { %v6651_v46 = vcombine.high %v4550_v23, %v4591_v44  ;;  %v4667_v58 = vrot.slane %v4662_v16, 4 }
 0x540   : > { %6249 = vmatprep.subr.bf16.mxu1 %v6653_v45  ;;  %v4633_v60 = vsel %vm335_vm0, %v4625_v13, %v4626_v34  ;;  %v4631_v8 = vsel %vm335_vm0, %v9715_v22, %v4625_v13 }
 0x541   : > { %6208 = vmatprep.subr.bf16.mxu0 %v6651_v46  ;;  %v4703_v6 = vpop.permute.xlu0 %4702  ;;  %6250 = vmatpush1.bf16.msra.mxu1 %v6652_v55  ;;  %v4660_v63 = vpop.permute.xlu1 %4659  ;;  %v4634_v31 = vsel %vm9717_vm1, %v4619_v27, %v4633_v60  ;;  %v4632_v37 = vsel %vm9720_vm4, %v8883_v38, %v4631_v8  ;;  %vm9732_vm1 = vcmask 7168   ;;  %vm9735_vm4 = vcmask 973824  }
 0x542   : > { %6209 = vmatpush1.bf16.msra.mxu0 %v6650_v47  ;;  %v4666_v41 = vrot.slane %v4660_v63, 4  ;;  %v4708_v16 = vrot.slane %v4703_v6, 4  ;;  %v9722_v47 = vrot.slane %v8909_v59, 4 }
 0x544   : > { %v4672_v14 = vsel %vm335_vm0, %v9716_v5, %v4666_v41  ;;  %v4674_v48 = vsel %vm335_vm0, %v4666_v41, %v4667_v58 }
 0x545   : > { %v4675_v36 = vsel %vm9718_vm2, %v4660_v63, %v4674_v48  ;;  %v4744_v26 = vpop.permute.xlu0 %4743  ;;  %v4701_v28 = vpop.permute.xlu1 %4700  ;;  %v4673_v1 = vsel %vm9719_vm3, %v8881_v21, %v4672_v14  ;;  %v9721_v21 = vrot.slane %v8911_v25, 4  ;;  %vm9733_vm2 = vmmov %vm9732_vm1  ;;  %vm9734_vm3 = vcmask 1039360  }
 0x546   : > { %v6660_v54 = vcombine.low %v4634_v31, %v4675_v36  ;;  %v6661_v24 = vcombine.high %v4634_v31, %v4675_v36  ;;  %v4707_v18 = vrot.slane %v4701_v28, 4  ;;  %v6658_v7 = vcombine.low %v4632_v37, %v4673_v1 }
 0x547   : > { %v6659_v35 = vcombine.high %v4632_v37, %v4673_v1  ;;  %v4749_v55 = vrot.slane %v4744_v26, 4  ;;  %v9727_v1 = vrot.slane %v8939_v40, 4 }
 0x548   : > { %6251 = vmatprep.subr.bf16.mxu1 %v6661_v24  ;;  %v4715_v45 = vsel %vm335_vm0, %v4707_v18, %v4708_v16  ;;  %v4713_v23 = vsel %vm335_vm0, %v9721_v21, %v4707_v18 }
 0x549   : > { %6210 = vmatprep.subr.bf16.mxu0 %v6659_v35  ;;  %v4785_v44 = vpop.permute.xlu0 %4784  ;;  %6252 = vmatpush1.bf16.msra.mxu1 %v6660_v54  ;;  %v4742_v27 = vpop.permute.xlu1 %4741  ;;  %v4716_v34 = vsel %vm9723_vm5, %v4701_v28, %v4715_v45  ;;  %v4714_v5 = vsel %vm9726_vm11, %v8911_v25, %v4713_v23  ;;  %vm9736_vm5 = vmmov %vm9734_vm3  ;;  %vm9740_vm11 = vcmask 957440  }
 0x54a   : > { %6211 = vmatpush1.bf16.msra.mxu0 %v6658_v7  ;;  %v4748_v13 = vrot.slane %v4742_v27, 4  ;;  %v4790_v14 = vrot.slane %v4785_v44, 4 }
 0x54c   : > { %v4754_v38 = vsel %vm335_vm0, %v9722_v47, %v4748_v13  ;;  %v4756_v46 = vsel %vm335_vm0, %v4748_v13, %v4749_v55 }
 0x54d   : > { %v4757_v6 = vsel %vm9724_vm6, %v4742_v27, %v4756_v46  ;;  %v4826_v63 = vpop.permute.xlu0 %4825  ;;  %v4783_v58 = vpop.permute.xlu1 %4782  ;;  %v4755_v60 = vsel %vm9725_vm7, %v8909_v59, %v4754_v38  ;;  %v4892_v38 = vld [vmem:[#allocation2 + $0x1c] sm:$0xff]  ;;  %vm9737_vm6 = vmmov %vm9735_vm4  ;;  %vm9739_vm7 = vcmask 965632  }
 0x54e   : > { %v6668_v41 = vcombine.low %v4716_v34, %v4757_v6  ;;  %v6669_v22 = vcombine.high %v4716_v34, %v4757_v6  ;;  %v4789_v8 = vrot.slane %v4783_v58, 4  ;;  %v6666_v48 = vcombine.low %v4714_v5, %v4755_v60  ;;  %v4891_v34 = vld [vmem:[#allocation2 + $0x14] sm:$0xff] }
 0x54f   : > { %v6667_v31 = vcombine.high %v4714_v5, %v4755_v60  ;;  %v4831_v28 = vrot.slane %v4826_v63, 4 }
 0x550   : > { %6253 = vmatprep.subr.bf16.mxu1 %v6669_v22  ;;  %v4797_v36 = vsel %vm335_vm0, %v4789_v8, %v4790_v14  ;;  %v4795_v59 = vsel %vm335_vm0, %v9727_v1, %v4789_v8  ;;  %v4962_v8 = vrot.slane %v8630_v30, 4 }
 0x551   : > { %6212 = vmatprep.subr.bf16.mxu0 %v6667_v31  ;;  %6254 = vmatpush1.bf16.msra.mxu1 %v6668_v41  ;;  %v4824_v26 = vpop.permute.xlu1 %4823  ;;  %v4867_v54 = vpop.permute.xlu0 %4866  ;;  %v4798_v18 = vsel %vm9728_vm10, %v4783_v58, %v4797_v36  ;;  %v4796_v44 = vsel %vm9730_vm12, %v8939_v40, %v4795_v59  ;;  %vm9741_vm10 = vmmov %vm9739_vm7  ;;  %vm9745_vm12 = vcmask 318464  }
 0x552   : > { %6213 = vmatpush1.bf16.msra.mxu0 %v6666_v48  ;;  %v4830_v24 = vrot.slane %v4824_v26, 4  ;;  %v4872_v7 = vrot.slane %v4867_v54, 4 }
 0x554   : > { %v4836_v25 = vsel %vm335_vm0, %v4829_v50, %v4830_v24  ;;  %v4838_v37 = vsel %vm335_vm0, %v4830_v24, %v4831_v28 }
 0x555   : > { %v4839_v35 = vsel %vm9729_vm9, %v4824_v26, %v4838_v37  ;;  %v4865_v16 = vpop.permute.xlu1 %4864  ;;  %v4837_v27 = vsel %vm9731_vm8, %v8937_v43, %v4836_v25  ;;  %v5162_v28 = vpop.permute.xlu0 %5161  ;;  %v5044_v37 = vrot.slane %v8640_v2, 4  ;;  %vm9742_vm9 = vmmov %vm9740_vm11  ;;  %vm9746_vm8 = vcmask 310272  }
 0x556   : > { %v6676_v55 = vcombine.low %v4798_v18, %v4839_v35  ;;  %v6677_v45 = vcombine.high %v4798_v18, %v4839_v35  ;;  %v4871_v13 = vrot.slane %v4865_v16, 4  ;;  %v6674_v21 = vcombine.low %v4796_v44, %v4837_v27 }
 0x557   : > { %v6675_v23 = vcombine.high %v4796_v44, %v4837_v27 }
 0x558   : > { %v4877_v50 = vsel %vm335_vm0, %v4870_v20, %v4871_v13  ;;  %v4879_v47 = vsel %vm335_vm0, %v4871_v13, %v4872_v7  ;;  %6255 = vmatprep.subr.bf16.mxu1 %v6677_v45  ;;  %v4921_v20 = vrot.slane %v8626_v51, 4 }
 0x559   : > { %v4880_v46 = vsel %vm9732_vm1, %v4865_v16, %v4879_v47  ;;  %6214 = vmatprep.subr.bf16.mxu0 %v6675_v23  ;;  %6256 = vmatpush1.bf16.msra.mxu1 %v6676_v55  ;;  %v4914_v40 = vpop.permute.xlu1 %4913  ;;  %v4878_v43 = vsel %vm9733_vm2, %v8969_v57, %v4877_v50  ;;  %v5203_v35 = vpop.permute.xlu0 %5202  ;;  %v9738_v16 = vrot.slane %v9027_v39, 4  ;;  %vm9747_vm1 = vmmov %vm9745_vm12 }
 0x55a   : > { %v6684_v6 = vcombine.low %v4880_v46, %v4892_v38  ;;  %v6685_v63 = vcombine.high %v4880_v46, %v4892_v38  ;;  %6215 = vmatpush1.bf16.msra.mxu0 %v6674_v21  ;;  %v4920_v58 = vrot.slane %v4914_v40, 4  ;;  %v6682_v60 = vcombine.low %v4878_v43, %v4891_v34  ;;  %vm9748_vm2 = vmmov %vm9746_vm8 }
 0x55b   : > { %v6683_v41 = vcombine.high %v4878_v43, %v4891_v34  ;;  %v5085_v38 = vrot.slane %v8646_v29, 4  ;;  %v5126_v43 = vrot.slane %v8650_v17, 4  ;;  %v9743_v34 = vrot.slane %v9025_v10, 4 }
 0x55c   : > { %6257 = vmatprep.subr.bf16.mxu1 %v6685_v63  ;;  %v4926_v5 = vsel %vm335_vm0, %v4919_v15, %v4920_v58  ;;  %v4928_v57 = vsel %vm335_vm0, %v4920_v58, %v4921_v20  ;;  %v9744_v63 = vrot.slane %v9053_v42, 4 }
 0x55d   : > { %6216 = vmatprep.subr.bf16.mxu0 %v6683_v41  ;;  %6258 = vmatpush1.bf16.msra.mxu1 %v6684_v6  ;;  %v4955_v22 = vpop.permute.xlu1 %4954  ;;  %v4929_v31 = vsel %vm9734_vm3, %v4914_v40, %v4928_v57  ;;  %v4927_v30 = vsel %vm9736_vm5, %v8967_v32, %v4926_v5  ;;  %v5244_v40 = vpop.permute.xlu0 %5243  ;;  %vm9751_vm3 = vcmask 302080  }
 0x55e   : > { %6217 = vmatpush1.bf16.msra.mxu0 %v6682_v60  ;;  %v4961_v14 = vrot.slane %v4955_v22, 4  ;;  %v5167_v60 = vrot.slane %v5162_v28, 4  ;;  %vm9753_vm5 = vmmov %vm9751_vm3 }
 0x560   : > { %v4967_v48 = vsel %vm335_vm0, %v4960_v61, %v4961_v14  ;;  %v4969_v51 = vsel %vm335_vm0, %v4961_v14, %v4962_v8  ;;  %v5003_v61 = vrot.slane %v8636_v9, 4 }
 0x561   : > { %v4970_v36 = vsel %vm9735_vm4, %v4955_v22, %v4969_v51  ;;  %v4996_v26 = vpop.permute.xlu1 %4995  ;;  %v4968_v15 = vsel %vm9737_vm6, %v8999_v19, %v4967_v48  ;;  %vm9752_vm4 = vcmask 236544  }
 0x562   : > { %v6692_v1 = vcombine.low %v4929_v31, %v4970_v36  ;;  %v6693_v59 = vcombine.high %v4929_v31, %v4970_v36  ;;  %v5002_v54 = vrot.slane %v4996_v26, 4  ;;  %v6690_v24 = vcombine.low %v4927_v30, %v4968_v15  ;;  %v5285_v31 = vpop.permute.xlu0 %5284  ;;  %vm9754_vm6 = vmmov %vm9752_vm4 }
 0x563   : > { %v6691_v18 = vcombine.high %v4927_v30, %v4968_v15  ;;  %v5208_v36 = vrot.slane %v5203_v35, 4  ;;  %v9749_v30 = vrot.slane %v9051_v56, 4 }
 0x564   : > { %6259 = vmatprep.subr.bf16.mxu1 %v6693_v59  ;;  %v5008_v32 = vsel %vm335_vm0, %v5001_v0, %v5002_v54  ;;  %v5010_v19 = vsel %vm335_vm0, %v5002_v54, %v5003_v61  ;;  %v5249_v54 = vrot.slane %v5244_v40, 4 }
 0x565   : > { %6218 = vmatprep.subr.bf16.mxu0 %v6691_v18  ;;  %6260 = vmatpush1.bf16.msra.mxu1 %v6692_v1  ;;  %v5037_v25 = vpop.permute.xlu1 %5036  ;;  %v5011_v27 = vsel %vm9739_vm7, %v4996_v26, %v5010_v19  ;;  %v5009_v45 = vsel %vm9741_vm10, %v8997_v4, %v5008_v32  ;;  %vm9757_vm7 = vcmask 228352  }
 0x566   : > { %6219 = vmatpush1.bf16.msra.mxu0 %v6690_v24  ;;  %v5043_v7 = vrot.slane %v5037_v25, 4  ;;  %v5326_v32 = vpop.permute.xlu0 %5325  ;;  %vm9759_vm10 = vmmov %vm9757_vm7 }
 0x568   : > { %v5049_v44 = vsel %vm335_vm0, %v9738_v16, %v5043_v7  ;;  %v5051_v9 = vsel %vm335_vm0, %v5043_v7, %v5044_v37 }
 0x569   : > { %v5052_v55 = vsel %vm9740_vm11, %v5037_v25, %v5051_v9  ;;  %v5078_v2 = vpop.permute.xlu1 %5077  ;;  %v5050_v0 = vsel %vm9742_vm9, %v9027_v39, %v5049_v44  ;;  %v5290_v9 = vrot.slane %v5285_v31, 4  ;;  %vm9758_vm11 = vcmask 220160  }
 0x56a   : > { %v6700_v13 = vcombine.low %v5011_v27, %v5052_v55  ;;  %v6701_v21 = vcombine.high %v5011_v27, %v5052_v55  ;;  %v5084_v23 = vrot.slane %v5078_v2, 4  ;;  %v6698_v50 = vcombine.low %v5009_v45, %v5050_v0  ;;  %vm9760_vm9 = vmmov %vm9758_vm11 }
 0x56b   : > { %v6699_v47 = vcombine.high %v5009_v45, %v5050_v0  ;;  %v9755_v55 = vrot.slane %v9077_v62, 4  ;;  %v9756_v0 = vrot.slane %v9105_v12, 4 }
 0x56c   : > { %6261 = vmatprep.subr.bf16.mxu1 %v6701_v21  ;;  %v5090_v4 = vsel %vm335_vm0, %v9743_v34, %v5084_v23  ;;  %v5092_v39 = vsel %vm335_vm0, %v5084_v23, %v5085_v38  ;;  %v5331_v23 = vrot.slane %v5326_v32, 4 }
 0x56d   : > { %6220 = vmatprep.subr.bf16.mxu0 %v6699_v47  ;;  %6262 = vmatpush1.bf16.msra.mxu1 %v6700_v13  ;;  %v5119_v46 = vpop.permute.xlu1 %5118  ;;  %v5093_v41 = vsel %vm9745_vm12, %v5078_v2, %v5092_v39  ;;  %v5091_v22 = vsel %vm9747_vm1, %v9025_v10, %v5090_v4 }
 0x56e   : > { %6221 = vmatpush1.bf16.msra.mxu0 %v6698_v50  ;;  %v5125_v6 = vrot.slane %v5119_v46, 4 }
 0x570   : > { %v5131_v58 = vsel %vm335_vm0, %v9744_v63, %v5125_v6  ;;  %v5133_v29 = vsel %vm335_vm0, %v5125_v6, %v5126_v43 }
 0x571   : > { %v5134_v20 = vsel %vm9746_vm8, %v5119_v46, %v5133_v29  ;;  %v5160_v17 = vpop.permute.xlu1 %5159  ;;  %v5132_v8 = vsel %vm9748_vm2, %v9053_v42, %v5131_v58  ;;  %v9750_v42 = vrot.slane %v9079_v53, 4 }
 0x572   : > { %v6708_v5 = vcombine.low %v5093_v41, %v5134_v20  ;;  %v6709_v57 = vcombine.high %v5093_v41, %v5134_v20  ;;  %v5166_v14 = vrot.slane %v5160_v17, 4  ;;  %v6706_v48 = vcombine.low %v5091_v22, %v5132_v8 }
 0x573   : > { %v6707_v51 = vcombine.high %v5091_v22, %v5132_v8 }
 0x574   : > { %6263 = vmatprep.subr.bf16.mxu1 %v6709_v57  ;;  %v5172_v15 = vsel %vm335_vm0, %v9749_v30, %v5166_v14  ;;  %v5174_v10 = vsel %vm335_vm0, %v5166_v14, %v5167_v60 }
 0x575   : > { %6222 = vmatprep.subr.bf16.mxu0 %v6707_v51  ;;  %6264 = vmatpush1.bf16.msra.mxu1 %v6708_v5  ;;  %v5201_v26 = vpop.permute.xlu1 %5200  ;;  %v5175_v24 = vsel %vm9751_vm3, %v5160_v17, %v5174_v10  ;;  %v5173_v25 = vsel %vm9753_vm5, %v9051_v56, %v5172_v15 }
 0x576   : > { %6223 = vmatpush1.bf16.msra.mxu0 %v6706_v48  ;;  %v5207_v28 = vrot.slane %v5201_v26, 4 }
 0x578   : > { %v5213_v1 = vsel %vm335_vm0, %v9750_v42, %v5207_v28  ;;  %v5215_v59 = vsel %vm335_vm0, %v5207_v28, %v5208_v36 }
 0x579   : > { %v5216_v18 = vsel %vm9752_vm4, %v5201_v26, %v5215_v59  ;;  %v5242_v61 = vpop.permute.xlu1 %5241  ;;  %v5214_v37 = vsel %vm9754_vm6, %v9079_v53, %v5213_v1  ;;  %v5367_v53 = vpop.permute.xlu0 %5366 }
 0x57a   : > { %v6716_v19 = vcombine.low %v5175_v24, %v5216_v18  ;;  %v6717_v7 = vcombine.high %v5175_v24, %v5216_v18  ;;  %v5248_v35 = vrot.slane %v5242_v61, 4  ;;  %v6714_v16 = vcombine.low %v5173_v25, %v5214_v37 }
 0x57b   : > { %v6715_v44 = vcombine.high %v5173_v25, %v5214_v37  ;;  %v5372_v63 = vrot.slane %v5367_v53, 4 }
 0x57c   : > { %6265 = vmatprep.subr.bf16.mxu1 %v6717_v7  ;;  %v5254_v2 = vsel %vm335_vm0, %v9755_v55, %v5248_v35  ;;  %v5256_v56 = vsel %vm335_vm0, %v5248_v35, %v5249_v54 }
 0x57d   : > { %6224 = vmatprep.subr.bf16.mxu0 %v6715_v44  ;;  %6266 = vmatpush1.bf16.msra.mxu1 %v6716_v19  ;;  %v5283_v27 = vpop.permute.xlu1 %5282  ;;  %v5257_v50 = vsel %vm9757_vm7, %v5242_v61, %v5256_v56  ;;  %v5255_v46 = vsel %vm9759_vm10, %v9077_v62, %v5254_v2  ;;  %v5408_v29 = vpop.permute.xlu0 %5407 }
 0x57e   : > { %6225 = vmatpush1.bf16.msra.mxu0 %v6714_v16  ;;  %v5289_v45 = vrot.slane %v5283_v27, 4  ;;  %v5413_v22 = vrot.slane %v5408_v29, 4 }
 0x580   : > { %v5295_v13 = vsel %vm335_vm0, %v9756_v0, %v5289_v45  ;;  %v5297_v21 = vsel %vm335_vm0, %v5289_v45, %v5290_v9 }
 0x581   : > { %v5298_v47 = vsel %vm9758_vm11, %v5283_v27, %v5297_v21  ;;  %v5324_v38 = vpop.permute.xlu1 %5323  ;;  %v5296_v40 = vsel %vm9760_vm9, %v9105_v12, %v5295_v13  ;;  %v9761_v12 = vrot.slane %v9132_v33, 4 }
 0x582   : > { %v6724_v43 = vcombine.low %v5257_v50, %v5298_v47  ;;  %v6725_v34 = vcombine.high %v5257_v50, %v5298_v47  ;;  %v5330_v4 = vrot.slane %v5324_v38, 4  ;;  %v6722_v39 = vcombine.low %v5255_v46, %v5296_v40 }
 0x583   : > { %v6723_v6 = vcombine.high %v5255_v46, %v5296_v40 }
 0x584   : > { %6267 = vmatprep.subr.bf16.mxu1 %v6725_v34  ;;  %v5336_v60 = vsel %vm335_vm0, %v5329_v3, %v5330_v4  ;;  %v5338_v62 = vsel %vm335_vm0, %v5330_v4, %v5331_v23 }
 0x585   : > { %6226 = vmatprep.subr.bf16.mxu0 %v6723_v6  ;;  %6268 = vmatpush1.bf16.msra.mxu1 %v6724_v43  ;;  %v5365_v58 = vpop.permute.xlu1 %5364  ;;  %v5339_v8 = vsel %vm1311_vm15, %v5324_v38, %v5338_v62  ;;  %v5337_v14 = vsel %vm1311_vm15, %v9103_v11, %v5336_v60 }
 0x586   : > { %6227 = vmatpush1.bf16.msra.mxu0 %v6722_v39  ;;  %v5371_v41 = vrot.slane %v5365_v58, 4 }
 0x588   : > { %v5377_v20 = vsel %vm335_vm0, %v9761_v12, %v5371_v41  ;;  %v5379_v17 = vsel %vm335_vm0, %v5371_v41, %v5372_v63 }
 0x589   : > { %v5380_v5 = vsel %vm1353_vm14, %v5365_v58, %v5379_v17  ;;  %v5406_v57 = vpop.permute.xlu1 %5405  ;;  %v5378_v3 = vsel %vm1353_vm14, %v9132_v33, %v5377_v20 }
 0x58a   : > { %v6732_v48 = vcombine.low %v5339_v8, %v5380_v5  ;;  %v6733_v51 = vcombine.high %v5339_v8, %v5380_v5  ;;  %v5412_v31 = vrot.slane %v5406_v57, 4  ;;  %v6730_v36 = vcombine.low %v5337_v14, %v5378_v3 }
 0x58b   : > { %v6731_v26 = vcombine.high %v5337_v14, %v5378_v3 }
 0x58c   : > { %v5418_v30 = vsel %vm335_vm0, %v5411_v49, %v5412_v31  ;;  %v5420_v15 = vsel %vm335_vm0, %v5412_v31, %v5413_v22  ;;  %6269 = vmatprep.subr.bf16.mxu1 %v6733_v51 }
 0x58d   : > { %v5421_v10 = vsel %vm1395_vm13, %v5406_v57, %v5420_v15  ;;  %6228 = vmatprep.subr.bf16.mxu0 %v6731_v26  ;;  %6270 = vmatpush1.bf16.msra.mxu1 %v6732_v48  ;;  %v5419_v11 = vsel %vm1395_vm13, %v9130_v52, %v5418_v30  ;;  %v6803_v52 = vld.sshfl [vmem:[%s9374_s6] sm:$0x33 pattern:$0x76325410] }
 0x58e   : > { %v6740_v33 = vcombine.low %v5421_v10, %v5421_v10  ;;  %v6741_v28 = vcombine.high %v5421_v10, %v5421_v10  ;;  %6229 = vmatpush1.bf16.msra.mxu0 %v6730_v36  ;;  %v6739_v42 = vcombine.high %v5419_v11, %v5419_v11  ;;  %v6738_v1 = vcombine.low %v5419_v11, %v5419_v11 }
 0x590   : > { %6746 = vmatprep.subr.msk.bf16.mxu0 %vm335_vm0, %v6739_v42  ;;  %6748 = vmatprep.subr.msk.bf16.mxu1 %vm335_vm0, %v6741_v28  ;;  %v6111_v49 = vsel %vm335_vm0, %v6738_v1, 0  ;;  %v6117_v59 = vsel %vm335_vm0, %v6740_v33, 0 }
 0x591   : > { %6272 = vmatpush1.bf16.msra.mxu1 %v6117_v59 }
 0x592   : > { %6231 = vmatpush1.bf16.msra.mxu0 %v6111_v49 }
 0x594   : > { %6278 = vmatmul.mubr.bf16.vlgmr.msra.gmra.mrb[20].mxu1 %v6803_v52 }
 0x595   : > { %6237 = vmatmul.mubr.bf16.vlgmr.msra.gmra.mrb[20].mxu0 %v6803_v52 }
 0x59a   : > { %v5543_v54 = vpop.permute.xlu1 %5542 }
 0x5ff   : > { %v6197_v24 = vpop.f32.mrb[16].mxu1 }
 0x600   : > { %v6156_v18 = vpop.f32.mrb[16].mxu0  ;;  %v6199_v61 = vpop.f32.mrb[17].mxu1  ;;  %v6198_v25 = vadd.f32 %v6197_v24, %v5543_v54 }
 0x601   : > { %v6158_v37 = vpop.f32.mrb[17].mxu0  ;;  %v6201_v32 = vpop.f32.mrb[18].mxu1  ;;  %v6157_v19 = vadd.f32 %v6156_v18, %v5543_v54  ;;  %v6200_v7 = vadd.f32 %v6199_v61, %v5543_v54 }
 0x602   : > { %v6160_v35 = vpop.f32.mrb[18].mxu0  ;;  %v6202_v16 = vpop.f32.mrb[19].mxu1  ;;  %v6159_v44 = vadd.f32 %v6158_v37, %v5543_v54  ;;  %v6288_v9 = vmax.f32 %v6198_v25, 0.0 }
 0x603   : > { %v6161_v27 = vpop.f32.mrb[19].mxu0  ;;  %v6286_v55 = vmax.f32 %v6157_v19, 0.0  ;;  %v6289_v2 = vmax.f32 %v6200_v7, 0.0 }
 0x604   : > { %v6287_v56 = vmax.f32 %v6159_v44, 0.0 }
 0x605   : > { %v6303_v45 = vcombine.low %v6288_v9, %v6289_v2 }
 0x606   : > { %v6302_v53 = vcombine.low %v6286_v55, %v6287_v56 }
 0x607   : > { %6311 = vst [vmem:[%s305_s16 + $0x8] sm:$0xff] %v6303_v45 }
 0x608   : > { %6310 = vst [vmem:[%s305_s16] sm:$0xff] %v6302_v53 }
 0x667   : > { %v6279_v0 = vpop.f32.mrb[20].mxu1 }
 0x668   : > { %v6238_v13 = vpop.f32.mrb[20].mxu0  ;;  %v6280_v21 = vadd.f32 %v6279_v0, %v5543_v54  ;;  %v6281_v23 = vpop.f32.mrb[21].mxu1 }
 0x669   : > { %v6239_v50 = vadd.f32 %v6238_v13, %v5543_v54  ;;  %v6240_v47 = vpop.f32.mrb[21].mxu0  ;;  %v6282_v38 = vadd.f32 %v6281_v23, %v5543_v54  ;;  %v6283_v46 = vpop.f32.mrb[22].mxu1 }
 0x66a   : > { %v6292_v40 = vmax.f32 %v6280_v21, 0.0  ;;  %v6241_v43 = vadd.f32 %v6240_v47, %v5543_v54  ;;  %v6242_v34 = vpop.f32.mrb[22].mxu0  ;;  %v6284_v4 = vpop.f32.mrb[23].mxu1 }
 0x66b   : > { %v6290_v39 = vmax.f32 %v6239_v50, 0.0  ;;  %v6293_v6 = vmax.f32 %v6282_v38, 0.0  ;;  %v6243_v63 = vpop.f32.mrb[23].mxu0 }
 0x66c   : > { %v6291_v58 = vmax.f32 %v6241_v43, 0.0 }
 0x66d   : > { %v6305_v29 = vcombine.low %v6292_v40, %v6293_v6 }
 0x66e   : > { %v6304_v60 = vcombine.low %v6290_v39, %v6291_v58 }
 0x66f   : > { %6313 = vst [vmem:[%s305_s16 + $0x18] sm:$0xff] %v6305_v29 }
 0x670   : > { %6312 = vst [vmem:[%s305_s16 + $0x10] sm:$0xff] %v6304_v60 }
 0x671 PF: > { %s9764_s17 = sld [smem:[#allocation4_spill]] }
 0x677   : > { %s18_s27 = sadd.s32 1, %s9764_s17  }
 0x678   : > { %p15_p4 = scmp.ge.s32.totalorder %s18_s27, 4  }
 0x67a   :  { %17 = sbr.rel (!%p15_p4) target bundleno = 7 (0x7), region = 82 }

</bundles_post_ra>
